<compile_context>
chip_gen: v7x
topology: tpu7x:2x2x1
jax: 0.10.0
libtpu: 0.0.40
codegen_flags: <defaults>
</compile_context>

<pallas_src>
import functools

import jax
import jax.numpy as jnp
from jax.experimental import pallas as pl
from jax.experimental.pallas import tpu as pltpu


def relu_conv7x1_kernel(x_ref, w_ref, o_ref, col_ref, *, rows, w_pad, kh_taps, pad_h, cin):
    # x_ref   : (rows, Cin)            HW-flattened, channels-last input (NOT H-padded)
    # w_ref   : (KH*Cin, Cout_pad)     im2col weight
    # o_ref   : (rows, Cout_pad)       output
    # col_ref : (rows, KH*Cin)         VMEM im2col scratch
    #
    # Build the im2col matrix: column slot kh holds ReLU(x) shifted by (kh - pad_h) rows
    # of h (i.e. (kh - pad_h) * w_pad flat rows); rows that fall outside the image are the
    # conv's zero halo and are written as zero strips.  Everything is static -> aligned.
    for kh in range(kh_taps):
        d = (kh - pad_h) * w_pad          # flat-row shift for this tap (multiple of 16)
        c0 = kh * cin
        if d < 0:
            nz = -d
            col_ref[0:nz, c0:c0 + cin] = jnp.zeros((nz, cin), jnp.float32)
            col_ref[nz:rows, c0:c0 + cin] = jnp.maximum(x_ref[0:rows - nz, :], 0.0)
        elif d > 0:
            col_ref[rows - d:rows, c0:c0 + cin] = jnp.zeros((d, cin), jnp.float32)
            col_ref[0:rows - d, c0:c0 + cin] = jnp.maximum(x_ref[d:rows, :], 0.0)
        else:
            col_ref[:, c0:c0 + cin] = jnp.maximum(x_ref[...], 0.0)

    # Single fused matmul: (rows, KH*Cin) @ (KH*Cin, Cout_pad)
    o_ref[...] = jnp.dot(
        col_ref[...], w_ref[...], preferred_element_type=jnp.float32
    ).astype(o_ref.dtype)


@jax.jit
def relu_conv2d_7x1(x_nchw, w_oihw):
    """ReLU + Conv2d(kernel=(7,1), stride=1, padding=(3,0), bias=False). NCHW in/out."""
    N, Cin, H, W = x_nchw.shape
    Cout, Cin2, KH, KW = w_oihw.shape
    assert N == 1 and KW == 1 and Cin == Cin2
    pad_h = (KH - 1) // 2

    # Pad W up to a multiple of 8 sublanes so the per-tap row shift is sublane-aligned.
    # Extra zero columns are harmless: ReLU(0)=0, a (7,1) kernel never mixes w columns,
    # and we strip them after the kernel.
    W_pad = ((W + 7) // 8) * 8                    # 12 -> 16
    # Pad Cout to a multiple of 128 lanes -> unmasked, lane-dense output stores.
    Cout_pad = ((Cout + 127) // 128) * 128        # 160 -> 256

    # NCHW -> (H, W_pad, Cin) -> flat (H*W_pad, Cin).  One fused layout copy under jit.
    x_hwc = jnp.transpose(x_nchw[0], (1, 2, 0))
    x_hwc = jnp.pad(x_hwc, ((0, 0), (0, W_pad - W), (0, 0)))
    x_flat = x_hwc.reshape(H * W_pad, Cin)

    # OIHW (Cout, Cin, KH, 1) -> (KH, Cin, Cout) -> im2col (KH*Cin, Cout_pad).
    w_mat = jnp.transpose(w_oihw[:, :, :, 0], (2, 1, 0)).reshape(KH * Cin, Cout)
    w_mat = jnp.pad(w_mat, ((0, 0), (0, Cout_pad - Cout)))

    rows = H * W_pad                              # 192
    k_dim = KH * Cin                              # 1120

    flops = 2 * rows * k_dim * Cout_pad
    bytes_accessed = 4 * (x_flat.size + w_mat.size + rows * Cout_pad)

    out_flat = pl.pallas_call(
        functools.partial(
            relu_conv7x1_kernel,
            rows=rows, w_pad=W_pad, kh_taps=KH, pad_h=pad_h, cin=Cin,
        ),
        out_shape=jax.ShapeDtypeStruct((rows, Cout_pad), x_nchw.dtype),
        grid=(1,),
        in_specs=[
            pl.BlockSpec(x_flat.shape, lambda i: (0, 0)),   # full input slab
            pl.BlockSpec(w_mat.shape, lambda i: (0, 0)),    # full im2col weight
        ],
        out_specs=pl.BlockSpec((rows, Cout_pad), lambda i: (0, 0)),
        scratch_shapes=[pltpu.VMEM((rows, k_dim), jnp.float32)],
        compiler_params=pltpu.CompilerParams(dimension_semantics=("arbitrary",)),
        cost_estimate=pl.CostEstimate(
            flops=flops, transcendentals=0, bytes_accessed=bytes_accessed
        ),
    )(x_flat, w_mat)

    # (H*W_pad, Cout_pad) -> strip W / Cout padding -> NCHW
    out = out_flat.reshape(H, W_pad, Cout_pad)[:, :W, :Cout]
    return jnp.transpose(out, (2, 0, 1))[None]


if __name__ == "__main__":
    key = jax.random.PRNGKey(0)
    kx, kw = jax.random.split(key)

    # Input matching the module's forward: [1, 160, 12, 12]
    x = jax.random.normal(kx, (1, 160, 12, 12), dtype=jnp.float32)

    # Deterministic weight init (PyTorch-like kaiming-uniform bound for Conv2d)
    Cout, Cin, KH, KW = 160, 160, 7, 1
    bound = 1.0 / jnp.sqrt(Cin * KH * KW)
    w = jax.random.uniform(kw, (Cout, Cin, KH, KW), jnp.float32, -bound, bound)

    out = relu_conv2d_7x1(x, w)
    out = jax.block_until_ready(out)

    # Pure-JAX reference for sanity check
    ref = jax.lax.conv_general_dilated(
        jnp.maximum(x, 0.0),
        w,
        window_strides=(1, 1),
        padding=((3, 3), (0, 0)),
        dimension_numbers=("NCHW", "OIHW", "NCHW"),
    )
    assert out.shape == (1, 160, 12, 12)
    err = float(jnp.max(jnp.abs(out - ref)))
    assert jnp.allclose(out, ref, atol=1e-4, rtol=1e-4), err

    print("KERNEL_OK")
</pallas_src>

<mosaic_0001>
module attributes {stable_mosaic.version = 11 : i64} {
  func.func @relu_conv7x1_kernel(%arg0: i32, %arg1: memref<192x160xf32, #tpu.memory_space<vmem>>, %arg2: memref<1120x256xf32, #tpu.memory_space<vmem>>, %arg3: memref<192x256xf32, #tpu.memory_space<vmem>>, %arg4: memref<192x1120xf32, #tpu.memory_space<vmem>>) attributes {dimension_semantics = [#tpu.dimension_semantics<arbitrary>], iteration_bounds = array<i64: 1>, scalar_prefetch = 0 : i64, scratch_operands = 1 : i64, tpu.core_type = #tpu.core_type<tc>, window_params = [{pipeline_mode = #tpu.pipeline_mode<synchronous>, transform_indices = @transform_0, window_bounds = array<i64: 192, 160>}, {pipeline_mode = #tpu.pipeline_mode<synchronous>, transform_indices = @transform_1, window_bounds = array<i64: 1120, 256>}, {pipeline_mode = #tpu.pipeline_mode<synchronous>, transform_indices = @transform_2, window_bounds = array<i64: 192, 256>}]} {
    %cst = arith.constant 0.000000e+00 : f32
    %0 = vector.broadcast %cst : f32 to vector<48x160xf32>
    %c0 = arith.constant 0 : index
    %c0_0 = arith.constant 0 : index
    %1 = vector.load %arg4[%c0, %c0_0] : memref<192x1120xf32, #tpu.memory_space<vmem>>, vector<48x160xf32>
    tpu.vector_store %arg4[%c0, %c0_0], %0 {strides = array<i32>} : memref<192x1120xf32, #tpu.memory_space<vmem>>, vector<48x160xf32>,
    %c0_1 = arith.constant 0 : index
    %c0_2 = arith.constant 0 : index
    %2 = vector.load %arg1[%c0_1, %c0_2] : memref<192x160xf32, #tpu.memory_space<vmem>>, vector<144x160xf32>
    %cst_3 = arith.constant 0.000000e+00 : f32
    %3 = vector.broadcast %cst_3 : f32 to vector<144x160xf32>
    %4 = arith.maximumf %2, %3 : vector<144x160xf32>
    %c48 = arith.constant 48 : index
    %c0_4 = arith.constant 0 : index
    %5 = vector.load %arg4[%c48, %c0_4] : memref<192x1120xf32, #tpu.memory_space<vmem>>, vector<144x160xf32>
    tpu.vector_store %arg4[%c48, %c0_4], %4 {strides = array<i32>} : memref<192x1120xf32, #tpu.memory_space<vmem>>, vector<144x160xf32>,
    %cst_5 = arith.constant 0.000000e+00 : f32
    %6 = vector.broadcast %cst_5 : f32 to vector<32x160xf32>
    %c0_6 = arith.constant 0 : index
    %c160 = arith.constant 160 : index
    %7 = vector.load %arg4[%c0_6, %c160] : memref<192x1120xf32, #tpu.memory_space<vmem>>, vector<32x160xf32>
    tpu.vector_store %arg4[%c0_6, %c160], %6 {strides = array<i32>} : memref<192x1120xf32, #tpu.memory_space<vmem>>, vector<32x160xf32>,
    %c0_7 = arith.constant 0 : index
    %c0_8 = arith.constant 0 : index
    %8 = vector.load %arg1[%c0_7, %c0_8] : memref<192x160xf32, #tpu.memory_space<vmem>>, vector<160x160xf32>
    %cst_9 = arith.constant 0.000000e+00 : f32
    %9 = vector.broadcast %cst_9 : f32 to vector<160x160xf32>
    %10 = arith.maximumf %8, %9 : vector<160x160xf32>
    %c32 = arith.constant 32 : index
    %c160_10 = arith.constant 160 : index
    %11 = vector.load %arg4[%c32, %c160_10] : memref<192x1120xf32, #tpu.memory_space<vmem>>, vector<160x160xf32>
    tpu.vector_store %arg4[%c32, %c160_10], %10 {strides = array<i32>} : memref<192x1120xf32, #tpu.memory_space<vmem>>, vector<160x160xf32>,
    %cst_11 = arith.constant 0.000000e+00 : f32
    %12 = vector.broadcast %cst_11 : f32 to vector<16x160xf32>
    %c0_12 = arith.constant 0 : index
    %c320 = arith.constant 320 : index
    %13 = vector.load %arg4[%c0_12, %c320] : memref<192x1120xf32, #tpu.memory_space<vmem>>, vector<16x160xf32>
    tpu.vector_store %arg4[%c0_12, %c320], %12 {strides = array<i32>} : memref<192x1120xf32, #tpu.memory_space<vmem>>, vector<16x160xf32>,
    %c0_13 = arith.constant 0 : index
    %c0_14 = arith.constant 0 : index
    %14 = vector.load %arg1[%c0_13, %c0_14] : memref<192x160xf32, #tpu.memory_space<vmem>>, vector<176x160xf32>
    %cst_15 = arith.constant 0.000000e+00 : f32
    %15 = vector.broadcast %cst_15 : f32 to vector<176x160xf32>
    %16 = arith.maximumf %14, %15 : vector<176x160xf32>
    %c16 = arith.constant 16 : index
    %c320_16 = arith.constant 320 : index
    %17 = vector.load %arg4[%c16, %c320_16] : memref<192x1120xf32, #tpu.memory_space<vmem>>, vector<176x160xf32>
    tpu.vector_store %arg4[%c16, %c320_16], %16 {strides = array<i32>} : memref<192x1120xf32, #tpu.memory_space<vmem>>, vector<176x160xf32>,
    %c0_17 = arith.constant 0 : index
    %c0_18 = arith.constant 0 : index
    %18 = vector.load %arg1[%c0_17, %c0_18] : memref<192x160xf32, #tpu.memory_space<vmem>>, vector<192x160xf32>
    %cst_19 = arith.constant 0.000000e+00 : f32
    %19 = vector.broadcast %cst_19 : f32 to vector<192x160xf32>
    %20 = arith.maximumf %18, %19 : vector<192x160xf32>
    %c0_20 = arith.constant 0 : index
    %c480 = arith.constant 480 : index
    %21 = vector.load %arg4[%c0_20, %c480] : memref<192x1120xf32, #tpu.memory_space<vmem>>, vector<192x160xf32>
    tpu.vector_store %arg4[%c0_20, %c480], %20 {strides = array<i32>} : memref<192x1120xf32, #tpu.memory_space<vmem>>, vector<192x160xf32>,
    %cst_21 = arith.constant 0.000000e+00 : f32
    %22 = vector.broadcast %cst_21 : f32 to vector<16x160xf32>
    %c176 = arith.constant 176 : index
    %c640 = arith.constant 640 : index
    %23 = vector.load %arg4[%c176, %c640] : memref<192x1120xf32, #tpu.memory_space<vmem>>, vector<16x160xf32>
    tpu.vector_store %arg4[%c176, %c640], %22 {strides = array<i32>} : memref<192x1120xf32, #tpu.memory_space<vmem>>, vector<16x160xf32>,
    %c16_22 = arith.constant 16 : index
    %c0_23 = arith.constant 0 : index
    %24 = vector.load %arg1[%c16_22, %c0_23] : memref<192x160xf32, #tpu.memory_space<vmem>>, vector<176x160xf32>
    %cst_24 = arith.constant 0.000000e+00 : f32
    %25 = vector.broadcast %cst_24 : f32 to vector<176x160xf32>
    %26 = arith.maximumf %24, %25 : vector<176x160xf32>
    %c0_25 = arith.constant 0 : index
    %c640_26 = arith.constant 640 : index
    %27 = vector.load %arg4[%c0_25, %c640_26] : memref<192x1120xf32, #tpu.memory_space<vmem>>, vector<176x160xf32>
    tpu.vector_store %arg4[%c0_25, %c640_26], %26 {strides = array<i32>} : memref<192x1120xf32, #tpu.memory_space<vmem>>, vector<176x160xf32>,
    %cst_27 = arith.constant 0.000000e+00 : f32
    %28 = vector.broadcast %cst_27 : f32 to vector<32x160xf32>
    %c160_28 = arith.constant 160 : index
    %c800 = arith.constant 800 : index
    %29 = vector.load %arg4[%c160_28, %c800] : memref<192x1120xf32, #tpu.memory_space<vmem>>, vector<32x160xf32>
    tpu.vector_store %arg4[%c160_28, %c800], %28 {strides = array<i32>} : memref<192x1120xf32, #tpu.memory_space<vmem>>, vector<32x160xf32>,
    %c32_29 = arith.constant 32 : index
    %c0_30 = arith.constant 0 : index
    %30 = vector.load %arg1[%c32_29, %c0_30] : memref<192x160xf32, #tpu.memory_space<vmem>>, vector<160x160xf32>
    %cst_31 = arith.constant 0.000000e+00 : f32
    %31 = vector.broadcast %cst_31 : f32 to vector<160x160xf32>
    %32 = arith.maximumf %30, %31 : vector<160x160xf32>
    %c0_32 = arith.constant 0 : index
    %c800_33 = arith.constant 800 : index
    %33 = vector.load %arg4[%c0_32, %c800_33] : memref<192x1120xf32, #tpu.memory_space<vmem>>, vector<160x160xf32>
    tpu.vector_store %arg4[%c0_32, %c800_33], %32 {strides = array<i32>} : memref<192x1120xf32, #tpu.memory_space<vmem>>, vector<160x160xf32>,
    %cst_34 = arith.constant 0.000000e+00 : f32
    %34 = vector.broadcast %cst_34 : f32 to vector<48x160xf32>
    %c144 = arith.constant 144 : index
    %c960 = arith.constant 960 : index
    %35 = vector.load %arg4[%c144, %c960] : memref<192x1120xf32, #tpu.memory_space<vmem>>, vector<48x160xf32>
    tpu.vector_store %arg4[%c144, %c960], %34 {strides = array<i32>} : memref<192x1120xf32, #tpu.memory_space<vmem>>, vector<48x160xf32>,
    %c48_35 = arith.constant 48 : index
    %c0_36 = arith.constant 0 : index
    %36 = vector.load %arg1[%c48_35, %c0_36] : memref<192x160xf32, #tpu.memory_space<vmem>>, vector<144x160xf32>
    %cst_37 = arith.constant 0.000000e+00 : f32
    %37 = vector.broadcast %cst_37 : f32 to vector<144x160xf32>
    %38 = arith.maximumf %36, %37 : vector<144x160xf32>
    %c0_38 = arith.constant 0 : index
    %c960_39 = arith.constant 960 : index
    %39 = vector.load %arg4[%c0_38, %c960_39] : memref<192x1120xf32, #tpu.memory_space<vmem>>, vector<144x160xf32>
    tpu.vector_store %arg4[%c0_38, %c960_39], %38 {strides = array<i32>} : memref<192x1120xf32, #tpu.memory_space<vmem>>, vector<144x160xf32>,
    %c0_40 = arith.constant 0 : index
    %c0_41 = arith.constant 0 : index
    %40 = vector.load %arg4[%c0_40, %c0_41] : memref<192x1120xf32, #tpu.memory_space<vmem>>, vector<192x1120xf32>
    %c0_42 = arith.constant 0 : index
    %c0_43 = arith.constant 0 : index
    %41 = vector.load %arg2[%c0_42, %c0_43] : memref<1120x256xf32, #tpu.memory_space<vmem>>, vector<1120x256xf32>
    %cst_44 = arith.constant dense<0.000000e+00> : vector<192x256xf32>
    %42 = tpu.matmul %40, %41, %cst_44 {dimension_numbers = #tpu.dot_dimension_numbers<[1], [0], [0], [1], [0, 0, 1, 1], [], []>} : vector<192x1120xf32>, vector<1120x256xf32>, vector<192x256xf32> -> vector<192x256xf32>
    %c0_45 = arith.constant 0 : index
    %c0_46 = arith.constant 0 : index
    %43 = vector.load %arg3[%c0_45, %c0_46] : memref<192x256xf32, #tpu.memory_space<vmem>>, vector<192x256xf32>
    tpu.vector_store %arg3[%c0_45, %c0_46], %42 {strides = array<i32>} : memref<192x256xf32, #tpu.memory_space<vmem>>, vector<192x256xf32>,
    return
  }
  func.func @transform_0(%arg0: i32) -> (i32, i32) {
    %c0_i32 = arith.constant 0 : i32
    %c0_i32_0 = arith.constant 0 : i32
    %c0_i32_1 = arith.constant 0 : i32
    return %c0_i32, %c0_i32_0 : i32, i32
  }
  func.func @transform_1(%arg0: i32) -> (i32, i32) {
    %c0_i32 = arith.constant 0 : i32
    %c0_i32_0 = arith.constant 0 : i32
    %c0_i32_1 = arith.constant 0 : i32
    return %c0_i32, %c0_i32_0 : i32, i32
  }
  func.func @transform_2(%arg0: i32) -> (i32, i32) {
    %c0_i32 = arith.constant 0 : i32
    %c0_i32_0 = arith.constant 0 : i32
    %c0_i32_1 = arith.constant 0 : i32
    return %c0_i32, %c0_i32_0 : i32, i32
  }
}

</mosaic_0001>

<bundles_post_ra>
// kernel: relu_conv2d_7x1.1
= control target key start
LH: loop header
LB: loop body
LE: loop exit
PB: predicated region body
PF: predicated region fallthrough
CT: control target
= control target key end

     0   :  { %vm444_vm0 = vcmask 785408   ;;  %vm12_vm1 = vcmask 261120   ;;  %v4088_v3 = vmov 0.0   ;;  %vm132_vm2 = vcmask 1047808   ;;  %s4089_s21 = smov 96   ;;  %s4090_s30 = smov 32   ;;  %s7305_s0 = inlined_call_operand.vmem [shape: f32[192,160], index: 0, kind: input, shape index: {}]   ;;  %s7306_s1 = inlined_call_operand.vmem [shape: f32[1120,256], index: 1, kind: input, shape index: {}]   ;;  %s7307_s2 = inlined_call_operand.vmem [shape: f32[192,256], index: 2, kind: output, shape index: {}]  }
   0x1   :  { %v4110_v0 = vld [vmem:[%s7305_s0 + $0x10] sm:$0xff]  ;;  %v4115_v1 = vld [vmem:[%s7305_s0] sm:$0xff]  ;;  %v781_v2 = vld [vmem:[%s7305_s0 + $0x18] sm:$0xff]  ;;  %447 = vst.msk [vmem:[#allocation2 + $0x60] sm:$0xff] %vm444_vm0, %v4088_v3  ;;  %vm1090_vm3 = vcmask 1048320   ;;  %vm134_vm4 = vcmask 523264  }
   0x2   :  { %11 = vst [vmem:[#allocation2] sm:$0xff] %v4088_v3  ;;  %445 = vst.msk [vmem:[#allocation2 + $0x18] sm:$0xff] %vm444_vm0, %v4088_v3  ;;  %v828_v4 = vmax.f32 %v4110_v0, 0.0  ;;  %v826_v5 = vmax.f32 %v4115_v1, 0.0  ;;  %v779_v6 = vld [vmem:[%s7305_s0 + $0x8] sm:$0xff]  ;;  %v782_v7 = vld [vmem:[%s7305_s0 + $0x20] sm:$0xff] }
   0x3   :  { %1584 = vst.msk [vmem:[#allocation2 + $0x550] sm:$0xff] %vm444_vm0, %v4088_v3  ;;  %1586 = vst.msk [vmem:[#allocation2 + $0x598] sm:$0xff] %vm444_vm0, %v4088_v3  ;;  %v4173_v8 = vmax.f32 %v782_v7, 0.0  ;;  %v784_v9 = vld [vmem:[%s7305_s0 + $0x30] sm:$0xff]  ;;  %v829_v10 = vmax.f32 %v781_v2, 0.0  ;;  %v827_v11 = vmax.f32 %v779_v6, 0.0 }
   0x4   :  { %1588 = vst.msk [vmem:[#allocation2 + $0x5e0] sm:$0xff] %vm444_vm0, %v4088_v3  ;;  %1590 = vst.msk [vmem:[#allocation2 + $0x628] sm:$0xff] %vm444_vm0, %v4088_v3  ;;  %926 = vrot.lane.b32.xlu1 %v828_v4, %s4089_s21  ;;  %922 = vrot.lane.b32.xlu0 %v826_v5, %s4089_s21  ;;  %v4184_v12 = vmax.f32 %v784_v9, 0.0  ;;  %v783_v13 = vld [vmem:[%s7305_s0 + $0x28] sm:$0xff]  ;;  %v785_v15 = vld [vmem:[%s7305_s0 + $0x38] sm:$0xff]  ;;  %vm442_vm5 = vcmask 1048064  }
   0x5   :  { %1592 = vst.msk [vmem:[#allocation2 + $0x670] sm:$0xff] %vm444_vm0, %v4088_v3  ;;  %1594 = vst.msk [vmem:[#allocation2 + $0x6b8] sm:$0xff] %vm444_vm0, %v4088_v3  ;;  %2915 = vmatprep.mubr.f32.mxu0 %v4173_v8  ;;  %v831_v14 = vmax.f32 %v783_v13, 0.0  ;;  %v2082_v16 = vld [vmem:[%s7306_s1 + $0x8] sm:$0xff]  ;;  %v2084_v17 = vld [vmem:[%s7306_s1 + $0x18] sm:$0xff]  ;;  %v833_v25 = vmax.f32 %v785_v15, 0.0 }
   0x6   :  { %13 = vst.msk [vmem:[#allocation2 + $0x8] sm:$0xff] %vm12_vm1, %v4088_v3  ;;  %15 = vst.msk [vmem:[#allocation2 + $0x50] sm:$0xff] %vm12_vm1, %v4088_v3  ;;  %v2081_v18 = vld [vmem:[%s7306_s1] sm:$0xff]  ;;  %v2083_v19 = vld [vmem:[%s7306_s1 + $0x10] sm:$0xff]  ;;  %v3554_v21 = vpack.c.bf16 %v2084_v17, %v2082_v16  ;;  %s4091_s20 = smov 64  }
   0x7   :  { %17 = vst.msk [vmem:[#allocation2 + $0x98] sm:$0xff] %vm12_vm1, %v4088_v3  ;;  %19 = vst.msk [vmem:[#allocation2 + $0xe0] sm:$0xff] %vm12_vm1, %v4088_v3  ;;  %v4211_v20 = vld [vmem:[%s7305_s0 + $0x40] sm:$0xff]  ;;  %v3556_v22 = vpack.c.bf16 %v2083_v19, %v2081_v18  ;;  %v2210_v23 = vld [vmem:[%s7306_s1 + $0x408] sm:$0xff] }
   0x8   :  { %21 = vst.msk [vmem:[#allocation2 + $0x128] sm:$0xff] %vm12_vm1, %v4088_v3  ;;  %23 = vst.msk [vmem:[#allocation2 + $0x170] sm:$0xff] %vm12_vm1, %v4088_v3  ;;  %928 = vrot.lane.b32.xlu1 %v829_v10, %s4089_s21  ;;  %924 = vrot.lane.b32.xlu0 %v827_v11, %s4089_s21  ;;  %v2212_v24 = vld [vmem:[%s7306_s1 + $0x418] sm:$0xff]  ;;  %v2209_v27 = vld [vmem:[%s7306_s1 + $0x400] sm:$0xff]  ;;  %v834_v43 = vmax.f32 %v4211_v20, 0.0 }
   0x9   :  { %1140 = vst.msk [vmem:[#allocation2 + $0x660] sm:$0xff] %vm12_vm1, %v4088_v3  ;;  %1142 = vst.msk [vmem:[#allocation2 + $0x6a8] sm:$0xff] %vm12_vm1, %v4088_v3  ;;  %v3682_v26 = vpack.c.bf16 %v2212_v24, %v2210_v23  ;;  %v2211_v28 = vld [vmem:[%s7306_s1 + $0x410] sm:$0xff]  ;;  %3555 = vmatprep.subr.bf16.mxu1 %v3554_v21  ;;  %v2086_v31 = vld [vmem:[%s7306_s1 + $0x28] sm:$0xff] }
   0xa   :  { %133 = vst.msk [vmem:[#allocation2 + $0x8] sm:$0xff] %vm132_vm2, %v4088_v3  ;;  %136 = vst.msk [vmem:[#allocation2 + $0x50] sm:$0xff] %vm132_vm2, %v4088_v3  ;;  %v3684_v30 = vpack.c.bf16 %v2211_v28, %v2209_v27  ;;  %v2088_v32 = vld [vmem:[%s7306_s1 + $0x38] sm:$0xff]  ;;  %v2085_v33 = vld [vmem:[%s7306_s1 + $0x20] sm:$0xff]  ;;  %3557 = vmatpush1.bf16.msra.mxu1 %v3556_v22 }
   0xb   :  { %138 = vst.msk [vmem:[#allocation2 + $0x98] sm:$0xff] %vm132_vm2, %v4088_v3  ;;  %140 = vst.msk [vmem:[#allocation2 + $0xe0] sm:$0xff] %vm132_vm2, %v4088_v3  ;;  %3683 = vmatprep.subr.bf16.mxu0 %v3682_v26  ;;  %v3558_v34 = vpack.c.bf16 %v2088_v32, %v2086_v31  ;;  %v2087_v35 = vld [vmem:[%s7306_s1 + $0x30] sm:$0xff]  ;;  %v2214_v36 = vld [vmem:[%s7306_s1 + $0x428] sm:$0xff] }
   0xc   :  { %1279 = vst.msk [vmem:[#allocation2 + $0x660] sm:$0xff] %vm132_vm2, %v4088_v3  ;;  %1281 = vst.msk [vmem:[#allocation2 + $0x6a8] sm:$0xff] %vm132_vm2, %v4088_v3  ;;  %932 = vrot.lane.b32.xlu1 %v831_v14, %s4089_s21  ;;  %930 = vrot.lane.b32.xlu0 %v4173_v8, %s4089_s21  ;;  %v2216_v37 = vld [vmem:[%s7306_s1 + $0x438] sm:$0xff]  ;;  %v787_v38 = vld [vmem:[%s7305_s0 + $0x48] sm:$0xff]  ;;  %v3560_v39 = vpack.c.bf16 %v2087_v35, %v2085_v33 }
   0xd   :  { %1233 = vst [vmem:[#allocation2 + $0x70] sm:$0xff] %v4184_v12  ;;  %3685 = vmatpush1.bf16.msra.mxu0 %v3684_v30  ;;  %v3686_v40 = vpack.c.bf16 %v2216_v37, %v2214_v36  ;;  %v2213_v41 = vld [vmem:[%s7306_s1 + $0x420] sm:$0xff]  ;;  %v2215_v42 = vld [vmem:[%s7306_s1 + $0x430] sm:$0xff]  ;;  %v2090_v45 = vld [vmem:[%s7306_s1 + $0x48] sm:$0xff]  ;;  %3559 = vmatprep.subr.bf16.mxu1 %v3558_v34  ;;  %v835_v59 = vmax.f32 %v787_v38, 0.0 }
   0xe   :  { %v3688_v44 = vpack.c.bf16 %v2215_v42, %v2213_v41  ;;  %v2092_v46 = vld [vmem:[%s7306_s1 + $0x58] sm:$0xff]  ;;  %v2089_v48 = vld [vmem:[%s7306_s1 + $0x40] sm:$0xff]  ;;  %v2091_v49 = vld [vmem:[%s7306_s1 + $0x50] sm:$0xff]  ;;  %3561 = vmatpush1.bf16.msra.mxu1 %v3560_v39 }
   0xf   :  { %3687 = vmatprep.subr.bf16.mxu0 %v3686_v40  ;;  %v3562_v47 = vpack.c.bf16 %v2092_v46, %v2090_v45  ;;  %v2218_v50 = vld [vmem:[%s7306_s1 + $0x448] sm:$0xff]  ;;  %v3564_v51 = vpack.c.bf16 %v2091_v49, %v2089_v48  ;;  %v2220_v52 = vld [vmem:[%s7306_s1 + $0x458] sm:$0xff]  ;;  %v4283_v54 = vld [vmem:[%s7305_s0 + $0x50] sm:$0xff] }
  0x10   :  { %936 = vrot.lane.b32.xlu1 %v833_v25, %s4089_s21  ;;  %934 = vrot.lane.b32.xlu0 %v4184_v12, %s4089_s21  ;;  %v789_v53 = vld [vmem:[%s7305_s0 + $0x58] sm:$0xff]  ;;  %v3690_v55 = vpack.c.bf16 %v2220_v52, %v2218_v50  ;;  %v2217_v56 = vld [vmem:[%s7306_s1 + $0x440] sm:$0xff]  ;;  %v836_v17 = vmax.f32 %v4283_v54, 0.0 }
  0x11   :  { %v1866_v29 = vld [vmem:[#allocation2 + $0x8] sm:$0xff]  ;;  %3689 = vmatpush1.bf16.msra.mxu0 %v3688_v44  ;;  %3563 = vmatprep.subr.bf16.mxu1 %v3562_v47  ;;  %v2219_v57 = vld [vmem:[%s7306_s1 + $0x450] sm:$0xff]  ;;  %v2096_v61 = vld [vmem:[%s7306_s1 + $0x78] sm:$0xff]  ;;  %v837_v16 = vmax.f32 %v789_v53, 0.0 }
  0x12   :  { %2497 = vmatprep.mubr.f32.mxu1 %v1866_v29  ;;  %v2094_v58 = vld [vmem:[%s7306_s1 + $0x68] sm:$0xff]  ;;  %v3692_v60 = vpack.c.bf16 %v2219_v57, %v2217_v56  ;;  %v2093_v62 = vld [vmem:[%s7306_s1 + $0x60] sm:$0xff]  ;;  %3691 = vmatprep.subr.bf16.mxu0 %v3690_v55  ;;  %v2095_v2 = vld [vmem:[%s7306_s1 + $0x70] sm:$0xff] }
  0x13   :  { %v3566_v63 = vpack.c.bf16 %v2096_v61, %v2094_v58  ;;  %v2222_v1 = vld [vmem:[%s7306_s1 + $0x468] sm:$0xff]  ;;  %3565 = vmatpush1.bf16.msra.mxu1 %v3564_v51  ;;  %v3568_v6 = vpack.c.bf16 %v2095_v2, %v2093_v62  ;;  %v2221_v9 = vld [vmem:[%s7306_s1 + $0x460] sm:$0xff]  ;;  %v2223_v10 = vld [vmem:[%s7306_s1 + $0x470] sm:$0xff] }
  0x14   :  { %938 = vrot.lane.b32.xlu1 %v834_v43, %s4089_s21  ;;  %262 = vrot.lane.b32.xlu0 %v826_v5, %s4090_s30  ;;  %v2224_v5 = vld [vmem:[%s7306_s1 + $0x478] sm:$0xff]  ;;  %v3696_v11 = vpack.c.bf16 %v2223_v10, %v2221_v9  ;;  %v2098_v13 = vld [vmem:[%s7306_s1 + $0x88] sm:$0xff] }
  0x15   :  { %v3694_v7 = vpack.c.bf16 %v2224_v5, %v2222_v1  ;;  %3693 = vmatpush1.bf16.msra.mxu0 %v3692_v60  ;;  %3567 = vmatprep.subr.bf16.mxu1 %v3566_v63  ;;  %v2100_v14 = vld [vmem:[%s7306_s1 + $0x98] sm:$0xff]  ;;  %v2097_v15 = vld [vmem:[%s7306_s1 + $0x80] sm:$0xff]  ;;  %v2099_v19 = vld [vmem:[%s7306_s1 + $0x90] sm:$0xff] }
  0x16   :  { %v3570_v18 = vpack.c.bf16 %v2100_v14, %v2098_v13  ;;  %v2226_v21 = vld [vmem:[%s7306_s1 + $0x488] sm:$0xff]  ;;  %v4344_v22 = vld [vmem:[%s7305_s0 + $0x60] sm:$0xff]  ;;  %v2228_v0 = vld [vmem:[%s7306_s1 + $0x498] sm:$0xff]  ;;  %v3572_v23 = vpack.c.bf16 %v2099_v19, %v2097_v15 }
  0x17   :  { %3695 = vmatprep.subr.bf16.mxu0 %v3694_v7  ;;  %3569 = vmatpush1.bf16.msra.mxu1 %v3568_v6  ;;  %v3698_v24 = vpack.c.bf16 %v2228_v0, %v2226_v21  ;;  %v2227_v25 = vld [vmem:[%s7306_s1 + $0x490] sm:$0xff]  ;;  %v2102_v26 = vld [vmem:[%s7306_s1 + $0xa8] sm:$0xff]  ;;  %v2104_v27 = vld [vmem:[%s7306_s1 + $0xb8] sm:$0xff]  ;;  %v838_v33 = vmax.f32 %v4344_v22, 0.0 }
  0x18   :  { %266 = vrot.lane.b32.xlu1 %v828_v4, %s4090_s30  ;;  %940 = vrot.lane.b32.xlu0 %v835_v59, %s4089_s21  ;;  %v2225_v4 = vld [vmem:[%s7306_s1 + $0x480] sm:$0xff]  ;;  %v3574_v29 = vpack.c.bf16 %v2104_v27, %v2102_v26  ;;  %v2103_v31 = vld [vmem:[%s7306_s1 + $0xb0] sm:$0xff] }
  0x19   :  { %3697 = vmatpush1.bf16.msra.mxu0 %v3696_v11  ;;  %3571 = vmatprep.subr.bf16.mxu1 %v3570_v18  ;;  %v3700_v28 = vpack.c.bf16 %v2227_v25, %v2225_v4  ;;  %v2101_v30 = vld [vmem:[%s7306_s1 + $0xa0] sm:$0xff]  ;;  %v2230_v32 = vld [vmem:[%s7306_s1 + $0x4a8] sm:$0xff]  ;;  %v2232_v34 = vld [vmem:[%s7306_s1 + $0x4b8] sm:$0xff] }
  0x1a   :  { %v791_v35 = vld [vmem:[%s7305_s0 + $0x68] sm:$0xff]  ;;  %3699 = vmatprep.subr.bf16.mxu0 %v3698_v24  ;;  %v3702_v36 = vpack.c.bf16 %v2232_v34, %v2230_v32  ;;  %v2229_v37 = vld [vmem:[%s7306_s1 + $0x4a0] sm:$0xff]  ;;  %v2231_v38 = vld [vmem:[%s7306_s1 + $0x4b0] sm:$0xff]  ;;  %v3576_v39 = vpack.c.bf16 %v2103_v31, %v2101_v30 }
  0x1b   :  { %3573 = vmatpush1.bf16.msra.mxu1 %v3572_v23  ;;  %v2106_v40 = vld [vmem:[%s7306_s1 + $0xc8] sm:$0xff]  ;;  %v2108_v41 = vld [vmem:[%s7306_s1 + $0xd8] sm:$0xff]  ;;  %v2105_v42 = vld [vmem:[%s7306_s1 + $0xc0] sm:$0xff]  ;;  %v3704_v45 = vpack.c.bf16 %v2231_v38, %v2229_v37  ;;  %v839_v50 = vmax.f32 %v791_v35, 0.0 }
  0x1c   :  { %944 = vrot.lane.b32.xlu1 %v837_v16, %s4089_s21  ;;  %942 = vrot.lane.b32.xlu0 %v836_v17, %s4089_s21  ;;  %v793_v44 = vld [vmem:[%s7305_s0 + $0x78] sm:$0xff]  ;;  %v3578_v46 = vpack.c.bf16 %v2108_v41, %v2106_v40  ;;  %v2107_v47 = vld [vmem:[%s7306_s1 + $0xd0] sm:$0xff] }
  0x1d   :  { %3701 = vmatpush1.bf16.msra.mxu0 %v3700_v28  ;;  %3575 = vmatprep.subr.bf16.mxu1 %v3574_v29  ;;  %v2234_v48 = vld [vmem:[%s7306_s1 + $0x4c8] sm:$0xff]  ;;  %v2236_v49 = vld [vmem:[%s7306_s1 + $0x4d8] sm:$0xff]  ;;  %v4416_v51 = vld [vmem:[%s7305_s0 + $0x70] sm:$0xff]  ;;  %v3580_v57 = vpack.c.bf16 %v2107_v47, %v2105_v42  ;;  %v841_v1 = vmax.f32 %v793_v44, 0.0 }
  0x1e   :  { %v2233_v52 = vld [vmem:[%s7306_s1 + $0x4c0] sm:$0xff]  ;;  %3703 = vmatprep.subr.bf16.mxu0 %v3702_v36  ;;  %v3706_v53 = vpack.c.bf16 %v2236_v49, %v2234_v48  ;;  %v2235_v55 = vld [vmem:[%s7306_s1 + $0x4d0] sm:$0xff]  ;;  %v2112_v56 = vld [vmem:[%s7306_s1 + $0xf8] sm:$0xff]  ;;  %v840_v5 = vmax.f32 %v4416_v51, 0.0 }
  0x1f   :  { %3577 = vmatpush1.bf16.msra.mxu1 %v3576_v39  ;;  %v2109_v58 = vld [vmem:[%s7306_s1 + $0xe0] sm:$0xff]  ;;  %v2238_v59 = vld [vmem:[%s7306_s1 + $0x4e8] sm:$0xff]  ;;  %v3708_v60 = vpack.c.bf16 %v2235_v55, %v2233_v52  ;;  %v2111_v62 = vld [vmem:[%s7306_s1 + $0xf0] sm:$0xff] }
  0x20   :  { %946 = vrot.lane.b32.xlu1 %v838_v33, %s4089_s21  ;;  %270 = vrot.lane.b32.xlu0 %v4173_v8, %s4090_s30  ;;  %v2110_v8 = vld [vmem:[%s7306_s1 + $0xe8] sm:$0xff]  ;;  %v2240_v63 = vld [vmem:[%s7306_s1 + $0x4f8] sm:$0xff]  ;;  %v3584_v11 = vpack.c.bf16 %v2111_v62, %v2109_v58 }
  0x21   :  { %3705 = vmatpush1.bf16.msra.mxu0 %v3704_v45  ;;  %3579 = vmatprep.subr.bf16.mxu1 %v3578_v46  ;;  %v3582_v61 = vpack.c.bf16 %v2112_v56, %v2110_v8  ;;  %v2237_v2 = vld [vmem:[%s7306_s1 + $0x4e0] sm:$0xff]  ;;  %v2239_v6 = vld [vmem:[%s7306_s1 + $0x4f0] sm:$0xff]  ;;  %v2114_v7 = vld [vmem:[%s7306_s1 + $0x108] sm:$0xff] }
  0x22   :  { %v4458_v9 = vld [vmem:[%s7305_s0 + $0x80] sm:$0xff]  ;;  %3707 = vmatprep.subr.bf16.mxu0 %v3706_v53  ;;  %v2116_v10 = vld [vmem:[%s7306_s1 + $0x118] sm:$0xff]  ;;  %v2242_v14 = vld [vmem:[%s7306_s1 + $0x508] sm:$0xff]  ;;  %v3712_v16 = vpack.c.bf16 %v2239_v6, %v2237_v2 }
  0x23   :  { %3581 = vmatpush1.bf16.msra.mxu1 %v3580_v57  ;;  %v2113_v13 = vld [vmem:[%s7306_s1 + $0x100] sm:$0xff]  ;;  %v2244_v15 = vld [vmem:[%s7306_s1 + $0x518] sm:$0xff]  ;;  %v3586_v18 = vpack.c.bf16 %v2116_v10, %v2114_v7  ;;  %v2115_v19 = vld [vmem:[%s7306_s1 + $0x110] sm:$0xff]  ;;  %v842_v4 = vmax.f32 %v4458_v9, 0.0 }
  0x24   :  { %274 = vrot.lane.b32.xlu1 %v4184_v12, %s4090_s30  ;;  %948 = vrot.lane.b32.xlu0 %v839_v50, %s4089_s21  ;;  %v3710_v12 = vpack.c.bf16 %v2240_v63, %v2238_v59  ;;  %v2241_v21 = vld [vmem:[%s7306_s1 + $0x500] sm:$0xff]  ;;  %v2243_v0 = vld [vmem:[%s7306_s1 + $0x510] sm:$0xff]  ;;  %v3714_v26 = vpack.c.bf16 %v2244_v15, %v2242_v14  ;;  %v3588_v27 = vpack.c.bf16 %v2115_v19, %v2113_v13 }
  0x25   :  { %3709 = vmatpush1.bf16.msra.mxu0 %v3708_v60  ;;  %3583 = vmatprep.subr.bf16.mxu1 %v3582_v61  ;;  %v2118_v23 = vld [vmem:[%s7306_s1 + $0x128] sm:$0xff]  ;;  %v2120_v24 = vld [vmem:[%s7306_s1 + $0x138] sm:$0xff]  ;;  %v2117_v28 = vld [vmem:[%s7306_s1 + $0x120] sm:$0xff]  ;;  %v3716_v31 = vpack.c.bf16 %v2243_v0, %v2241_v21 }
  0x26   :  { %v795_v25 = vld [vmem:[%s7305_s0 + $0x88] sm:$0xff]  ;;  %3711 = vmatprep.subr.bf16.mxu0 %v3710_v12  ;;  %v2248_v30 = vld [vmem:[%s7306_s1 + $0x538] sm:$0xff]  ;;  %v3590_v32 = vpack.c.bf16 %v2120_v24, %v2118_v23  ;;  %v2119_v34 = vld [vmem:[%s7306_s1 + $0x130] sm:$0xff] }
  0x27   :  { %3585 = vmatpush1.bf16.msra.mxu1 %v3584_v11  ;;  %v2246_v29 = vld [vmem:[%s7306_s1 + $0x528] sm:$0xff]  ;;  %v2245_v35 = vld [vmem:[%s7306_s1 + $0x520] sm:$0xff]  ;;  %v2247_v36 = vld [vmem:[%s7306_s1 + $0x530] sm:$0xff]  ;;  %v843_v37 = vmax.f32 %v795_v25, 0.0 }
  0x28   :  { %952 = vrot.lane.b32.xlu1 %v841_v1, %s4089_s21  ;;  %950 = vrot.lane.b32.xlu0 %v840_v5, %s4089_s21  ;;  %v2122_v38 = vld [vmem:[%s7306_s1 + $0x148] sm:$0xff]  ;;  %v2124_v39 = vld [vmem:[%s7306_s1 + $0x158] sm:$0xff]  ;;  %v3718_v20 = vpack.c.bf16 %v2248_v30, %v2246_v29  ;;  %v3720_v46 = vpack.c.bf16 %v2247_v36, %v2245_v35 }
  0x29   :  { %3713 = vmatpush1.bf16.msra.mxu0 %v3712_v16  ;;  %3587 = vmatprep.subr.bf16.mxu1 %v3586_v18  ;;  %v797_v40 = vld [vmem:[%s7305_s0 + $0x98] sm:$0xff]  ;;  %v4531_v41 = vld [vmem:[%s7305_s0 + $0x90] sm:$0xff]  ;;  %v2121_v42 = vld [vmem:[%s7306_s1 + $0x140] sm:$0xff]  ;;  %v3594_v47 = vpack.c.bf16 %v2124_v39, %v2122_v38 }
  0x2a   :  { %3715 = vmatprep.subr.bf16.mxu0 %v3714_v26  ;;  %v2250_v44 = vld [vmem:[%s7306_s1 + $0x548] sm:$0xff]  ;;  %v2252_v45 = vld [vmem:[%s7306_s1 + $0x558] sm:$0xff]  ;;  %v2123_v48 = vld [vmem:[%s7306_s1 + $0x150] sm:$0xff]  ;;  %v845_v52 = vmax.f32 %v797_v40, 0.0  ;;  %v844_v53 = vmax.f32 %v4531_v41, 0.0 }
  0x2b   :  { %3589 = vmatpush1.bf16.msra.mxu1 %v3588_v27  ;;  %v2249_v49 = vld [vmem:[%s7306_s1 + $0x540] sm:$0xff]  ;;  %v2251_v50 = vld [vmem:[%s7306_s1 + $0x550] sm:$0xff]  ;;  %v2126_v55 = vld [vmem:[%s7306_s1 + $0x168] sm:$0xff]  ;;  %v3722_v54 = vpack.c.bf16 %v2252_v45, %v2250_v44 }
  0x2c   :  { %954 = vrot.lane.b32.xlu1 %v842_v4, %s4089_s21  ;;  %278 = vrot.lane.b32.xlu0 %v834_v43, %s4090_s30  ;;  %v3592_v43 = vpack.c.bf16 %v2119_v34, %v2117_v28  ;;  %v2128_v8 = vld [vmem:[%s7306_s1 + $0x178] sm:$0xff]  ;;  %v4565_v56 = vld [vmem:[%s7305_s0 + $0xa0] sm:$0xff]  ;;  %v3724_v60 = vpack.c.bf16 %v2251_v50, %v2249_v49 }
  0x2d   :  { %3717 = vmatpush1.bf16.msra.mxu0 %v3716_v31  ;;  %3591 = vmatprep.subr.bf16.mxu1 %v3590_v32  ;;  %v2125_v57 = vld [vmem:[%s7306_s1 + $0x160] sm:$0xff]  ;;  %v2254_v58 = vld [vmem:[%s7306_s1 + $0x568] sm:$0xff]  ;;  %v2256_v59 = vld [vmem:[%s7306_s1 + $0x578] sm:$0xff]  ;;  %v3598_v61 = vpack.c.bf16 %v2128_v8, %v2126_v55  ;;  %v846_v1 = vmax.f32 %v4565_v56, 0.0 }
  0x2e   :  { %3719 = vmatprep.subr.bf16.mxu0 %v3718_v20  ;;  %v2127_v62 = vld [vmem:[%s7306_s1 + $0x170] sm:$0xff]  ;;  %v2253_v63 = vld [vmem:[%s7306_s1 + $0x560] sm:$0xff]  ;;  %v2130_v6 = vld [vmem:[%s7306_s1 + $0x188] sm:$0xff]  ;;  %v3726_v10 = vpack.c.bf16 %v2256_v59, %v2254_v58 }
  0x2f   :  { %3593 = vmatpush1.bf16.msra.mxu1 %v3592_v43  ;;  %v2255_v2 = vld [vmem:[%s7306_s1 + $0x570] sm:$0xff]  ;;  %v2132_v7 = vld [vmem:[%s7306_s1 + $0x198] sm:$0xff]  ;;  %v799_v12 = vld [vmem:[%s7305_s0 + $0xa8] sm:$0xff]  ;;  %v3600_v11 = vpack.c.bf16 %v2127_v62, %v2125_v57 }
  0x30   :  { %282 = vrot.lane.b32.xlu1 %v836_v17, %s4090_s30  ;;  %956 = vrot.lane.b32.xlu0 %v843_v37, %s4089_s21  ;;  %v3596_v17 = vpack.c.bf16 %v2123_v48, %v2121_v42  ;;  %v2129_v13 = vld [vmem:[%s7306_s1 + $0x180] sm:$0xff]  ;;  %v2258_v14 = vld [vmem:[%s7306_s1 + $0x588] sm:$0xff]  ;;  %v3728_v16 = vpack.c.bf16 %v2255_v2, %v2253_v63  ;;  %v3602_v18 = vpack.c.bf16 %v2132_v7, %v2130_v6  ;;  %v847_v23 = vmax.f32 %v799_v12, 0.0 }
  0x31   :  { %3721 = vmatpush1.bf16.msra.mxu0 %v3720_v46  ;;  %3595 = vmatprep.subr.bf16.mxu1 %v3594_v47  ;;  %v2260_v15 = vld [vmem:[%s7306_s1 + $0x598] sm:$0xff]  ;;  %v2131_v19 = vld [vmem:[%s7306_s1 + $0x190] sm:$0xff]  ;;  %v2257_v21 = vld [vmem:[%s7306_s1 + $0x580] sm:$0xff] }
  0x32   :  { %3723 = vmatprep.subr.bf16.mxu0 %v3722_v54  ;;  %v2259_v0 = vld [vmem:[%s7306_s1 + $0x590] sm:$0xff]  ;;  %v2134_v24 = vld [vmem:[%s7306_s1 + $0x1a8] sm:$0xff]  ;;  %v2136_v25 = vld [vmem:[%s7306_s1 + $0x1b8] sm:$0xff]  ;;  %v3730_v22 = vpack.c.bf16 %v2260_v15, %v2258_v14 }
  0x33   :  { %3597 = vmatpush1.bf16.msra.mxu1 %v3596_v17  ;;  %v801_v26 = vld [vmem:[%s7305_s0 + $0xb8] sm:$0xff]  ;;  %v4635_v27 = vld [vmem:[%s7305_s0 + $0xb0] sm:$0xff]  ;;  %v2133_v28 = vld [vmem:[%s7306_s1 + $0x1a0] sm:$0xff]  ;;  %v3732_v31 = vpack.c.bf16 %v2259_v0, %v2257_v21  ;;  %v3606_v32 = vpack.c.bf16 %v2136_v25, %v2134_v24 }
  0x34   :  { %960 = vrot.lane.b32.xlu1 %v845_v52, %s4089_s21  ;;  %958 = vrot.lane.b32.xlu0 %v844_v53, %s4089_s21  ;;  %v2262_v29 = vld [vmem:[%s7306_s1 + $0x5a8] sm:$0xff]  ;;  %v2264_v30 = vld [vmem:[%s7306_s1 + $0x5b8] sm:$0xff]  ;;  %v849_v37 = vmax.f32 %v801_v26, 0.0  ;;  %v848_v38 = vmax.f32 %v4635_v27, 0.0 }
  0x35   :  { %3725 = vmatpush1.bf16.msra.mxu0 %v3724_v60  ;;  %3599 = vmatprep.subr.bf16.mxu1 %v3598_v61  ;;  %v2135_v34 = vld [vmem:[%s7306_s1 + $0x1b0] sm:$0xff]  ;;  %v2261_v35 = vld [vmem:[%s7306_s1 + $0x5a0] sm:$0xff]  ;;  %v2138_v39 = vld [vmem:[%s7306_s1 + $0x1c8] sm:$0xff]  ;;  %v3734_v51 = vpack.c.bf16 %v2264_v30, %v2262_v29 }
  0x36   :  { %3727 = vmatprep.subr.bf16.mxu0 %v3726_v10  ;;  %v2263_v36 = vld [vmem:[%s7306_s1 + $0x5b0] sm:$0xff]  ;;  %v2140_v40 = vld [vmem:[%s7306_s1 + $0x1d8] sm:$0xff]  ;;  %v4669_v20 = vld [vmem:[%s7305_s0 + $0xc0] sm:$0xff]  ;;  %v3608_v42 = vpack.c.bf16 %v2135_v34, %v2133_v28 }
  0x37   :  { %3601 = vmatpush1.bf16.msra.mxu1 %v3600_v11  ;;  %v4679_v43 = vld [vmem:[%s7306_s1 + $0x1d0] sm:$0xff]  ;;  %v2266_v44 = vld [vmem:[%s7306_s1 + $0x5c8] sm:$0xff]  ;;  %v2268_v45 = vld [vmem:[%s7306_s1 + $0x5d8] sm:$0xff]  ;;  %v3736_v48 = vpack.c.bf16 %v2263_v36, %v2261_v35  ;;  %v3610_v49 = vpack.c.bf16 %v2140_v40, %v2138_v39  ;;  %v850_v8 = vmax.f32 %v4669_v20, 0.0 }
  0x38   :  { %962 = vrot.lane.b32.xlu1 %v846_v1, %s4089_s21  ;;  %286 = vrot.lane.b32.xlu0 %v838_v33, %s4090_s30  ;;  %v3604_v33 = vpack.c.bf16 %v2131_v19, %v2129_v13  ;;  %v4690_v46 = vld [vmem:[%s7306_s1 + $0x5c0] sm:$0xff]  ;;  %v4695_v47 = vld [vmem:[%s7305_s0 + $0xc8] sm:$0xff]  ;;  %v3738_v59 = vpack.c.bf16 %v2268_v45, %v2266_v44 }
  0x39   :  { %3729 = vmatpush1.bf16.msra.mxu0 %v3728_v16  ;;  %3603 = vmatprep.subr.bf16.mxu1 %v3602_v18  ;;  %v4700_v50 = vld [vmem:[%s7306_s1 + $0x5d0] sm:$0xff]  ;;  %v4705_v52 = vld [vmem:[%s7306_s1 + $0x1e8] sm:$0xff]  ;;  %v4710_v55 = vld [vmem:[%s7306_s1 + $0x1f8] sm:$0xff] }
  0x3a   :  { %3731 = vmatprep.subr.bf16.mxu0 %v3730_v22  ;;  %v4720_v54 = vld [vmem:[%s7305_s0 + $0xd8] sm:$0xff]  ;;  %v4725_v17 = vld [vmem:[%s7306_s1 + $0x5e8] sm:$0xff]  ;;  %v4737_v60 = vld [vmem:[%s7306_s1 + $0x1e0] sm:$0xff]  ;;  %v3740_v6 = vpack.c.bf16 %v4700_v50, %v4690_v46  ;;  %v3614_v19 = vpack.c.bf16 %v4710_v55, %v4705_v52  ;;  %v851_v22 = vmax.f32 %v4695_v47, 0.0 }
  0x3b   :  { %3605 = vmatpush1.bf16.msra.mxu1 %v3604_v33  ;;  %v4730_v57 = vld [vmem:[%s7306_s1 + $0x5f8] sm:$0xff]  ;;  %v4742_v61 = vld [vmem:[%s7306_s1 + $0x1f0] sm:$0xff]  ;;  %v1147_v62 = vld [vmem:[%s7305_s0 + $0x40] sm:$0xff] }
  0x3c   :  { %290 = vrot.lane.b32.xlu1 %v840_v5, %s4090_s30  ;;  %964 = vrot.lane.b32.xlu0 %v847_v23, %s4089_s21  ;;  %v4674_v5 = vld [vmem:[%s7306_s1 + $0x1c0] sm:$0xff]  ;;  %v1284_v63 = vld [vmem:[%s7305_s0 + $0x48] sm:$0xff]  ;;  %v4765_v10 = vmax.f32 %v1147_v62, 0.0  ;;  %v3616_v39 = vpack.c.bf16 %v4742_v61, %v4737_v60  ;;  %v1875_v60 = vld [vmem:[#allocation2 + $0x50] sm:$0xff] }
  0x3d   :  { %3733 = vmatpush1.bf16.msra.mxu0 %v3732_v31  ;;  %3607 = vmatprep.subr.bf16.mxu1 %v3606_v32  ;;  %v3612_v58 = vpack.c.bf16 %v4679_v43, %v4674_v5  ;;  %v1149_v2 = vld [vmem:[%s7305_s0 + $0x50] sm:$0xff]  ;;  %v4758_v7 = vld [vmem:[%s7306_s1 + $0x5e0] sm:$0xff]  ;;  %v4767_v11 = vmax.f32 %v1284_v63, 0.0  ;;  %v25_v15 = vld [vmem:[%s7305_s0 + $0x8] sm:$0xff]  ;;  %v3742_v31 = vpack.c.bf16 %v4730_v57, %v4725_v17 }
  0x3e   :  { %3735 = vmatprep.subr.bf16.mxu0 %v3734_v51  ;;  %v4763_v12 = vld [vmem:[%s7306_s1 + $0x5f0] sm:$0xff]  ;;  %v4769_v13 = vmax.f32 %v1149_v2, 0.0  ;;  %v1595_v14 = vld [vmem:[%s7305_s0 + $0x60] sm:$0xff]  ;;  %v4791_v0 = vmax.f32 %v25_v15, 0.0  ;;  %v1286_v24 = vld [vmem:[%s7305_s0 + $0x58] sm:$0xff]  ;;  %1235 = vst [vmem:[#allocation2 + $0xb8] sm:$0xff] %v4765_v10 }
  0x3f   :  { %3609 = vmatpush1.bf16.msra.mxu1 %v3608_v42  ;;  %v4780_v16 = vld [vmem:[%s7305_s0] sm:$0xff]  ;;  %v4785_v18 = vld [vmem:[%s7305_s0 + $0xd0] sm:$0xff]  ;;  %v4789_v21 = vmax.f32 %v1595_v14, 0.0  ;;  %v27_v25 = vld [vmem:[%s7305_s0 + $0x18] sm:$0xff]  ;;  %v4812_v33 = vmax.f32 %v1286_v24, 0.0  ;;  %105 = vst.msk [vmem:[#allocation2 + $0x2d8] sm:$0xff] %vm12_vm1, %v4767_v11  ;;  %v3744_v46 = vpack.c.bf16 %v4763_v12, %v4758_v7 }
  0x40   :  { %968 = vrot.lane.b32.xlu1 %v849_v37, %s4089_s21  ;;  %966 = vrot.lane.b32.xlu0 %v848_v38, %s4089_s21  ;;  %v7317_v23 = vmax.f32 %v4780_v16, 0.0  ;;  %v1153_v26 = vld [vmem:[%s7305_s0 + $0x70] sm:$0xff]  ;;  %1237 = vst [vmem:[#allocation2 + $0x100] sm:$0xff] %v4769_v13  ;;  %v4814_v28 = vmax.f32 %v27_v25, 0.0  ;;  %v1288_v30 = vld [vmem:[%s7305_s0 + $0x68] sm:$0xff]  ;;  %97 = vst.msk [vmem:[#allocation2 + $0x1b8] sm:$0xff] %vm12_vm1, %v4791_v0 }
  0x41   :  { %3737 = vmatpush1.bf16.msra.mxu0 %v3736_v48  ;;  %3611 = vmatprep.subr.bf16.mxu1 %v3610_v49  ;;  %v4816_v29 = vmax.f32 %v1153_v26, 0.0  ;;  %v29_v9 = vld [vmem:[%s7305_s0 + $0x28] sm:$0xff]  ;;  %1239 = vst [vmem:[#allocation2 + $0x148] sm:$0xff] %v4789_v21  ;;  %v4832_v32 = vmax.f32 %v1288_v30, 0.0  ;;  %v4841_v35 = vld [vmem:[%s7305_s0 + $0x80] sm:$0xff]  ;;  %v450_v36 = vld [vmem:[%s7305_s0 + $0x10] sm:$0xff] }
  0x42   :  { %3739 = vmatprep.subr.bf16.mxu0 %v3738_v59  ;;  %v4834_v34 = vmax.f32 %v29_v9, 0.0  ;;  %96 = vst [vmem:[#allocation2 + $0x1b0] sm:$0xff] %v7317_v23  ;;  %v31_v37 = vld [vmem:[%s7305_s0 + $0x38] sm:$0xff]  ;;  %99 = vst.msk [vmem:[#allocation2 + $0x200] sm:$0xff] %vm12_vm1, %v4814_v28  ;;  %v7318_v40 = vmax.f32 %v4841_v35, 0.0  ;;  %v494_v51 = vmax.f32 %v450_v36, 0.0 }
  0x43   :  { %3613 = vmatpush1.bf16.msra.mxu1 %v3612_v58  ;;  %1241 = vst [vmem:[#allocation2 + $0x190] sm:$0xff] %v4816_v29  ;;  %v4855_v5 = vmax.f32 %v31_v37, 0.0  ;;  %v4860_v43 = vld [vmem:[%s7305_s0 + $0x90] sm:$0xff]  ;;  %v452_v42 = vld [vmem:[%s7305_s0 + $0x20] sm:$0xff]  ;;  %v1290_v44 = vld [vmem:[%s7305_s0 + $0x78] sm:$0xff]  ;;  %v852_v17 = vmax.f32 %v4785_v18, 0.0 }
  0x44   :  { %970 = vrot.lane.b32.xlu1 %v850_v8, %s4089_s21  ;;  %294 = vrot.lane.b32.xlu0 %v842_v4, %s4090_s30  ;;  %v853_v4 = vmax.f32 %v4720_v54, 0.0  ;;  %107 = vst.msk [vmem:[#allocation2 + $0x320] sm:$0xff] %vm12_vm1, %v4812_v33  ;;  %v4873_v45 = vld [vmem:[%s7305_s0 + $0xe0] sm:$0xff]  ;;  %101 = vst.msk [vmem:[#allocation2 + $0x248] sm:$0xff] %vm12_vm1, %v4834_v34  ;;  %v7316_v47 = vmax.f32 %v4860_v43, 0.0  ;;  %v496_v48 = vmax.f32 %v452_v42, 0.0 }
  0x45   :  { %3741 = vmatpush1.bf16.msra.mxu0 %v3740_v6  ;;  %3615 = vmatprep.subr.bf16.mxu1 %v3614_v19  ;;  %v4880_v49 = vmax.f32 %v1290_v44, 0.0  ;;  %v4885_v50 = vld [vmem:[%s7305_s0 + $0xa0] sm:$0xff]  ;;  %v1161_v52 = vld [vmem:[%s7305_s0 + $0xb0] sm:$0xff]  ;;  %109 = vst.msk [vmem:[#allocation2 + $0x368] sm:$0xff] %vm12_vm1, %v4832_v32  ;;  %1243 = vst [vmem:[#allocation2 + $0x1d8] sm:$0xff] %v7318_v40 }
  0x46   :  { %v30_v55 = vld [vmem:[%s7305_s0 + $0x30] sm:$0xff]  ;;  %103 = vst.msk [vmem:[#allocation2 + $0x290] sm:$0xff] %vm12_vm1, %v4855_v5  ;;  %98 = vst [vmem:[#allocation2 + $0x1f8] sm:$0xff] %v494_v51  ;;  %v7315_v57 = vmax.f32 %v4885_v50, 0.0  ;;  %v1205_v58 = vmax.f32 %v1161_v52, 0.0  ;;  %v4908_v41 = vld [vmem:[%s7305_s0 + $0x88] sm:$0xff]  ;;  %3743 = vmatprep.subr.bf16.mxu0 %v3742_v31 }
  0x47   :  { %v66_v59 = vmax.f32 %v30_v55, 0.0  ;;  %1245 = vst [vmem:[#allocation2 + $0x220] sm:$0xff] %v7316_v47  ;;  %100 = vst [vmem:[#allocation2 + $0x240] sm:$0xff] %v496_v48  ;;  %v7314_v61 = vmax.f32 %v4908_v41, 0.0  ;;  %v1165_v63 = vld [vmem:[%s7305_s0 + $0xd0] sm:$0xff]  ;;  %v4924_v2 = vld [vmem:[%s7305_s0 + $0x98] sm:$0xff]  ;;  %3617 = vmatpush1.bf16.msra.mxu1 %v3616_v39 }
  0x48   :  { %298 = vrot.lane.b32.xlu1 %v844_v53, %s4090_s30  ;;  %972 = vrot.lane.b32.xlu0 %v851_v22, %s4089_s21  ;;  %v1163_v53 = vld [vmem:[%s7305_s0 + $0xc0] sm:$0xff]  ;;  %111 = vst.msk [vmem:[#allocation2 + $0x3b0] sm:$0xff] %vm12_vm1, %v4880_v49  ;;  %1247 = vst [vmem:[#allocation2 + $0x268] sm:$0xff] %v7315_v57  ;;  %v1209_v7 = vmax.f32 %v1165_v63, 0.0  ;;  %v7313_v12 = vmax.f32 %v4924_v2, 0.0  ;;  %v2146_v15 = vld [vmem:[%s7306_s1 + $0x208] sm:$0xff] }
  0x49   :  { %v1207_v62 = vmax.f32 %v1163_v53, 0.0  ;;  %v1167_v6 = vld [vmem:[%s7305_s0 + $0xe0] sm:$0xff]  ;;  %1249 = vst [vmem:[#allocation2 + $0x2b0] sm:$0xff] %v1205_v58  ;;  %102 = vst [vmem:[#allocation2 + $0x288] sm:$0xff] %v66_v59  ;;  %v2148_v19 = vld [vmem:[%s7306_s1 + $0x218] sm:$0xff]  ;;  %3745 = vmatpush1.bf16.msra.mxu0 %v3744_v46  ;;  %v854_v31 = vmax.f32 %v4873_v45, 0.0 }
  0x4a   :  { %v1211_v14 = vmax.f32 %v1167_v6, 0.0  ;;  %v2145_v24 = vld [vmem:[%s7306_s1 + $0x200] sm:$0xff]  ;;  %v807_v25 = vld [vmem:[%s7305_s0 + $0xe8] sm:$0xff]  ;;  %113 = vst.msk [vmem:[#allocation2 + $0x3f8] sm:$0xff] %vm12_vm1, %v7314_v61  ;;  %v3618_v26 = vpack.c.bf16 %v2148_v19, %v2146_v15  ;;  %v2147_v22 = vld [vmem:[%s7306_s1 + $0x210] sm:$0xff]  ;;  %2498 = vmatmul.mubr.f32.vlgmr.msra.gmra.mrb[0].mxu1 %v4088_v3 }
  0x4b   :  { %1251 = vst [vmem:[#allocation2 + $0x2f8] sm:$0xff] %v1207_v62  ;;  %v1169_v30 = vld [vmem:[%s7305_s0 + $0xf0] sm:$0xff]  ;;  %v2150_v9 = vld [vmem:[%s7306_s1 + $0x228] sm:$0xff]  ;;  %1253 = vst [vmem:[#allocation2 + $0x340] sm:$0xff] %v1209_v7  ;;  %v3620_v36 = vpack.c.bf16 %v2147_v22, %v2145_v24  ;;  %2503 = vmatprep.mubr.f32.mxu1 %v1875_v60  ;;  %v855_v63 = vmax.f32 %v807_v25, 0.0 }
  0x4c   :  { %976 = vrot.lane.b32.xlu1 %v853_v4, %s4089_s21  ;;  %974 = vrot.lane.b32.xlu0 %v852_v17, %s4089_s21  ;;  %1255 = vst [vmem:[#allocation2 + $0x388] sm:$0xff] %v1211_v14  ;;  %115 = vst.msk [vmem:[#allocation2 + $0x440] sm:$0xff] %vm12_vm1, %v7313_v12  ;;  %v1213_v37 = vmax.f32 %v1169_v30, 0.0  ;;  %v2152_v39 = vld [vmem:[%s7306_s1 + $0x238] sm:$0xff]  ;;  %v2149_v54 = vld [vmem:[%s7306_s1 + $0x220] sm:$0xff] }
  0x4d   :  { %3619 = vmatprep.subr.bf16.mxu1 %v3618_v26  ;;  %v3622_v4 = vpack.c.bf16 %v2152_v39, %v2150_v9  ;;  %v2151_v51 = vld [vmem:[%s7306_s1 + $0x230] sm:$0xff]  ;;  %v2154_v42 = vld [vmem:[%s7306_s1 + $0x248] sm:$0xff]  ;;  %v2156_v44 = vld [vmem:[%s7306_s1 + $0x258] sm:$0xff] }
  0x4e   :  { %3621 = vmatpush1.bf16.msra.mxu1 %v3620_v36  ;;  %1257 = vst [vmem:[#allocation2 + $0x3d0] sm:$0xff] %v1213_v37  ;;  %v3624_v46 = vpack.c.bf16 %v2151_v51, %v2149_v54  ;;  %v2274_v3 = vld [vmem:[%s7306_s1 + $0x608] sm:$0xff]  ;;  %v2276_v48 = vld [vmem:[%s7306_s1 + $0x618] sm:$0xff]  ;;  %v3626_v58 = vpack.c.bf16 %v2156_v44, %v2154_v42  ;;  %v2153_v60 = vld [vmem:[%s7306_s1 + $0x240] sm:$0xff] }
  0x4f   :  { %v4991_v52 = vld [vmem:[%s7305_s0 + $0xa8] sm:$0xff]  ;;  %v1884_v55 = vld [vmem:[#allocation2 + $0x98] sm:$0xff]  ;;  %3623 = vmatprep.subr.bf16.mxu1 %v3622_v4  ;;  %v4993_v59 = vpack.c.bf16 %v2276_v48, %v2274_v3  ;;  %v2155_v62 = vld [vmem:[%s7306_s1 + $0x250] sm:$0xff] }
  0x50   :  { %v7312_v53 = vmax.f32 %v4991_v52, 0.0  ;;  %978 = vrot.lane.b32.xlu1 %v854_v31, %s4089_s21  ;;  %302 = vrot.lane.b32.xlu0 %v846_v1, %s4090_s30  ;;  %v809_v6 = vld [vmem:[%s7305_s0 + $0xf8] sm:$0xff]  ;;  %v1171_v7 = vld [vmem:[%s7305_s0 + $0x100] sm:$0xff]  ;;  %v3628_v25 = vpack.c.bf16 %v2155_v62, %v2153_v60 }
  0x51   :  { %v5017_v14 = vld [vmem:[%s7305_s0 + $0xf0] sm:$0xff]  ;;  %v5019_v15 = vld [vmem:[#allocation2] sm:$0xff]  ;;  %3747 = vmatprep.subr.bf16.mxu0 %v4993_v59  ;;  %v1215_v56 = vmax.f32 %v1171_v7, 0.0  ;;  %v2158_v1 = vld [vmem:[%s7306_s1 + $0x268] sm:$0xff]  ;;  %v857_v36 = vmax.f32 %v809_v6, 0.0 }
  0x52   :  { %2504 = vmatmul.mubr.f32.gmra.mrb[2].mxu1 %v5019_v15  ;;  %117 = vst.msk [vmem:[#allocation2 + $0x488] sm:$0xff] %vm12_vm1, %v7312_v53  ;;  %v2160_v19 = vld [vmem:[%s7306_s1 + $0x278] sm:$0xff]  ;;  %v1893_v24 = vld [vmem:[#allocation2 + $0xe0] sm:$0xff]  ;;  %v2159_v30 = vld [vmem:[%s7306_s1 + $0x270] sm:$0xff]  ;;  %v856_v37 = vmax.f32 %v5017_v14, 0.0 }
  0x53   :  { %2509 = vmatprep.mubr.f32.mxu1 %v1884_v55  ;;  %3625 = vmatpush1.bf16.msra.mxu1 %v3624_v46  ;;  %1259 = vst [vmem:[#allocation2 + $0x418] sm:$0xff] %v1215_v56  ;;  %v3630_v26 = vpack.c.bf16 %v2160_v19, %v2158_v1  ;;  %v2157_v22 = vld [vmem:[%s7306_s1 + $0x260] sm:$0xff]  ;;  %v5041_v9 = vld [vmem:[%s7305_s0 + $0xb8] sm:$0xff]  ;;  %v1173_v54 = vld [vmem:[%s7305_s0 + $0x110] sm:$0xff] }
  0x54   :  { %3627 = vmatprep.subr.bf16.mxu1 %v3626_v58  ;;  %306 = vrot.lane.b32.xlu1 %v848_v38, %s4090_s30  ;;  %v7311_v39 = vmax.f32 %v5041_v9, 0.0  ;;  %v2162_v4 = vld [vmem:[%s7306_s1 + $0x288] sm:$0xff]  ;;  %v5058_v27 = vld [vmem:[%s7305_s0 + $0x100] sm:$0xff]  ;;  %v1217_v38 = vmax.f32 %v1173_v54, 0.0  ;;  %v2164_v51 = vld [vmem:[%s7306_s1 + $0x298] sm:$0xff]  ;;  %v3632_v42 = vpack.c.bf16 %v2159_v30, %v2157_v22  ;;  %135 = vst.msk [vmem:[#allocation2 + $0x10] sm:$0xff] %vm134_vm4, %v5019_v15 }
  0x55   :  { %980 = vrot.lane.b32.xlu0 %v855_v63, %s4089_s21  ;;  %v3634_v44 = vpack.c.bf16 %v2164_v51, %v2162_v4  ;;  %v2161_v46 = vld [vmem:[%s7306_s1 + $0x280] sm:$0xff]  ;;  %v2163_v3 = vld [vmem:[%s7306_s1 + $0x290] sm:$0xff]  ;;  %v858_v48 = vmax.f32 %v5058_v27, 0.0  ;;  %v2166_v55 = vld [vmem:[%s7306_s1 + $0x2a8] sm:$0xff]  ;;  %137 = vst.msk [vmem:[#allocation2 + $0x58] sm:$0xff] %vm134_vm4, %v5019_v15 }
  0x56   :  { %2510 = vmatmul.mubr.f32.gmra.mrb[4].mxu1 %v5019_v15  ;;  %119 = vst.msk [vmem:[#allocation2 + $0x4d0] sm:$0xff] %vm12_vm1, %v7311_v39  ;;  %1261 = vst [vmem:[#allocation2 + $0x460] sm:$0xff] %v1217_v38  ;;  %v2168_v58 = vld [vmem:[%s7306_s1 + $0x2b8] sm:$0xff]  ;;  %v811_v60 = vld [vmem:[%s7305_s0 + $0x108] sm:$0xff]  ;;  %v3636_v62 = vpack.c.bf16 %v2163_v3, %v2161_v46 }
  0x57   :  { %2515 = vmatprep.mubr.f32.mxu1 %v1893_v24  ;;  %3629 = vmatpush1.bf16.msra.mxu1 %v3628_v25  ;;  %v5091_v63 = vld [vmem:[%s7305_s0 + $0xc8] sm:$0xff]  ;;  %v1175_v6 = vld [vmem:[%s7305_s0 + $0x120] sm:$0xff]  ;;  %v3638_v7 = vpack.c.bf16 %v2168_v58, %v2166_v55  ;;  %v2167_v1 = vld [vmem:[%s7306_s1 + $0x2b0] sm:$0xff]  ;;  %v859_v25 = vmax.f32 %v811_v60, 0.0  ;;  %139 = vst.msk [vmem:[#allocation2 + $0xa0] sm:$0xff] %vm134_vm4, %v5019_v15 }
  0x58   :  { %3631 = vmatprep.subr.bf16.mxu1 %v3630_v26  ;;  %984 = vrot.lane.b32.xlu1 %v857_v36, %s4089_s21  ;;  %v2165_v56 = vld [vmem:[%s7306_s1 + $0x2a0] sm:$0xff]  ;;  %v7308_v19 = vmax.f32 %v5091_v63, 0.0  ;;  %v1219_v24 = vmax.f32 %v1175_v6, 0.0  ;;  %v2170_v26 = vld [vmem:[%s7306_s1 + $0x2c8] sm:$0xff]  ;;  %v2172_v22 = vld [vmem:[%s7306_s1 + $0x2d8] sm:$0xff]  ;;  %141 = vst.msk [vmem:[#allocation2 + $0xe8] sm:$0xff] %vm134_vm4, %v5019_v15 }
  0x59   :  { %982 = vrot.lane.b32.xlu0 %v856_v37, %s4089_s21  ;;  %v813_v30 = vld [vmem:[%s7305_s0 + $0x118] sm:$0xff]  ;;  %v5121_v36 = vld [vmem:[%s7305_s0 + $0x110] sm:$0xff]  ;;  %v3640_v20 = vpack.c.bf16 %v2167_v1, %v2165_v56  ;;  %v3642_v4 = vpack.c.bf16 %v2172_v22, %v2170_v26  ;;  %v2169_v38 = vld [vmem:[%s7306_s1 + $0x2c0] sm:$0xff]  ;;  %1276 = vst.msk [vmem:[#allocation2 + $0x5d8] sm:$0xff] %vm134_vm4, %v5019_v15 }
  0x5a   :  { %2516 = vmatmul.mubr.f32.gmra.mrb[6].mxu1 %v5019_v15  ;;  %121 = vst.msk [vmem:[#allocation2 + $0x518] sm:$0xff] %vm12_vm1, %v7308_v19  ;;  %1263 = vst [vmem:[#allocation2 + $0x4a8] sm:$0xff] %v1219_v24  ;;  %v1177_v54 = vld [vmem:[%s7305_s0 + $0x130] sm:$0xff]  ;;  %v2174_v46 = vld [vmem:[%s7306_s1 + $0x2e8] sm:$0xff]  ;;  %v861_v3 = vmax.f32 %v813_v30, 0.0  ;;  %v860_v55 = vmax.f32 %v5121_v36, 0.0 }
  0x5b   :  { %3633 = vmatpush1.bf16.msra.mxu1 %v3632_v42  ;;  %v2171_v51 = vld [vmem:[%s7306_s1 + $0x2d0] sm:$0xff]  ;;  %v2176_v58 = vld [vmem:[%s7306_s1 + $0x2f8] sm:$0xff]  ;;  %v5154_v60 = vld [vmem:[%s7305_s0 + $0x48] sm:$0xff]  ;;  %1278 = vst.msk [vmem:[#allocation2 + $0x620] sm:$0xff] %vm134_vm4, %v5019_v15 }
  0x5c   :  { %3635 = vmatprep.subr.bf16.mxu1 %v3634_v44  ;;  %986 = vrot.lane.b32.xlu1 %v858_v48, %s4089_s21  ;;  %v1221_v44 = vmax.f32 %v1177_v54, 0.0  ;;  %v7310_v18 = vmax.f32 %v5154_v60, 0.0  ;;  %v3646_v6 = vpack.c.bf16 %v2176_v58, %v2174_v46  ;;  %v2175_v56 = vld [vmem:[%s7306_s1 + $0x2f0] sm:$0xff]  ;;  %v2178_v24 = vld [vmem:[%s7306_s1 + $0x308] sm:$0xff]  ;;  %v5193_v30 = vld [vmem:[%s7305_s0 + $0x140] sm:$0xff]  ;;  %1280 = vst.msk [vmem:[#allocation2 + $0x668] sm:$0xff] %vm134_vm4, %v5019_v15 }
  0x5d   :  { %310 = vrot.lane.b32.xlu0 %v850_v8, %s4090_s30  ;;  %v51_v8 = vld [vmem:[%s7305_s0 + $0xd8] sm:$0xff]  ;;  %v815_v26 = vld [vmem:[%s7305_s0 + $0x128] sm:$0xff]  ;;  %v2179_v46 = vld [vmem:[%s7306_s1 + $0x310] sm:$0xff]  ;;  %1282 = vst.msk [vmem:[#allocation2 + $0x6b0] sm:$0xff] %vm134_vm4, %v5019_v15 }
  0x5e   :  { %v5138_v42 = vmax.f32 %v51_v8, 0.0  ;;  %1265 = vst [vmem:[#allocation2 + $0x4f0] sm:$0xff] %v1221_v44  ;;  %1236 = vst.msk [vmem:[#allocation2 + $0xc0] sm:$0xff] %vm12_vm1, %v7310_v18  ;;  %v53_v22 = vld [vmem:[%s7305_s0 + $0xe8] sm:$0xff]  ;;  %v2177_v44 = vld [vmem:[%s7306_s1 + $0x300] sm:$0xff] }
  0x5f   :  { %3637 = vmatpush1.bf16.msra.mxu1 %v3636_v62  ;;  %v5159_v62 = vld [vmem:[%s7305_s0 + $0x120] sm:$0xff]  ;;  %v5195_v8 = vmax.f32 %v53_v22, 0.0  ;;  %v2182_v58 = vld [vmem:[%s7306_s1 + $0x328] sm:$0xff]  ;;  %v5232_v45 = vld [vmem:[%s7305_s0 + $0x150] sm:$0xff]  ;;  %443 = vst.msk [vmem:[#allocation2 + $0x10] sm:$0xff] %vm442_vm5, %v5019_v15 }
  0x60   :  { %3639 = vmatprep.subr.bf16.mxu1 %v3638_v7  ;;  %314 = vrot.lane.b32.xlu1 %v852_v17, %s4090_s30  ;;  %123 = vst.msk [vmem:[#allocation2 + $0x560] sm:$0xff] %vm12_vm1, %v5138_v42  ;;  %v3644_v17 = vpack.c.bf16 %v2171_v51, %v2169_v38  ;;  %v2173_v7 = vld [vmem:[%s7306_s1 + $0x2e0] sm:$0xff]  ;;  %v862_v1 = vmax.f32 %v5159_v62, 0.0  ;;  %v5204_v38 = vld [vmem:[%s7305_s0 + $0x130] sm:$0xff]  ;;  %v821_v27 = vld [vmem:[%s7305_s0 + $0x158] sm:$0xff] }
  0x61   :  { %988 = vrot.lane.b32.xlu0 %v859_v25, %s4089_s21  ;;  %v2180_v25 = vld [vmem:[%s7306_s1 + $0x318] sm:$0xff]  ;;  %125 = vst.msk [vmem:[#allocation2 + $0x5a8] sm:$0xff] %vm12_vm1, %v5195_v8  ;;  %v2181_v22 = vld [vmem:[%s7306_s1 + $0x320] sm:$0xff]  ;;  %v2183_v19 = vld [vmem:[%s7306_s1 + $0x330] sm:$0xff] }
  0x62   :  { %v3650_v51 = vpack.c.bf16 %v2180_v25, %v2178_v24  ;;  %v818_v14 = vld [vmem:[%s7305_s0 + $0x140] sm:$0xff]  ;;  %v2278_v18 = vld [vmem:[%s7306_s1 + $0x628] sm:$0xff]  ;;  %v2280_v54 = vld [vmem:[%s7306_s1 + $0x638] sm:$0xff]  ;;  %446 = vst.msk [vmem:[#allocation2 + $0x58] sm:$0xff] %vm442_vm5, %v5019_v15 }
  0x63   :  { %3641 = vmatpush1.bf16.msra.mxu1 %v3640_v20  ;;  %v3648_v20 = vpack.c.bf16 %v2175_v56, %v2173_v7  ;;  %v3652_v7 = vpack.c.bf16 %v2179_v46, %v2177_v44  ;;  %v7319_v44 = vmax.f32 %v5204_v38, 0.0  ;;  %v2186_v46 = vld [vmem:[%s7306_s1 + $0x348] sm:$0xff]  ;;  %v5358_v39 = vld [vmem:[%s7306_s1 + $0x380] sm:$0xff]  ;;  %v5385_v53 = vld [vmem:[%s7306_s1 + $0x3b8] sm:$0xff]  ;;  %1587 = vst.msk [vmem:[#allocation2 + $0x5d8] sm:$0xff] %vm442_vm5, %v5019_v15 }
  0x64   :  { %3643 = vmatprep.subr.bf16.mxu1 %v3642_v4  ;;  %992 = vrot.lane.b32.xlu1 %v861_v3, %s4089_s21  ;;  %v817_v4 = vld [vmem:[%s7305_s0 + $0x138] sm:$0xff]  ;;  %v863_v3 = vmax.f32 %v815_v26, 0.0  ;;  %v822_v36 = vld [vmem:[%s7305_s0 + $0x160] sm:$0xff]  ;;  %v2283_v61 = vld [vmem:[%s7306_s1 + $0x650] sm:$0xff]  ;;  %1589 = vst.msk [vmem:[#allocation2 + $0x620] sm:$0xff] %vm442_vm5, %v5019_v15 }
  0x65   :  { %990 = vrot.lane.b32.xlu0 %v860_v55, %s4089_s21  ;;  %1591 = vst.msk [vmem:[#allocation2 + $0x668] sm:$0xff] %vm442_vm5, %v5019_v15  ;;  %1593 = vst.msk [vmem:[#allocation2 + $0x6b0] sm:$0xff] %vm442_vm5, %v5019_v15  ;;  %v2288_v47 = vld [vmem:[%s7306_s1 + $0x678] sm:$0xff]  ;;  %v2285_v62 = vld [vmem:[%s7306_s1 + $0x660] sm:$0xff] }
  0x66   :  { %v467_v23 = vld [vmem:[%s7305_s0 + $0x98] sm:$0xff] }
  0x67   :  { %3645 = vmatpush1.bf16.msra.mxu1 %v3644_v17  ;;  %v2184_v17 = vld [vmem:[%s7306_s1 + $0x338] sm:$0xff] }
  0x68   :  { %3647 = vmatprep.subr.bf16.mxu1 %v3646_v6  ;;  %994 = vrot.lane.b32.xlu1 %v862_v1, %s4089_s21  ;;  %v55_v6 = vld [vmem:[%s7305_s0 + $0xf8] sm:$0xff]  ;;  %v3654_v26 = vpack.c.bf16 %v2184_v17, %v2182_v58 }
  0x69   :  { %318 = vrot.lane.b32.xlu0 %v854_v31, %s4090_s30  ;;  %v1183_v31 = vld [vmem:[%s7305_s0 + $0x160] sm:$0xff]  ;;  %v5237_v56 = vmax.f32 %v55_v6, 0.0  ;;  %v2188_v58 = vld [vmem:[%s7306_s1 + $0x358] sm:$0xff] }
  0x6a   :  { %v1227_v25 = vmax.f32 %v1183_v31, 0.0  ;;  %v3658_v6 = vpack.c.bf16 %v2188_v58, %v2186_v46  ;;  %v2185_v31 = vld [vmem:[%s7306_s1 + $0x340] sm:$0xff] }
  0x6b   :  { %3649 = vmatpush1.bf16.msra.mxu1 %v3648_v20  ;;  %v5249_v20 = vld [vmem:[%s7305_s0 + $0x58] sm:$0xff]  ;;  %127 = vst.msk [vmem:[#allocation2 + $0x5f0] sm:$0xff] %vm12_vm1, %v5237_v56 }
  0x6c   :  { %3651 = vmatprep.subr.bf16.mxu1 %v3650_v51  ;;  %322 = vrot.lane.b32.xlu1 %v856_v37, %s4090_s30  ;;  %v865_v51 = vmax.f32 %v817_v4, 0.0  ;;  %v7309_v17 = vmax.f32 %v5249_v20, 0.0  ;;  %1271 = vst [vmem:[#allocation2 + $0x5c8] sm:$0xff] %v1227_v25  ;;  %v1185_v37 = vld [vmem:[%s7305_s0 + $0x170] sm:$0xff]  ;;  %v3656_v4 = vpack.c.bf16 %v2183_v19, %v2181_v22  ;;  %v866_v19 = vmax.f32 %v818_v14, 0.0  ;;  %v819_v22 = vld [vmem:[%s7305_s0 + $0x148] sm:$0xff] }
  0x6d   :  { %996 = vrot.lane.b32.xlu0 %v863_v3, %s4089_s21  ;;  %v1229_v3 = vmax.f32 %v1185_v37, 0.0  ;;  %v2187_v25 = vld [vmem:[%s7306_s1 + $0x350] sm:$0xff]  ;;  %v2189_v37 = vld [vmem:[%s7306_s1 + $0x360] sm:$0xff] }
  0x6e   :  { %1238 = vst.msk [vmem:[#allocation2 + $0x108] sm:$0xff] %vm12_vm1, %v7309_v17  ;;  %v3660_v46 = vpack.c.bf16 %v2187_v25, %v2185_v31  ;;  %v465_v17 = vld [vmem:[%s7305_s0 + $0x88] sm:$0xff]  ;;  %v2196_v31 = vld [vmem:[%s7306_s1 + $0x398] sm:$0xff] }
  0x6f   :  { %3653 = vmatpush1.bf16.msra.mxu1 %v3652_v7  ;;  %v2190_v7 = vld [vmem:[%s7306_s1 + $0x368] sm:$0xff]  ;;  %1273 = vst [vmem:[#allocation2 + $0x610] sm:$0xff] %v1229_v3  ;;  %v2191_v3 = vld [vmem:[%s7306_s1 + $0x370] sm:$0xff]  ;;  %v5319_v25 = vmax.f32 %v465_v17, 0.0 }
  0x70   :  { %3655 = vmatprep.subr.bf16.mxu1 %v3654_v26  ;;  %1000 = vrot.lane.b32.xlu1 %v865_v51, %s4089_s21  ;;  %v2192_v26 = vld [vmem:[%s7306_s1 + $0x378] sm:$0xff]  ;;  %v57_v51 = vld [vmem:[%s7305_s0 + $0x108] sm:$0xff]  ;;  %v2275_v17 = vld [vmem:[%s7306_s1 + $0x610] sm:$0xff] }
  0x71   :  { %998 = vrot.lane.b32.xlu0 %v7319_v44, %s4089_s21  ;;  %v5296_v58 = vmax.f32 %v57_v51, 0.0  ;;  %v3662_v14 = vpack.c.bf16 %v2192_v26, %v2190_v7  ;;  %v3664_v51 = vpack.c.bf16 %v2191_v3, %v2189_v37  ;;  %1244 = vst.msk [vmem:[#allocation2 + $0x1e0] sm:$0xff] %vm12_vm1, %v5319_v25  ;;  %v155_v37 = vld [vmem:[%s7305_s0 + $0x68] sm:$0xff]  ;;  %v869_v3 = vmax.f32 %v821_v27, 0.0  ;;  %v2292_v44 = vld [vmem:[%s7306_s1 + $0x698] sm:$0xff] }
  0x72   :  { %v5372_v27 = vpack.c.bf16 %v2280_v54, %v2278_v18 }
  0x73   :  { %3657 = vmatpush1.bf16.msra.mxu1 %v3656_v4  ;;  %7362 = vst [vmem:[#allocation3_spill] sm:$0xff] %v5296_v58  ;;  %v867_v4 = vmax.f32 %v819_v22, 0.0  ;;  %129 = vst.msk [vmem:[#allocation2 + $0x638] sm:$0xff] %vm12_vm1, %v5296_v58  ;;  %v2273_v22 = vld [vmem:[%s7306_s1 + $0x600] sm:$0xff]  ;;  %v2207_v58 = vld [vmem:[%s7306_s1 + $0x3f0] sm:$0xff] }
  0x74   :  { %3659 = vmatprep.subr.bf16.mxu1 %v3658_v6  ;;  %1002 = vrot.lane.b32.xlu1 %v866_v19, %s4089_s21  ;;  %v2194_v6 = vld [vmem:[%s7306_s1 + $0x388] sm:$0xff]  ;;  %v59_v19 = vld [vmem:[%s7305_s0 + $0x118] sm:$0xff] }
  0x75   :  { %326 = vrot.lane.b32.xlu0 %v858_v48, %s4090_s30  ;;  %v820_v48 = vld [vmem:[%s7305_s0 + $0x150] sm:$0xff]  ;;  %v5336_v24 = vmax.f32 %v59_v19, 0.0 }
  0x76   :  { %v927_v7 = vpop.permute.xlu1 %926  ;;  %v923_v26 = vpop.permute.xlu0 %922  ;;  %v868_v19 = vmax.f32 %v820_v48, 0.0  ;;  %v2277_v48 = vld [vmem:[%s7306_s1 + $0x620] sm:$0xff] }
  0x77   :  { %3661 = vmatpush1.bf16.msra.mxu1 %v3660_v46  ;;  %7363 = vst [vmem:[#allocation4_spill] sm:$0xff] %v5336_v24  ;;  %1093 = vst.msk [vmem:[#allocation2 + $0x60] sm:$0xff] %vm1090_vm3, %v927_v7  ;;  %v3666_v46 = vpack.c.bf16 %v2196_v31, %v2194_v6  ;;  %v5365_v6 = vmax.f32 %v155_v37, 0.0  ;;  %v5370_v31 = vpack.c.bf16 %v2275_v17, %v2273_v22  ;;  %v5380_v37 = vld [vmem:[%s7306_s1 + $0x3a8] sm:$0xff]  ;;  %v2279_v22 = vld [vmem:[%s7306_s1 + $0x630] sm:$0xff] }
  0x78   :  { %1091 = vst.msk [vmem:[#allocation2 + $0x18] sm:$0xff] %vm1090_vm3, %v923_v26  ;;  %3663 = vmatprep.subr.bf16.mxu1 %v3662_v14  ;;  %330 = vrot.lane.b32.xlu1 %v860_v55, %s4090_s30  ;;  %v2195_v14 = vld [vmem:[%s7306_s1 + $0x390] sm:$0xff]  ;;  %v2282_v17 = vld [vmem:[%s7306_s1 + $0x648] sm:$0xff] }
  0x79   :  { %1004 = vrot.lane.b32.xlu0 %v867_v4, %s4089_s21  ;;  %131 = vst.msk [vmem:[#allocation2 + $0x680] sm:$0xff] %vm12_vm1, %v5336_v24  ;;  %1240 = vst.msk [vmem:[#allocation2 + $0x150] sm:$0xff] %vm12_vm1, %v5365_v6  ;;  %v3668_v12 = vpack.c.bf16 %v2195_v14, %v5358_v39  ;;  %v823_v39 = vld [vmem:[%s7305_s0 + $0x168] sm:$0xff]  ;;  %v2205_v24 = vld [vmem:[%s7306_s1 + $0x3e0] sm:$0xff] }
  0x7a   :  { %v929_v55 = vpop.permute.xlu1 %928  ;;  %v925_v4 = vpop.permute.xlu0 %924 }
  0x7b   :  { %3665 = vmatpush1.bf16.msra.mxu1 %v3664_v51  ;;  %v1019_v18 = vsel %vm444_vm0, %v927_v7, %v929_v55  ;;  %v1018_v54 = vsel %vm444_vm0, %v923_v26, %v925_v4  ;;  %v2284_v51 = vld [vmem:[%s7306_s1 + $0x658] sm:$0xff]  ;;  %v870_v7 = vmax.f32 %v822_v36, 0.0  ;;  %v5406_v26 = vld [vmem:[%s7306_s1 + $0x3a0] sm:$0xff]  ;;  %v5411_v55 = vld [vmem:[%s7306_s1 + $0x3b0] sm:$0xff] }
  0x7c   :  { %3667 = vmatprep.subr.bf16.mxu1 %v3666_v46  ;;  %1008 = vrot.lane.b32.xlu1 %v869_v3, %s4089_s21  ;;  %v2281_v46 = vld [vmem:[%s7306_s1 + $0x640] sm:$0xff]  ;;  %v3670_v3 = vpack.c.bf16 %v5385_v53, %v5380_v37  ;;  %v4063_v4 = vld [vmem:[#allocation2 + $0x70] sm:$0xff]  ;;  %v2202_v53 = vld [vmem:[%s7306_s1 + $0x3c8] sm:$0xff] }
  0x7d   :  { %1006 = vrot.lane.b32.xlu0 %v868_v19, %s4089_s21  ;;  %2916 = vmatmul.mubr.f32.vlgmr.msra.gmra.mrb[0].mxu0 %v1018_v54  ;;  %v1144_v19 = vld [vmem:[%s7305_s0 + $0x28] sm:$0xff]  ;;  %v5443_v54 = vpack.c.bf16 %v2279_v22, %v2277_v48  ;;  %v2204_v37 = vld [vmem:[%s7306_s1 + $0x3d8] sm:$0xff] }
  0x7e   :  { %v933_v14 = vpop.permute.xlu1 %932  ;;  %v5440_v36 = vpop.permute.xlu0 %930  ;;  %2921 = vmatprep.mubr.f32.mxu0 %v4063_v4  ;;  %3749 = vmatpush1.bf16.msra.mxu0 %v5370_v31  ;;  %v1188_v57 = vmax.f32 %v1144_v19, 0.0  ;;  %v5471_v22 = vld [vmem:[%s7305_s0 + $0x178] sm:$0xff]  ;;  %v5474_v19 = vpack.c.bf16 %v2284_v51, %v2282_v17  ;;  %v2286_v4 = vld [vmem:[%s7306_s1 + $0x668] sm:$0xff]  ;;  %v871_v17 = vmax.f32 %v823_v39, 0.0  ;;  %v2201_v51 = vld [vmem:[%s7306_s1 + $0x3c0] sm:$0xff] }
  0x7f   :  { %v1020_v48 = vsel %vm444_vm0, %v5440_v36, %v933_v14  ;;  %3751 = vmatprep.subr.bf16.mxu0 %v5372_v27  ;;  %3669 = vmatpush1.bf16.msra.mxu1 %v3668_v12  ;;  %v3672_v14 = vpack.c.bf16 %v5411_v55, %v5406_v26  ;;  %v2203_v12 = vld [vmem:[%s7306_s1 + $0x3d0] sm:$0xff]  ;;  %v5498_v26 = vmax.f32 %v467_v23, 0.0  ;;  %v1146_v55 = vld [vmem:[%s7305_s0 + $0x38] sm:$0xff]  ;;  %v5513_v23 = vpack.c.bf16 %v2283_v61, %v2281_v46 }
  0x80   :  { %1010 = vrot.lane.b32.xlu1 %v870_v7, %s4089_s21  ;;  %1232 = vst.msk [vmem:[#allocation2 + $0x30] sm:$0xff] %vm12_vm1, %v1188_v57  ;;  %v824_v7 = vld [vmem:[%s7305_s0 + $0x170] sm:$0xff]  ;;  %3671 = vmatprep.subr.bf16.mxu1 %v3670_v3  ;;  %v2208_v3 = vld [vmem:[%s7306_s1 + $0x3f8] sm:$0xff]  ;;  %v5529_v46 = vpack.c.bf16 %v2288_v47, %v2286_v4  ;;  %v873_v47 = vmax.f32 %v5471_v22, 0.0 }
  0x81   :  { %334 = vrot.lane.b32.xlu0 %v862_v1, %s4090_s30  ;;  %2922 = vmatmul.mubr.f32.gmra.mrb[2].mxu0 %v1019_v18  ;;  %v3674_v1 = vpack.c.bf16 %v2204_v37, %v2202_v53  ;;  %v2287_v57 = vld [vmem:[%s7306_s1 + $0x670] sm:$0xff]  ;;  %v2206_v18 = vld [vmem:[%s7306_s1 + $0x3e8] sm:$0xff]  ;;  %v1190_v53 = vmax.f32 %v1146_v55, 0.0  ;;  %1246 = vst.msk [vmem:[#allocation2 + $0x228] sm:$0xff] %vm12_vm1, %v5498_v26  ;;  %v3676_v55 = vpack.c.bf16 %v2203_v12, %v2201_v51  ;;  %v872_v4 = vmax.f32 %v824_v7, 0.0  ;;  %v2289_v7 = vld [vmem:[%s7306_s1 + $0x680] sm:$0xff] }
  0x82   :  { %v937_v39 = vpop.permute.xlu1 %936  ;;  %v5509_v40 = vpop.permute.xlu0 %934  ;;  %2927 = vmatprep.mubr.f32.mxu0 %v4765_v10  ;;  %3753 = vmatpush1.bf16.msra.mxu0 %v5443_v54  ;;  %v2290_v37 = vld [vmem:[%s7306_s1 + $0x688] sm:$0xff]  ;;  %v3678_v51 = vpack.c.bf16 %v2208_v3, %v2206_v18  ;;  %v5560_v22 = vpack.c.bf16 %v2287_v57, %v2285_v62  ;;  %v3680_v18 = vpack.c.bf16 %v2207_v58, %v2205_v24  ;;  %v2296_v62 = vld [vmem:[%s7306_s1 + $0x6b8] sm:$0xff] }
  0x83   :  { %v1021_v61 = vsel %vm444_vm0, %v5509_v40, %v937_v39  ;;  %3755 = vmatprep.subr.bf16.mxu0 %v5474_v19  ;;  %3673 = vmatpush1.bf16.msra.mxu1 %v3672_v14  ;;  %v7364_v39 = vmax.f32 %v5204_v38, 0.0  ;;  %1234 = vst.msk [vmem:[#allocation2 + $0x78] sm:$0xff] %vm12_vm1, %v1190_v53  ;;  %v157_v14 = vld [vmem:[%s7305_s0 + $0x78] sm:$0xff] }
  0x84   :  { %3675 = vmatprep.subr.bf16.mxu1 %v3674_v1  ;;  %v5552_v38 = vmax.f32 %v157_v14, 0.0  ;;  %v2291_v1 = vld [vmem:[%s7306_s1 + $0x690] sm:$0xff] }
  0x85   :  { %338 = vrot.lane.b32.xlu1 %v7364_v39, %s4090_s30  ;;  %1012 = vrot.lane.b32.xlu0 %v871_v17, %s4089_s21  ;;  %v5587_v58 = vpack.c.bf16 %v2291_v1, %v2289_v7  ;;  %v2300_v39 = vld [vmem:[%s7306_s1 + $0x6d8] sm:$0xff] }
  0x86   :  { %2928 = vmatmul.mubr.f32.gmra.mrb[4].mxu0 %v1020_v48  ;;  %v5554_v12 = vpop.permute.xlu1 %938  ;;  %v5556_v17 = vpop.permute.xlu0 %262  ;;  %v5565_v48 = vpack.c.bf16 %v2292_v44, %v2290_v37  ;;  %1242 = vst.msk [vmem:[#allocation2 + $0x198] sm:$0xff] %vm12_vm1, %v5552_v38  ;;  %v2294_v44 = vld [vmem:[%s7306_s1 + $0x6a8] sm:$0xff]  ;;  %v2295_v37 = vld [vmem:[%s7306_s1 + $0x6b0] sm:$0xff] }
  0x87   :  { %7365 = vst [vmem:[#allocation5_spill] sm:$0xff] %v5556_v17  ;;  %2933 = vmatprep.mubr.f32.mxu0 %v4769_v13  ;;  %3757 = vmatpush1.bf16.msra.mxu0 %v5513_v23  ;;  %402 = vst.msk [vmem:[#allocation2 + $0x128] sm:$0xff] %vm132_vm2, %v5556_v17  ;;  %v5594_v53 = vpack.c.bf16 %v2296_v62, %v2294_v44  ;;  %v2299_v44 = vld [vmem:[%s7306_s1 + $0x6d0] sm:$0xff]  ;;  %v2302_v62 = vld [vmem:[%s7306_s1 + $0x6e8] sm:$0xff] }
  0x88   :  { %3759 = vmatprep.subr.bf16.mxu0 %v5529_v46  ;;  %3677 = vmatpush1.bf16.msra.mxu1 %v3676_v55  ;;  %v2298_v55 = vld [vmem:[%s7306_s1 + $0x6c8] sm:$0xff]  ;;  %v2335_v17 = vld [vmem:[%s7306_s1 + $0x7f0] sm:$0xff] }
  0x89   :  { %1016 = vrot.lane.b32.xlu1 %v873_v47, %s4089_s21  ;;  %1014 = vrot.lane.b32.xlu0 %v872_v4, %s4089_s21  ;;  %v469_v47 = vld [vmem:[%s7305_s0 + $0xa8] sm:$0xff] }
  0x8a   :  { %2934 = vmatmul.mubr.f32.gmra.mrb[6].mxu0 %v1021_v61  ;;  %3679 = vmatprep.subr.bf16.mxu1 %v3678_v51  ;;  %v5583_v57 = vpop.permute.xlu1 %266  ;;  %v941_v24 = vpop.permute.xlu0 %940  ;;  %v2293_v61 = vld [vmem:[%s7306_s1 + $0x6a0] sm:$0xff]  ;;  %v5615_v4 = vmax.f32 %v469_v47, 0.0  ;;  %v2306_v47 = vld [vmem:[%s7306_s1 + $0x708] sm:$0xff] }
  0x8b   :  { %7366 = vst [vmem:[#allocation6_spill] sm:$0xff] %v5583_v57  ;;  %2939 = vmatprep.mubr.f32.mxu0 %v4789_v21  ;;  %3761 = vmatpush1.bf16.msra.mxu0 %v5560_v22  ;;  %404 = vst.msk [vmem:[#allocation2 + $0x170] sm:$0xff] %vm132_vm2, %v5583_v57  ;;  %v1022_v3 = vsel %vm444_vm0, %v5554_v12, %v941_v24  ;;  %v2304_v24 = vld [vmem:[%s7306_s1 + $0x6f8] sm:$0xff] }
  0x8c   :  { %3763 = vmatprep.subr.bf16.mxu0 %v5565_v48  ;;  %3681 = vmatpush1.bf16.msra.mxu1 %v3680_v18  ;;  %v5627_v18 = vpack.c.bf16 %v2300_v39, %v2298_v55  ;;  %1248 = vst.msk [vmem:[#allocation2 + $0x270] sm:$0xff] %vm12_vm1, %v5615_v4  ;;  %v5660_v55 = vpack.c.bf16 %v2304_v24, %v2302_v62  ;;  %v2301_v39 = vld [vmem:[%s7306_s1 + $0x6e0] sm:$0xff] }
  0x8d   :  { %1405 = vrot.lane.b32.xlu1 %v4767_v11, %s4090_s30  ;;  %1403 = vrot.lane.b32.xlu0 %v4765_v10, %s4090_s30  ;;  %v5622_v10 = vpack.c.bf16 %v2295_v37, %v2293_v61  ;;  %v7370_v37 = vmax.f32 %v4841_v35, 0.0  ;;  %v2303_v35 = vld [vmem:[%s7306_s1 + $0x6f0] sm:$0xff] }
  0x8e   :  { %2940 = vmatmul.mubr.f32.gmra.mrb[8].mxu0 %v1022_v3  ;;  %3834 = vmatprep.subr.bf16.mxu1 %v4993_v59  ;;  %v945_v14 = vpop.permute.xlu1 %944  ;;  %v5618_v51 = vpop.permute.xlu0 %942  ;;  %v1902_v7 = vld [vmem:[#allocation2 + $0x128] sm:$0xff]  ;;  %v2297_v59 = vld [vmem:[%s7306_s1 + $0x6c0] sm:$0xff]  ;;  %7371 = vst [vmem:[#allocation10_spill] sm:$0xff] %v5660_v55 }
  0x8f   :  { %7367 = vst [vmem:[#allocation7_spill] sm:$0xff] %v5618_v51  ;;  %2945 = vmatprep.mubr.f32.mxu0 %v4816_v29  ;;  %3765 = vmatpush1.bf16.msra.mxu0 %v5587_v58  ;;  %v1023_v1 = vsel %vm444_vm0, %v5618_v51, %v945_v14  ;;  %v7372_v14 = vmax.f32 %v4780_v16, 0.0  ;;  %v5688_v16 = vpack.c.bf16 %v2303_v35, %v2301_v39  ;;  %v2310_v39 = vld [vmem:[%s7306_s1 + $0x728] sm:$0xff]  ;;  %v2312_v35 = vld [vmem:[%s7306_s1 + $0x738] sm:$0xff] }
  0x90   :  { %2521 = vmatprep.mubr.f32.mxu1 %v1902_v7  ;;  %3767 = vmatprep.subr.bf16.mxu0 %v5594_v53  ;;  %v2308_v7 = vld [vmem:[%s7306_s1 + $0x718] sm:$0xff] }
  0x91   :  { %1407 = vrot.lane.b32.xlu1 %v4769_v13, %s4090_s30  ;;  %1703 = vrot.lane.b32.xlu0 %v4789_v21, %s4091_s20  ;;  %v5655_v21 = vpack.c.bf16 %v2299_v44, %v2297_v59  ;;  %7374 = vst [vmem:[#allocation12_spill] sm:$0xff] %v5688_v16 }
  0x92   :  { %2522 = vmatmul.mubr.f32.gmra.mrb[8].mxu1 %v5019_v15  ;;  %2946 = vmatmul.mubr.f32.gmra.mrb[10].mxu0 %v1023_v1  ;;  %v5648_v3 = vpop.permute.xlu1 %946  ;;  %v5650_v61 = vpop.permute.xlu0 %270  ;;  %v1911_v13 = vld [vmem:[#allocation2 + $0x170] sm:$0xff]  ;;  %v471_v1 = vld [vmem:[%s7305_s0 + $0xb8] sm:$0xff] }
  0x93   :  { %7368 = vst [vmem:[#allocation8_spill] sm:$0xff] %v5648_v3  ;;  %7369 = vst [vmem:[#allocation9_spill] sm:$0xff] %v5650_v61  ;;  %2951 = vmatprep.mubr.f32.mxu0 %v7370_v37  ;;  %3769 = vmatpush1.bf16.msra.mxu0 %v5622_v10  ;;  %v5683_v59 = vmax.f32 %v471_v1, 0.0  ;;  %v2307_v37 = vld [vmem:[%s7306_s1 + $0x710] sm:$0xff]  ;;  %v7377_v1 = vmax.f32 %v4860_v43, 0.0 }
  0x94   :  { %406 = vst.msk [vmem:[#allocation2 + $0x1b8] sm:$0xff] %vm132_vm2, %v5650_v61  ;;  %2527 = vmatprep.mubr.f32.mxu1 %v1911_v13  ;;  %3771 = vmatprep.subr.bf16.mxu0 %v5627_v18  ;;  %v5695_v13 = vpack.c.bf16 %v2308_v7, %v2306_v47  ;;  %v2311_v43 = vld [vmem:[%s7306_s1 + $0x730] sm:$0xff] }
  0x95   :  { %580 = vrot.lane.b32.xlu1 %v7372_v14, %s4091_s20  ;;  %1409 = vrot.lane.b32.xlu0 %v4812_v33, %s4090_s30  ;;  %1250 = vst.msk [vmem:[#allocation2 + $0x2b8] sm:$0xff] %vm12_vm1, %v5683_v59 }
  0x96   :  { %2528 = vmatmul.mubr.f32.gmra.mrb[10].mxu1 %v5019_v15  ;;  %v5685_v44 = vpop.permute.xlu1 %274  ;;  %v949_v62 = vpop.permute.xlu0 %948  ;;  %7375 = vst [vmem:[#allocation13_spill] sm:$0xff] %v5695_v13  ;;  %v2305_v15 = vld [vmem:[%s7306_s1 + $0x700] sm:$0xff] }
  0x97   :  { %7373 = vst [vmem:[#allocation11_spill] sm:$0xff] %v5685_v44  ;;  %3773 = vmatpush1.bf16.msra.mxu0 %v5655_v21  ;;  %408 = vst.msk [vmem:[#allocation2 + $0x200] sm:$0xff] %vm132_vm2, %v5685_v44  ;;  %v1024_v24 = vsel %vm444_vm0, %v5648_v3, %v949_v62  ;;  %v5725_v44 = vpack.c.bf16 %v2312_v35, %v2310_v39  ;;  %v2316_v39 = vld [vmem:[%s7306_s1 + $0x758] sm:$0xff]  ;;  %v473_v35 = vld [vmem:[%s7305_s0 + $0xc8] sm:$0xff]  ;;  %v7382_v3 = vmax.f32 %v4885_v50, 0.0 }
  0x98   :  { %3775 = vmatprep.subr.bf16.mxu0 %v5660_v55  ;;  %2952 = vmatmul.mubr.f32.gmra.mrb[12].mxu0 %v1024_v24  ;;  %v2309_v24 = vld [vmem:[%s7306_s1 + $0x720] sm:$0xff]  ;;  %v2315_v50 = vld [vmem:[%s7306_s1 + $0x750] sm:$0xff] }
  0x99   :  { %1707 = vrot.lane.b32.xlu1 %v4816_v29, %s4091_s20  ;;  %582 = vrot.lane.b32.xlu0 %v4791_v0, %s4091_s20  ;;  %v5720_v29 = vpack.c.bf16 %v2307_v37, %v2305_v15  ;;  %7379 = vst [vmem:[#allocation16_spill] sm:$0xff] %v5725_v44  ;;  %v2314_v15 = vld [vmem:[%s7306_s1 + $0x748] sm:$0xff]  ;;  %v5757_v57 = vpack.c.bf16 %v2311_v43, %v2309_v24  ;;  %v2320_v24 = vld [vmem:[%s7306_s1 + $0x778] sm:$0xff] }
  0x9a   :  { %v953_v47 = vpop.permute.xlu1 %952  ;;  %v5715_v14 = vpop.permute.xlu0 %950  ;;  %2957 = vmatprep.mubr.f32.mxu0 %v7377_v1  ;;  %v5738_v37 = vld [vmem:[#allocation2 + $0x148] sm:$0xff]  ;;  %v2329_v55 = vld [vmem:[%s7306_s1 + $0x7c0] sm:$0xff] }
  0x9b   :  { %7376 = vst [vmem:[#allocation14_spill] sm:$0xff] %v5715_v14  ;;  %v1920_v7 = vld [vmem:[#allocation2 + $0x1b8] sm:$0xff]  ;;  %3777 = vmatpush1.bf16.msra.mxu0 %v5688_v16  ;;  %7378 = vst [vmem:[#allocation15_spill] sm:$0xff] %v5720_v29  ;;  %v1025_v62 = vsel %vm444_vm0, %v5715_v14, %v953_v47  ;;  %v4065_v47 = vld [vmem:[#allocation2 + $0x1b0] sm:$0xff] }
  0x9c   :  { %2533 = vmatprep.mubr.f32.mxu1 %v1920_v7  ;;  %3779 = vmatprep.subr.bf16.mxu0 %v5695_v13  ;;  %v5748_v7 = vmax.f32 %v473_v35, 0.0  ;;  %7383 = vst [vmem:[#allocation19_spill] sm:$0xff] %v5757_v57  ;;  %v2313_v35 = vld [vmem:[%s7306_s1 + $0x740] sm:$0xff]  ;;  %v2323_v13 = vld [vmem:[%s7306_s1 + $0x790] sm:$0xff] }
  0x9d   :  { %1413 = vrot.lane.b32.xlu1 %v4832_v32, %s4090_s30  ;;  %1411 = vrot.lane.b32.xlu0 %v5738_v37, %s4090_s30  ;;  %v4070_v16 = vld [vmem:[#allocation2 + $0x240] sm:$0xff] }
  0x9e   :  { %2534 = vmatmul.mubr.f32.gmra.mrb[12].mxu1 %v4065_v47  ;;  %2958 = vmatmul.mubr.f32.gmra.mrb[14].mxu0 %v1025_v62  ;;  %v5750_v1 = vpop.permute.xlu1 %954  ;;  %v5752_v14 = vpop.permute.xlu0 %278  ;;  %v1929_v61 = vld [vmem:[#allocation2 + $0x200] sm:$0xff]  ;;  %v5762_v62 = vpack.c.bf16 %v2316_v39, %v2314_v15  ;;  %1252 = vst.msk [vmem:[#allocation2 + $0x300] sm:$0xff] %vm12_vm1, %v5748_v7  ;;  %v5784_v39 = vpack.c.bf16 %v2315_v50, %v2313_v35  ;;  %v5799_v35 = vld [vmem:[#allocation2 + $0x190] sm:$0xff]  ;;  %v5803_v50 = vld [vmem:[#allocation2 + $0x1d8] sm:$0xff] }
  0x9f   :  { %7380 = vst [vmem:[#allocation17_spill] sm:$0xff] %v5750_v1  ;;  %7381 = vst [vmem:[#allocation18_spill] sm:$0xff] %v5752_v14  ;;  %2963 = vmatprep.mubr.f32.mxu0 %v7382_v3  ;;  %3781 = vmatpush1.bf16.msra.mxu0 %v5720_v29  ;;  %v4066_v3 = vld [vmem:[#allocation2 + $0x1f8] sm:$0xff] }
  0xa0   :  { %410 = vst.msk [vmem:[#allocation2 + $0x248] sm:$0xff] %vm132_vm2, %v5752_v14  ;;  %2539 = vmatprep.mubr.f32.mxu1 %v1929_v61  ;;  %3783 = vmatprep.subr.bf16.mxu0 %v5725_v44  ;;  %7384 = vst [vmem:[#allocation20_spill] sm:$0xff] %v5762_v62  ;;  %v2318_v61 = vld [vmem:[%s7306_s1 + $0x768] sm:$0xff] }
  0xa1   :  { %586 = vrot.lane.b32.xlu1 %v4814_v28, %s4091_s20  ;;  %584 = vrot.lane.b32.xlu0 %v4066_v3, %s4091_s20  ;;  %7386 = vst [vmem:[#allocation22_spill] sm:$0xff] %v5784_v39  ;;  %v5791_v14 = vpack.c.bf16 %v2320_v24, %v2318_v61  ;;  %v2322_v61 = vld [vmem:[%s7306_s1 + $0x788] sm:$0xff]  ;;  %v2324_v24 = vld [vmem:[%s7306_s1 + $0x798] sm:$0xff] }
  0xa2   :  { %2540 = vmatmul.mubr.f32.gmra.mrb[14].mxu1 %v4066_v3  ;;  %v5781_v43 = vpop.permute.xlu1 %282  ;;  %v957_v15 = vpop.permute.xlu0 %956  ;;  %v2317_v3 = vld [vmem:[%s7306_s1 + $0x760] sm:$0xff]  ;;  %v5824_v29 = vpack.c.bf16 %v2324_v24, %v2322_v61 }
  0xa3   :  { %7385 = vst [vmem:[#allocation21_spill] sm:$0xff] %v5781_v43  ;;  %3785 = vmatpush1.bf16.msra.mxu0 %v5757_v57  ;;  %412 = vst.msk [vmem:[#allocation2 + $0x290] sm:$0xff] %vm132_vm2, %v5781_v43  ;;  %v1026_v47 = vsel %vm444_vm0, %v5750_v1, %v957_v15  ;;  %v2319_v57 = vld [vmem:[%s7306_s1 + $0x770] sm:$0xff] }
  0xa4   :  { %3787 = vmatprep.subr.bf16.mxu0 %v5762_v62  ;;  %7387 = vst [vmem:[#allocation23_spill] sm:$0xff] %v5791_v14  ;;  %2964 = vmatmul.mubr.f32.gmra.mrb[16].mxu0 %v1026_v47  ;;  %v5815_v62 = vld [vmem:[#allocation2 + $0x2b0] sm:$0xff]  ;;  %v5819_v51 = vpack.c.bf16 %v2319_v57, %v2317_v3  ;;  %7390 = vst [vmem:[#allocation26_spill] sm:$0xff] %v5824_v29  ;;  %v2321_v47 = vld [vmem:[%s7306_s1 + $0x780] sm:$0xff] }
  0xa5   :  { %1415 = vrot.lane.b32.xlu1 %v5799_v35, %s4090_s30  ;;  %1711 = vrot.lane.b32.xlu0 %v5803_v50, %s4091_s20  ;;  %v2326_v57 = vld [vmem:[%s7306_s1 + $0x7a8] sm:$0xff] }
  0xa6   :  { %v961_v15 = vpop.permute.xlu1 %960  ;;  %v5813_v43 = vpop.permute.xlu0 %958  ;;  %2969 = vmatprep.mubr.f32.mxu0 %v5815_v62  ;;  %7389 = vst [vmem:[#allocation25_spill] sm:$0xff] %v5819_v51 }
  0xa7   :  { %7388 = vst [vmem:[#allocation24_spill] sm:$0xff] %v5813_v43  ;;  %v1938_v1 = vld [vmem:[#allocation2 + $0x248] sm:$0xff]  ;;  %3789 = vmatpush1.bf16.msra.mxu0 %v5784_v39  ;;  %v1027_v44 = vsel %vm444_vm0, %v5813_v43, %v961_v15  ;;  %v5845_v15 = vld [vmem:[#allocation2 + $0x2f8] sm:$0xff]  ;;  %v5849_v43 = vpack.c.bf16 %v2323_v13, %v2321_v47  ;;  %v5862_v39 = vld [vmem:[#allocation2 + $0x220] sm:$0xff] }
  0xa8   :  { %2545 = vmatprep.mubr.f32.mxu1 %v1938_v1  ;;  %3791 = vmatprep.subr.bf16.mxu0 %v5791_v14  ;;  %v2328_v1 = vld [vmem:[%s7306_s1 + $0x7b8] sm:$0xff]  ;;  %v2327_v14 = vld [vmem:[%s7306_s1 + $0x7b0] sm:$0xff]  ;;  %v2330_v13 = vld [vmem:[%s7306_s1 + $0x7c8] sm:$0xff] }
  0xa9   :  { %588 = vrot.lane.b32.xlu1 %v4070_v16, %s4091_s20  ;;  %1417 = vrot.lane.b32.xlu0 %v4880_v49, %s4090_s30  ;;  %7393 = vst [vmem:[#allocation29_spill] sm:$0xff] %v5849_v43  ;;  %v2332_v47 = vld [vmem:[%s7306_s1 + $0x7d8] sm:$0xff] }
  0xaa   :  { %2546 = vmatmul.mubr.f32.gmra.mrb[16].mxu1 %v4070_v16  ;;  %2970 = vmatmul.mubr.f32.gmra.mrb[18].mxu0 %v1027_v44  ;;  %v5841_v3 = vpop.permute.xlu1 %962  ;;  %v5843_v61 = vpop.permute.xlu0 %286  ;;  %v1947_v24 = vld [vmem:[#allocation2 + $0x290] sm:$0xff]  ;;  %v5854_v44 = vpack.c.bf16 %v2328_v1, %v2326_v57  ;;  %v2325_v16 = vld [vmem:[%s7306_s1 + $0x7a0] sm:$0xff]  ;;  %v4073_v57 = vld [vmem:[#allocation2 + $0x288] sm:$0xff] }
  0xab   :  { %7391 = vst [vmem:[#allocation27_spill] sm:$0xff] %v5841_v3  ;;  %7392 = vst [vmem:[#allocation28_spill] sm:$0xff] %v5843_v61  ;;  %2975 = vmatprep.mubr.f32.mxu0 %v5845_v15  ;;  %3793 = vmatpush1.bf16.msra.mxu0 %v5819_v51  ;;  %v5884_v51 = vpack.c.bf16 %v2332_v47, %v2330_v13 }
  0xac   :  { %414 = vst.msk [vmem:[#allocation2 + $0x2d8] sm:$0xff] %vm132_vm2, %v5843_v61  ;;  %2551 = vmatprep.mubr.f32.mxu1 %v1947_v24  ;;  %3795 = vmatprep.subr.bf16.mxu0 %v5824_v29  ;;  %7394 = vst [vmem:[#allocation30_spill] sm:$0xff] %v5854_v44  ;;  %v5877_v61 = vpack.c.bf16 %v2327_v14, %v2325_v16  ;;  %v2334_v14 = vld [vmem:[%s7306_s1 + $0x7e8] sm:$0xff]  ;;  %v2336_v16 = vld [vmem:[%s7306_s1 + $0x7f8] sm:$0xff] }
  0xad   :  { %1715 = vrot.lane.b32.xlu1 %v5862_v39, %s4091_s20  ;;  %590 = vrot.lane.b32.xlu0 %v4834_v34, %s4091_s20 }
  0xae   :  { %2552 = vmatmul.mubr.f32.gmra.mrb[18].mxu1 %v4073_v57  ;;  %v5874_v1 = vpop.permute.xlu1 %290  ;;  %v965_v24 = vpop.permute.xlu0 %964 }
  0xaf   :  { %7395 = vst [vmem:[#allocation31_spill] sm:$0xff] %v5874_v1  ;;  %3797 = vmatpush1.bf16.msra.mxu0 %v5849_v43  ;;  %416 = vst.msk [vmem:[#allocation2 + $0x320] sm:$0xff] %vm132_vm2, %v5874_v1  ;;  %v1028_v29 = vsel %vm444_vm0, %v5841_v3, %v965_v24  ;;  %v2331_v43 = vld [vmem:[%s7306_s1 + $0x7d0] sm:$0xff]  ;;  %v5904_v1 = vld [vmem:[#allocation2 + $0x340] sm:$0xff] }
  0xb0   :  { %3799 = vmatprep.subr.bf16.mxu0 %v5854_v44  ;;  %2976 = vmatmul.mubr.f32.gmra.mrb[20].mxu0 %v1028_v29  ;;  %v5913_v44 = vpack.c.bf16 %v2336_v16, %v2334_v14  ;;  %v2333_v29 = vld [vmem:[%s7306_s1 + $0x7e0] sm:$0xff] }
  0xb1   :  { %1419 = vrot.lane.b32.xlu1 %v5803_v50, %s4090_s30  ;;  %264 = vrot.lane.b32.xlu0 %v4791_v0, %s4090_s30  ;;  %v5908_v0 = vpack.c.bf16 %v2331_v43, %v2329_v55  ;;  %v7399_v55 = vmax.f32 %v4908_v41, 0.0  ;;  %v4075_v43 = vld [vmem:[#allocation2 + $0xb8] sm:$0xff]  ;;  %v5938_v41 = vld [vmem:[#allocation2 + $0x268] sm:$0xff] }
  0xb2   :  { %v969_v13 = vpop.permute.xlu1 %968  ;;  %v5902_v47 = vpop.permute.xlu0 %966  ;;  %2981 = vmatprep.mubr.f32.mxu0 %v5904_v1  ;;  %7398 = vst [vmem:[#allocation34_spill] sm:$0xff] %v5913_v44 }
  0xb3   :  { %7396 = vst [vmem:[#allocation32_spill] sm:$0xff] %v5902_v47  ;;  %v1956_v24 = vld [vmem:[#allocation2 + $0x2d8] sm:$0xff]  ;;  %3801 = vmatpush1.bf16.msra.mxu0 %v5877_v61  ;;  %7397 = vst [vmem:[#allocation33_spill] sm:$0xff] %v5908_v0  ;;  %v1029_v3 = vsel %vm444_vm0, %v5902_v47, %v969_v13  ;;  %v5933_v47 = vpack.c.bf16 %v2335_v17, %v2333_v29  ;;  %v4078_v17 = vld [vmem:[#allocation2 + $0x100] sm:$0xff] }
  0xb4   :  { %2557 = vmatprep.mubr.f32.mxu1 %v1956_v24  ;;  %3803 = vmatprep.subr.bf16.mxu0 %v5884_v51  ;;  %v5929_v24 = vld [vmem:[#allocation2 + $0x388] sm:$0xff] }
  0xb5   :  { %592 = vrot.lane.b32.xlu1 %v4073_v57, %s4091_s20  ;;  %1421 = vrot.lane.b32.xlu0 %v7399_v55, %s4090_s30  ;;  %7402 = vst [vmem:[#allocation37_spill] sm:$0xff] %v5933_v47 }
  0xb6   :  { %2558 = vmatmul.mubr.f32.gmra.mrb[20].mxu1 %v4075_v43  ;;  %2982 = vmatmul.mubr.f32.gmra.mrb[22].mxu0 %v1029_v3  ;;  %v5925_v13 = vpop.permute.xlu1 %970  ;;  %v5927_v14 = vpop.permute.xlu0 %294  ;;  %v1965_v16 = vld [vmem:[#allocation2 + $0x320] sm:$0xff]  ;;  %v169_v3 = vld [vmem:[%s7305_s0 + $0xd8] sm:$0xff] }
  0xb7   :  { %7400 = vst [vmem:[#allocation35_spill] sm:$0xff] %v5925_v13  ;;  %7401 = vst [vmem:[#allocation36_spill] sm:$0xff] %v5927_v14  ;;  %2987 = vmatprep.mubr.f32.mxu0 %v5929_v24  ;;  %3805 = vmatpush1.bf16.msra.mxu0 %v5908_v0  ;;  %v5947_v57 = vmax.f32 %v169_v3, 0.0  ;;  %v5978_v0 = vld [vmem:[#allocation2 + $0x418] sm:$0xff] }
  0xb8   :  { %418 = vst.msk [vmem:[#allocation2 + $0x368] sm:$0xff] %vm132_vm2, %v5927_v14  ;;  %2563 = vmatprep.mubr.f32.mxu1 %v1965_v16  ;;  %3807 = vmatprep.subr.bf16.mxu0 %v5913_v44  ;;  %v5964_v44 = vld [vmem:[#allocation2 + $0x3d0] sm:$0xff] }
  0xb9   :  { %1719 = vrot.lane.b32.xlu1 %v5938_v41, %s4091_s20  ;;  %594 = vrot.lane.b32.xlu0 %v4855_v5, %s4091_s20  ;;  %1254 = vst.msk [vmem:[#allocation2 + $0x348] sm:$0xff] %vm12_vm1, %v5947_v57 }
  0xba   :  { %2564 = vmatmul.mubr.f32.gmra.mrb[22].mxu1 %v4078_v17  ;;  %v5949_v29 = vpop.permute.xlu1 %298  ;;  %v973_v55 = vpop.permute.xlu0 %972 }
  0xbb   :  { %7403 = vst [vmem:[#allocation38_spill] sm:$0xff] %v5949_v29  ;;  %3809 = vmatpush1.bf16.msra.mxu0 %v5933_v47  ;;  %420 = vst.msk [vmem:[#allocation2 + $0x3b0] sm:$0xff] %vm132_vm2, %v5949_v29  ;;  %v1030_v16 = vsel %vm444_vm0, %v5925_v13, %v973_v55  ;;  %v7404_v29 = vmax.f32 %v4924_v2, 0.0 }
  0xbc   :  { %2988 = vmatmul.mubr.f32.gmra.mrb[24].mxu0 %v1030_v16 }
  0xbd   :  { %1423 = vrot.lane.b32.xlu1 %v5862_v39, %s4090_s30  ;;  %268 = vrot.lane.b32.xlu0 %v4814_v28, %s4090_s30 }
  0xbe   :  { %v977_v3 = vpop.permute.xlu1 %976  ;;  %v5962_v14 = vpop.permute.xlu0 %974  ;;  %2993 = vmatprep.mubr.f32.mxu0 %v5964_v44 }
  0xbf   :  { %v1974_v47 = vld [vmem:[#allocation2 + $0x368] sm:$0xff]  ;;  %v1031_v55 = vsel %vm444_vm0, %v5962_v14, %v977_v3 }
  0xc0   :  { %2569 = vmatprep.mubr.f32.mxu1 %v1974_v47  ;;  %2994 = vmatmul.mubr.f32.gmra.mrb[26].mxu0 %v1031_v55  ;;  %v7406_v55 = vmax.f32 %v4991_v52, 0.0 }
  0xc1   :  { %596 = vrot.lane.b32.xlu1 %v4075_v43, %s4091_s20  ;;  %1425 = vrot.lane.b32.xlu0 %v7404_v29, %s4090_s30  ;;  %v6000_v29 = vld [vmem:[#allocation2 + $0x460] sm:$0xff] }
  0xc2   :  { %2570 = vmatmul.mubr.f32.gmra.mrb[24].mxu1 %v5738_v37  ;;  %v5974_v28 = vpop.permute.xlu1 %978  ;;  %v5976_v16 = vpop.permute.xlu0 %302  ;;  %v1983_v13 = vld [vmem:[#allocation2 + $0x3b0] sm:$0xff]  ;;  %2999 = vmatprep.mubr.f32.mxu0 %v5978_v0 }
  0xc3   :  { %422 = vst.msk [vmem:[#allocation2 + $0x3f8] sm:$0xff] %vm132_vm2, %v5976_v16  ;;  %2575 = vmatprep.mubr.f32.mxu1 %v1983_v13 }
  0xc5   :  { %1723 = vrot.lane.b32.xlu1 %v5815_v62, %s4091_s20  ;;  %598 = vrot.lane.b32.xlu0 %v4767_v11, %s4091_s20 }
  0xc6   :  { %2576 = vmatmul.mubr.f32.gmra.mrb[26].mxu1 %v5799_v35  ;;  %v5988_v2 = vpop.permute.xlu1 %306 }
  0xc7   :  { %7405 = vst [vmem:[#allocation39_spill] sm:$0xff] %v5988_v2  ;;  %v981_v47 = vpop.permute.xlu0 %980  ;;  %424 = vst.msk [vmem:[#allocation2 + $0x440] sm:$0xff] %vm132_vm2, %v5988_v2  ;;  %v4082_v2 = vld [vmem:[#allocation2 + $0x4a8] sm:$0xff] }
  0xc8   :  { %v1032_v43 = vsel %vm444_vm0, %v5974_v28, %v981_v47 }
  0xc9   :  { %1427 = vrot.lane.b32.xlu1 %v5938_v41, %s4090_s30  ;;  %272 = vrot.lane.b32.xlu0 %v4834_v34, %s4090_s30 }
  0xca   :  { %3000 = vmatmul.mubr.f32.gmra.mrb[28].mxu0 %v1032_v43  ;;  %v985_v13 = vpop.permute.xlu1 %984  ;;  %v1992_v35 = vld [vmem:[#allocation2 + $0x3f8] sm:$0xff] }
  0xcb   :  { %v5998_v11 = vpop.permute.xlu0 %982  ;;  %3005 = vmatprep.mubr.f32.mxu0 %v6000_v29  ;;  %2581 = vmatprep.mubr.f32.mxu1 %v1992_v35 }
  0xcc   :  { %v1033_v3 = vsel %vm444_vm0, %v5998_v11, %v985_v13  ;;  %2582 = vmatmul.mubr.f32.gmra.mrb[28].mxu1 %v5803_v50  ;;  %v4083_v13 = vld [vmem:[#allocation2 + $0x4f0] sm:$0xff] }
  0xcd   :  { %600 = vrot.lane.b32.xlu1 %v4078_v17, %s4091_s20  ;;  %1429 = vrot.lane.b32.xlu0 %v7406_v55, %s4090_s30 }
  0xce   :  { %3006 = vmatmul.mubr.f32.gmra.mrb[30].mxu0 %v1033_v3  ;;  %v6010_v34 = vpop.permute.xlu1 %986  ;;  %v2001_v43 = vld [vmem:[#allocation2 + $0x440] sm:$0xff]  ;;  %v7407_v3 = vmax.f32 %v5041_v9, 0.0  ;;  %v462_v9 = vld [vmem:[%s7305_s0 + $0x70] sm:$0xff] }
  0xcf   :  { %v6012_v47 = vpop.permute.xlu0 %310  ;;  %3011 = vmatprep.mubr.f32.mxu0 %v4082_v2  ;;  %2587 = vmatprep.mubr.f32.mxu1 %v2001_v43 }
  0xd0   :  { %426 = vst.msk [vmem:[#allocation2 + $0x488] sm:$0xff] %vm132_vm2, %v6012_v47  ;;  %2588 = vmatmul.mubr.f32.gmra.mrb[30].mxu1 %v5862_v39 }
  0xd1   :  { %1727 = vrot.lane.b32.xlu1 %v5845_v15, %s4091_s20  ;;  %602 = vrot.lane.b32.xlu0 %v4812_v33, %s4091_s20 }
  0xd2   :  { %v6021_v52 = vpop.permute.xlu1 %314 }
  0xd3   :  { %v989_v50 = vpop.permute.xlu0 %988  ;;  %428 = vst.msk [vmem:[#allocation2 + $0x4d0] sm:$0xff] %vm132_vm2, %v6021_v52 }
  0xd4   :  { %v1034_v17 = vsel %vm444_vm0, %v6010_v34, %v989_v50  ;;  %v7408_v50 = vmax.f32 %v5193_v30, 0.0 }
  0xd5   :  { %1431 = vrot.lane.b32.xlu1 %v5815_v62, %s4090_s30  ;;  %276 = vrot.lane.b32.xlu0 %v4855_v5, %s4090_s30 }
  0xd6   :  { %3012 = vmatmul.mubr.f32.gmra.mrb[32].mxu0 %v1034_v17  ;;  %v993_v2 = vpop.permute.xlu1 %992 }
  0xd7   :  { %v6031_v33 = vpop.permute.xlu0 %990  ;;  %v2010_v39 = vld [vmem:[#allocation2 + $0x488] sm:$0xff]  ;;  %3017 = vmatprep.mubr.f32.mxu0 %v4083_v13  ;;  %v7410_v13 = vmax.f32 %v5232_v45, 0.0 }
  0xd8   :  { %v1035_v35 = vsel %vm444_vm0, %v6031_v33, %v993_v2  ;;  %2593 = vmatprep.mubr.f32.mxu1 %v2010_v39  ;;  %v4084_v45 = vld [vmem:[#allocation2 + $0x5c8] sm:$0xff] }
  0xd9   :  { %604 = vrot.lane.b32.xlu1 %v5738_v37, %s4091_s20  ;;  %1433 = vrot.lane.b32.xlu0 %v7407_v3, %s4090_s30  ;;  %v7411_v3 = vmax.f32 %v5091_v63, 0.0  ;;  %v464_v63 = vld [vmem:[%s7305_s0 + $0x80] sm:$0xff] }
  0xda   :  { %2594 = vmatmul.mubr.f32.gmra.mrb[32].mxu1 %v5938_v41  ;;  %3018 = vmatmul.mubr.f32.gmra.mrb[34].mxu0 %v1035_v35  ;;  %v6041_v5 = vpop.permute.xlu1 %994  ;;  %v2019_v43 = vld [vmem:[#allocation2 + $0x4d0] sm:$0xff] }
  0xdb   :  { %v6043_v55 = vpop.permute.xlu0 %318  ;;  %3023 = vmatprep.mubr.f32.mxu0 %v7408_v50  ;;  %2599 = vmatprep.mubr.f32.mxu1 %v2019_v43 }
  0xdc   :  { %430 = vst.msk [vmem:[#allocation2 + $0x518] sm:$0xff] %vm132_vm2, %v6043_v55 }
  0xdd   :  { %1731 = vrot.lane.b32.xlu1 %v5904_v1, %s4091_s20  ;;  %606 = vrot.lane.b32.xlu0 %v4832_v32, %s4091_s20  ;;  %v7409_v32 = vmax.f32 %v5154_v60, 0.0 }
  0xde   :  { %2600 = vmatmul.mubr.f32.gmra.mrb[34].mxu1 %v5815_v62  ;;  %v6057_v37 = vpop.permute.xlu1 %322  ;;  %v506_v62 = vmax.f32 %v462_v9, 0.0 }
  0xdf   :  { %v997_v30 = vpop.permute.xlu0 %996  ;;  %432 = vst.msk [vmem:[#allocation2 + $0x560] sm:$0xff] %vm132_vm2, %v6057_v37 }
  0xe0   :  { %v1036_v41 = vsel %vm444_vm0, %v6041_v5, %v997_v30 }
  0xe1   :  { %1435 = vrot.lane.b32.xlu1 %v5845_v15, %s4090_s30  ;;  %280 = vrot.lane.b32.xlu0 %v7409_v32, %s4090_s30  ;;  %v1618_v32 = vld [vmem:[%s7305_s0 + $0x118] sm:$0xff] }
  0xe2   :  { %3024 = vmatmul.mubr.f32.gmra.mrb[36].mxu0 %v1036_v41  ;;  %v1001_v17 = vpop.permute.xlu1 %1000  ;;  %v508_v41 = vmax.f32 %v464_v63, 0.0  ;;  %v466_v63 = vld [vmem:[%s7305_s0 + $0x90] sm:$0xff] }
  0xe3   :  { %v6068_v2 = vpop.permute.xlu0 %998  ;;  %v2028_v39 = vld [vmem:[#allocation2 + $0x518] sm:$0xff]  ;;  %3029 = vmatprep.mubr.f32.mxu0 %v7410_v13 }
  0xe4   :  { %v1037_v35 = vsel %vm444_vm0, %v6068_v2, %v1001_v17  ;;  %2605 = vmatprep.mubr.f32.mxu1 %v2028_v39 }
  0xe5   :  { %608 = vrot.lane.b32.xlu1 %v506_v62, %s4091_s20  ;;  %1437 = vrot.lane.b32.xlu0 %v7411_v3, %s4090_s30  ;;  %v6107_v62 = vmax.f32 %v1618_v32, 0.0  ;;  %v2340_v32 = vld [vmem:[%s7306_s1 + $0x818] sm:$0xff] }
  0xe6   :  { %2606 = vmatmul.mubr.f32.gmra.mrb[36].mxu1 %v5845_v15  ;;  %3030 = vmatmul.mubr.f32.gmra.mrb[38].mxu0 %v1037_v35  ;;  %v6079_v60 = vpop.permute.xlu1 %1002  ;;  %v2037_v50 = vld [vmem:[#allocation2 + $0x560] sm:$0xff]  ;;  %v4085_v35 = vld [vmem:[#allocation2 + $0x610] sm:$0xff] }
  0xe7   :  { %v6081_v43 = vpop.permute.xlu0 %326  ;;  %3035 = vmatprep.mubr.f32.mxu0 %v4084_v45  ;;  %2611 = vmatprep.mubr.f32.mxu1 %v2037_v50  ;;  %1262 = vst.msk [vmem:[#allocation2 + $0x468] sm:$0xff] %vm12_vm1, %v6107_v62  ;;  %v6123_v45 = vld [vmem:[#allocation2] sm:$0xff] }
  0xe8   :  { %434 = vst.msk [vmem:[#allocation2 + $0x5a8] sm:$0xff] %vm132_vm2, %v6081_v43 }
  0xe9   :  { %1735 = vrot.lane.b32.xlu1 %v5929_v24, %s4091_s20  ;;  %610 = vrot.lane.b32.xlu0 %v4880_v49, %s4091_s20  ;;  %v7412_v49 = vmax.f32 %v5249_v20, 0.0 }
  0xea   :  { %2612 = vmatmul.mubr.f32.gmra.mrb[38].mxu1 %v5904_v1  ;;  %v6093_v15 = vpop.permute.xlu1 %330 }
  0xeb   :  { %v1005_v9 = vpop.permute.xlu0 %1004  ;;  %436 = vst.msk [vmem:[#allocation2 + $0x5f0] sm:$0xff] %vm132_vm2, %v6093_v15 }
  0xec   :  { %v1038_v30 = vsel %vm444_vm0, %v6079_v60, %v1005_v9 }
  0xed   :  { %1439 = vrot.lane.b32.xlu1 %v5904_v1, %s4090_s30  ;;  %284 = vrot.lane.b32.xlu0 %v7412_v49, %s4090_s30 }
  0xee   :  { %3036 = vmatmul.mubr.f32.gmra.mrb[40].mxu0 %v1038_v30  ;;  %v1009_v17 = vpop.permute.xlu1 %1008 }
  0xef   :  { %v6109_v39 = vpop.permute.xlu0 %1006  ;;  %v2046_v13 = vld [vmem:[#allocation2 + $0x5a8] sm:$0xff]  ;;  %3041 = vmatprep.mubr.f32.mxu0 %v4085_v35 }
  0xf0   :  { %v1039_v1 = vsel %vm444_vm0, %v6109_v39, %v1009_v17  ;;  %2617 = vmatprep.mubr.f32.mxu1 %v2046_v13 }
  0xf1   :  { %612 = vrot.lane.b32.xlu1 %v508_v41, %s4091_s20  ;;  %1441 = vrot.lane.b32.xlu0 %v5138_v42, %s4090_s30  ;;  %v2338_v41 = vld [vmem:[%s7306_s1 + $0x808] sm:$0xff] }
  0xf2   :  { %2618 = vmatmul.mubr.f32.gmra.mrb[40].mxu1 %v5929_v24  ;;  %3042 = vmatmul.mubr.f32.gmra.mrb[42].mxu0 %v1039_v1  ;;  %v6119_v20 = vpop.permute.xlu1 %1010  ;;  %v2055_v50 = vld [vmem:[#allocation2 + $0x5f0] sm:$0xff]  ;;  %v3810_v17 = vpack.c.bf16 %v2340_v32, %v2338_v41  ;;  %v1868_v32 = vld [vmem:[#allocation2 + $0x18] sm:$0xff] }
  0xf3   :  { %v6121_v3 = vpop.permute.xlu0 %334  ;;  %3047 = vmatprep.mubr.f32.mxu0 %v6123_v45  ;;  %2623 = vmatprep.mubr.f32.mxu1 %v2055_v50  ;;  %v6164_v50 = vld [vmem:[%s7305_s0 + $0xf0] sm:$0xff] }
  0xf4   :  { %438 = vst.msk [vmem:[#allocation2 + $0x638] sm:$0xff] %vm132_vm2, %v6121_v3  ;;  %3811 = vmatprep.subr.bf16.mxu0 %v3810_v17  ;;  %v468_v17 = vld [vmem:[%s7305_s0 + $0xa0] sm:$0xff] }
  0xf5   :  { %1739 = vrot.lane.b32.xlu1 %v5964_v44, %s4091_s20  ;;  %614 = vrot.lane.b32.xlu0 %v5319_v25, %s4091_s20 }
  0xf6   :  { %2624 = vmatmul.mubr.f32.gmra.mrb[42].mxu1 %v5964_v44  ;;  %v510_v44 = vmax.f32 %v466_v63, 0.0 }
  0xf7   :  { %v6136_v9 = vpop.permute.xlu1 %338  ;;  %v1013_v30 = vpop.permute.xlu0 %1012 }
  0xf8   :  { %7413 = vst [vmem:[#allocation40_spill] sm:$0xff] %v6136_v9  ;;  %440 = vst.msk [vmem:[#allocation2 + $0x680] sm:$0xff] %vm132_vm2, %v6136_v9  ;;  %v1040_v49 = vsel %vm444_vm0, %v6119_v20, %v1013_v30 }
  0xf9   :  { %1443 = vrot.lane.b32.xlu1 %v5929_v24, %s4090_s30  ;;  %288 = vrot.lane.b32.xlu0 %v5365_v6, %s4090_s30 }
  0xfa   :  { %3048 = vmatmul.mubr.f32.gmra.mrb[44].mxu0 %v1040_v49 }
  0xfb   :  { %v1017_v13 = vpop.permute.xlu1 %1016  ;;  %v6152_v35 = vpop.permute.xlu0 %1014  ;;  %v2064_v1 = vld [vmem:[#allocation2 + $0x638] sm:$0xff]  ;;  %3053 = vmatprep.mubr.f32.mxu0 %v6123_v45 }
  0xfc   :  { %7414 = vst [vmem:[#allocation41_spill] sm:$0xff] %v6152_v35  ;;  %v1041_v24 = vsel %vm444_vm0, %v6152_v35, %v1017_v13  ;;  %2629 = vmatprep.mubr.f32.mxu1 %v2064_v1  ;;  %v2341_v35 = vld [vmem:[%s7306_s1 + $0x820] sm:$0xff] }
  0xfd   :  { %616 = vrot.lane.b32.xlu1 %v510_v44, %s4091_s20  ;;  %1445 = vrot.lane.b32.xlu0 %v5195_v8, %s4090_s30  ;;  %v7359_v44 = vmax.f32 %v6164_v50, 0.0 }
  0xfe   :  { %2630 = vmatmul.mubr.f32.gmra.mrb[44].mxu1 %v5978_v0  ;;  %3054 = vmatmul.mubr.f32.gmra.mrb[46].mxu0 %v1041_v24  ;;  %v1867_v24 = vld [vmem:[#allocation2 + $0x10] sm:$0xff] }
  0xff   :  { %v1406_v63 = vpop.permute.xlu1 %1405  ;;  %v1404_v30 = vpop.permute.xlu0 %1403  ;;  %v2073_v49 = vld [vmem:[#allocation2 + $0x680] sm:$0xff] }
 0x100   :  { %v1483_v41 = vsel %vm12_vm1, %v1404_v30, %v1406_v63  ;;  %1543 = vst.msk [vmem:[#allocation2 + $0x30] sm:$0xff] %vm132_vm2, %v1404_v30  ;;  %2635 = vmatprep.mubr.f32.mxu1 %v2073_v49  ;;  %v1617_v63 = vld [vmem:[%s7305_s0 + $0x110] sm:$0xff] }
 0x101   :  { %1544 = vst.msk [vmem:[#allocation2 + $0x38] sm:$0xff] %vm134_vm4, %v1483_v41  ;;  %1743 = vrot.lane.b32.xlu1 %v5978_v0, %s4091_s20  ;;  %618 = vrot.lane.b32.xlu0 %v5498_v26, %s4091_s20  ;;  %v512_v0 = vmax.f32 %v468_v17, 0.0  ;;  %v1876_v41 = vld [vmem:[#allocation2 + $0x58] sm:$0xff]  ;;  %v2337_v17 = vld [vmem:[%s7306_s1 + $0x800] sm:$0xff] }
 0x102   :  { %2636 = vmatmul.mubr.f32.gmra.mrb[46].mxu1 %v6000_v29  ;;  %v1877_v29 = vld [vmem:[#allocation2 + $0x60] sm:$0xff] }
 0x103   :  { %2706 = vmatprep.mubr.f32.mxu1 %v1868_v32  ;;  %v1408_v13 = vpop.permute.xlu1 %1407  ;;  %v6178_v1 = vpop.permute.xlu0 %1703 }
 0x104   :  { %1545 = vst.msk [vmem:[#allocation2 + $0x78] sm:$0xff] %vm132_vm2, %v1408_v13 }
 0x105   :  { %1829 = vst.msk [vmem:[#allocation2 + $0x38] sm:$0xff] %vm442_vm5, %v6178_v1  ;;  %1447 = vrot.lane.b32.xlu1 %v7359_v44, %s4090_s30  ;;  %292 = vrot.lane.b32.xlu0 %v5552_v38, %s4090_s30 }
 0x106   :  { %2707 = vmatmul.mubr.f32.vlgmr.msra.gmra.mrb[0].mxu1 %v1867_v24  ;;  %v2339_v24 = vld [vmem:[%s7306_s1 + $0x810] sm:$0xff] }
 0x107   :  { %2712 = vmatprep.mubr.f32.mxu1 %v1877_v29  ;;  %v581_v30 = vpop.permute.xlu1 %580  ;;  %v1410_v49 = vpop.permute.xlu0 %1409  ;;  %3850 = vmatpush1.bf16.msra.mxu1 %v5370_v31  ;;  %v6205_v31 = vmax.f32 %v1617_v63, 0.0  ;;  %v2344_v29 = vld [vmem:[%s7306_s1 + $0x838] sm:$0xff]  ;;  %v3812_v44 = vpack.c.bf16 %v2339_v24, %v2337_v17  ;;  %v2346_v17 = vld [vmem:[%s7306_s1 + $0x848] sm:$0xff] }
 0x108   :  { %734 = vst.msk [vmem:[#allocation2 + $0xa0] sm:$0xff] %vm442_vm5, %v581_v30  ;;  %v1484_v32 = vsel %vm12_vm1, %v1408_v13, %v1410_v49  ;;  %3835 = vmatprep.subr.bf16.mxu1 %v5372_v27  ;;  %v2342_v13 = vld [vmem:[%s7306_s1 + $0x828] sm:$0xff]  ;;  %v470_v27 = vld [vmem:[%s7305_s0 + $0xb0] sm:$0xff]  ;;  %v2348_v24 = vld [vmem:[%s7306_s1 + $0x858] sm:$0xff] }
 0x109   :  { %1546 = vst.msk [vmem:[#allocation2 + $0x80] sm:$0xff] %vm134_vm4, %v1484_v32  ;;  %620 = vrot.lane.b32.xlu1 %v512_v0, %s4091_s20  ;;  %1449 = vrot.lane.b32.xlu0 %v5237_v56, %s4090_s30  ;;  %v3814_v9 = vpack.c.bf16 %v2344_v29, %v2342_v13 }
 0x10a   :  { %2713 = vmatmul.mubr.f32.gmra.mrb[2].mxu1 %v1876_v41  ;;  %v2343_v41 = vld [vmem:[%s7306_s1 + $0x830] sm:$0xff] }
 0x10b   :  { %v6216_v49 = vpop.permute.xlu1 %1707  ;;  %v583_v0 = vpop.permute.xlu0 %582  ;;  %3851 = vmatpush1.bf16.msra.mxu1 %v5443_v54  ;;  %v1871_v54 = vld [vmem:[#allocation2 + $0x30] sm:$0xff]  ;;  %v3816_v29 = vpack.c.bf16 %v2343_v41, %v2341_v35  ;;  %v472_v35 = vld [vmem:[%s7305_s0 + $0xc0] sm:$0xff] }
 0x10c   :  { %v1872_v32 = vld [vmem:[#allocation2 + $0x38] sm:$0xff]  ;;  %1831 = vst.msk [vmem:[#allocation2 + $0x80] sm:$0xff] %vm442_vm5, %v6216_v49  ;;  %v668_v63 = vsel %vm134_vm4, %v581_v30, %v583_v0  ;;  %3836 = vmatprep.subr.bf16.mxu1 %v5474_v19  ;;  %v514_v30 = vmax.f32 %v470_v27, 0.0  ;;  %v3818_v0 = vpack.c.bf16 %v2348_v24, %v2346_v17  ;;  %v2351_v24 = vld [vmem:[%s7306_s1 + $0x870] sm:$0xff] }
 0x10d   :  { %3124 = vmatprep.mubr.f32.mxu0 %v1872_v32  ;;  %735 = vst.msk [vmem:[#allocation2 + $0xa8] sm:$0xff] %vm444_vm0, %v668_v63  ;;  %1747 = vrot.lane.b32.xlu1 %v6205_v31, %s4091_s20  ;;  %v2345_v32 = vld [vmem:[%s7306_s1 + $0x840] sm:$0xff] }
 0x10e   :  { %622 = vrot.lane.b32.xlu0 %v5615_v4, %s4091_s20  ;;  %1095 = vst.msk [vmem:[#allocation2 + $0xa8] sm:$0xff] %vm1090_vm3, %v5440_v36  ;;  %3125 = vmatmul.mubr.f32.vlgmr.msra.gmra.mrb[0].mxu0 %v1871_v54  ;;  %v2347_v36 = vld [vmem:[%s7306_s1 + $0x850] sm:$0xff]  ;;  %v2349_v54 = vld [vmem:[%s7306_s1 + $0x860] sm:$0xff] }
 0x10f   :  { %v1414_v19 = vpop.permute.xlu1 %1413  ;;  %v1412_v13 = vpop.permute.xlu0 %1411  ;;  %3813 = vmatpush1.bf16.msra.mxu0 %v3812_v44  ;;  %3852 = vmatpush1.bf16.msra.mxu1 %v5513_v23  ;;  %v2350_v23 = vld [vmem:[%s7306_s1 + $0x868] sm:$0xff]  ;;  %v3820_v41 = vpack.c.bf16 %v2347_v36, %v2345_v32  ;;  %v1885_v32 = vld [vmem:[#allocation2 + $0xa0] sm:$0xff] }
 0x110   :  { %v1485_v27 = vsel %vm12_vm1, %v1412_v13, %v1414_v19  ;;  %1547 = vst.msk [vmem:[#allocation2 + $0xc0] sm:$0xff] %vm132_vm2, %v1412_v13  ;;  %3815 = vmatprep.subr.bf16.mxu0 %v3814_v9  ;;  %3837 = vmatprep.subr.bf16.mxu1 %v5529_v46  ;;  %v2352_v9 = vld [vmem:[%s7306_s1 + $0x878] sm:$0xff]  ;;  %v2354_v19 = vld [vmem:[%s7306_s1 + $0x888] sm:$0xff] }
 0x111   :  { %1548 = vst.msk [vmem:[#allocation2 + $0xc8] sm:$0xff] %vm134_vm4, %v1485_v27  ;;  %624 = vrot.lane.b32.xlu1 %v514_v30, %s4091_s20  ;;  %v3822_v17 = vpack.c.bf16 %v2352_v9, %v2350_v23  ;;  %v2356_v13 = vld [vmem:[%s7306_s1 + $0x898] sm:$0xff]  ;;  %v516_v27 = vmax.f32 %v472_v35, 0.0  ;;  %v3824_v9 = vpack.c.bf16 %v2351_v24, %v2349_v54 }
 0x112   :  { %296 = vrot.lane.b32.xlu0 %v5319_v25, %s4090_s30  ;;  %v3826_v35 = vpack.c.bf16 %v2356_v13, %v2354_v19  ;;  %v2357_v19 = vld [vmem:[%s7306_s1 + $0x8a0] sm:$0xff]  ;;  %v2359_v13 = vld [vmem:[%s7306_s1 + $0x8b0] sm:$0xff] }
 0x113   :  { %v587_v46 = vpop.permute.xlu1 %586  ;;  %v585_v44 = vpop.permute.xlu0 %584  ;;  %v1881_v63 = vld [vmem:[#allocation2 + $0x80] sm:$0xff]  ;;  %3817 = vmatpush1.bf16.msra.mxu0 %v3816_v29  ;;  %3853 = vmatpush1.bf16.msra.mxu1 %v5560_v22  ;;  %v1880_v22 = vld [vmem:[#allocation2 + $0x78] sm:$0xff] }
 0x114   :  { %v669_v30 = vsel %vm134_vm4, %v585_v44, %v587_v46  ;;  %736 = vst.msk [vmem:[#allocation2 + $0xe8] sm:$0xff] %vm442_vm5, %v585_v44  ;;  %3130 = vmatprep.mubr.f32.mxu0 %v1881_v63  ;;  %3819 = vmatprep.subr.bf16.mxu0 %v3818_v0  ;;  %v1628_v0 = vld [vmem:[%s7305_s0 + $0x168] sm:$0xff]  ;;  %v2355_v46 = vld [vmem:[%s7306_s1 + $0x890] sm:$0xff]  ;;  %v2360_v63 = vld [vmem:[%s7306_s1 + $0x8b8] sm:$0xff] }
 0x115   :  { %737 = vst.msk [vmem:[#allocation2 + $0xf0] sm:$0xff] %vm444_vm0, %v669_v30  ;;  %1705 = vrot.lane.b32.xlu1 %v5365_v6, %s4091_s20  ;;  %v1886_v29 = vld [vmem:[#allocation2 + $0xa8] sm:$0xff]  ;;  %3131 = vmatmul.mubr.f32.gmra.mrb[2].mxu0 %v1880_v22  ;;  %v6290_v36 = vmax.f32 %v1628_v0, 0.0  ;;  %v1630_v22 = vld [vmem:[%s7305_s0 + $0x178] sm:$0xff] }
 0x116   :  { %626 = vrot.lane.b32.xlu0 %v5683_v59, %s4091_s20  ;;  %1097 = vst.msk [vmem:[#allocation2 + $0xf0] sm:$0xff] %vm1090_vm3, %v5509_v40  ;;  %2718 = vmatprep.mubr.f32.mxu1 %v1886_v29  ;;  %v2353_v40 = vld [vmem:[%s7306_s1 + $0x880] sm:$0xff]  ;;  %v2358_v44 = vld [vmem:[%s7306_s1 + $0x8a8] sm:$0xff] }
 0x117   :  { %v1416_v23 = vpop.permute.xlu1 %1415  ;;  %v6292_v6 = vpop.permute.xlu0 %1711  ;;  %2719 = vmatmul.mubr.f32.gmra.mrb[4].mxu1 %v1885_v32  ;;  %3821 = vmatpush1.bf16.msra.mxu0 %v3820_v41  ;;  %1272 = vst.msk [vmem:[#allocation2 + $0x5d0] sm:$0xff] %vm12_vm1, %v6290_v36  ;;  %v3828_v30 = vpack.c.bf16 %v2355_v46, %v2353_v40  ;;  %v3830_v24 = vpack.c.bf16 %v2360_v63, %v2358_v44  ;;  %v7415_v44 = vld [vmem:[#allocation5_spill] sm:$0xff]  ;;  %v7416_v63 = vld [vmem:[#allocation10_spill] sm:$0xff] }
 0x118   :  { %1549 = vst.msk [vmem:[#allocation2 + $0x108] sm:$0xff] %vm132_vm2, %v1416_v23  ;;  %3823 = vmatprep.subr.bf16.mxu0 %v3822_v17  ;;  %3838 = vmatprep.subr.bf16.mxu1 %v5565_v48  ;;  %1275 = vst.msk [vmem:[#allocation2 + $0x5d0] sm:$0xff] %vm132_vm2, %v6123_v45  ;;  %v474_v48 = vld [vmem:[%s7305_s0 + $0xd0] sm:$0xff] }
 0x119   :  { %1833 = vst.msk [vmem:[#allocation2 + $0xc8] sm:$0xff] %vm442_vm5, %v6292_v6  ;;  %628 = vrot.lane.b32.xlu1 %v516_v27, %s4091_s20  ;;  %3854 = vmatpush1.bf16.msra.mxu1 %v5587_v58  ;;  %v6337_v27 = vmax.f32 %v1630_v22, 0.0  ;;  %v7421_v22 = vld [vmem:[#allocation7_spill] sm:$0xff] }
 0x11a   :  { %300 = vrot.lane.b32.xlu0 %v5498_v26, %s4090_s30  ;;  %3839 = vmatprep.subr.bf16.mxu1 %v5594_v53  ;;  %v518_v53 = vmax.f32 %v474_v48, 0.0 }
 0x11b   :  { %v589_v41 = vpop.permute.xlu1 %588  ;;  %v1418_v54 = vpop.permute.xlu0 %1417  ;;  %3825 = vmatpush1.bf16.msra.mxu0 %v3824_v9  ;;  %v1894_v29 = vld [vmem:[#allocation2 + $0xe8] sm:$0xff]  ;;  %1274 = vst.msk [vmem:[#allocation2 + $0x618] sm:$0xff] %vm12_vm1, %v6337_v27 }
 0x11c   :  { %v1486_v17 = vsel %vm12_vm1, %v1416_v23, %v1418_v54  ;;  %3827 = vmatprep.subr.bf16.mxu0 %v3826_v35  ;;  %v3832_v23 = vpack.c.bf16 %v2359_v13, %v2357_v19  ;;  %1277 = vst.msk [vmem:[#allocation2 + $0x618] sm:$0xff] %vm132_vm2, %v6123_v45  ;;  %v476_v35 = vld [vmem:[%s7305_s0 + $0xe0] sm:$0xff]  ;;  %v7417_v54 = vld [vmem:[#allocation12_spill] sm:$0xff] }
 0x11d   :  { %1550 = vst.msk [vmem:[#allocation2 + $0x110] sm:$0xff] %vm134_vm4, %v1486_v17  ;;  %1709 = vrot.lane.b32.xlu1 %v5552_v38, %s4091_s20  ;;  %v1895_v58 = vld [vmem:[#allocation2 + $0xf0] sm:$0xff]  ;;  %3855 = vmatpush1.bf16.msra.mxu1 %v5622_v10  ;;  %v1889_v10 = vld [vmem:[#allocation2 + $0xc0] sm:$0xff] }
 0x11e   :  { %630 = vrot.lane.b32.xlu0 %v5748_v7, %s4091_s20  ;;  %2724 = vmatprep.mubr.f32.mxu1 %v1895_v58  ;;  %v7418_v17 = vld [vmem:[#allocation13_spill] sm:$0xff]  ;;  %v7419_v19 = vld [vmem:[#allocation15_spill] sm:$0xff]  ;;  %v7420_v58 = vld [vmem:[#allocation16_spill] sm:$0xff] }
 0x11f   :  { %v6340_v0 = vpop.permute.xlu1 %1715  ;;  %v591_v32 = vpop.permute.xlu0 %590  ;;  %2725 = vmatmul.mubr.f32.gmra.mrb[6].mxu1 %v1894_v29  ;;  %3829 = vmatpush1.bf16.msra.mxu0 %v3828_v30 }
 0x120   :  { %v1890_v38 = vld [vmem:[#allocation2 + $0xc8] sm:$0xff]  ;;  %1835 = vst.msk [vmem:[#allocation2 + $0x110] sm:$0xff] %vm442_vm5, %v6340_v0  ;;  %v670_v9 = vsel %vm134_vm4, %v589_v41, %v591_v32  ;;  %3831 = vmatprep.subr.bf16.mxu0 %v3830_v24  ;;  %3840 = vmatprep.subr.bf16.mxu1 %v5627_v18 }
 0x121   :  { %3136 = vmatprep.mubr.f32.mxu0 %v1890_v38  ;;  %739 = vst.msk [vmem:[#allocation2 + $0x138] sm:$0xff] %vm444_vm0, %v670_v9  ;;  %632 = vrot.lane.b32.xlu1 %v518_v53, %s4091_s20  ;;  %v7422_v38 = vld [vmem:[#allocation19_spill] sm:$0xff] }
 0x122   :  { %304 = vrot.lane.b32.xlu0 %v5615_v4, %s4090_s30  ;;  %1099 = vst.msk [vmem:[#allocation2 + $0x138] sm:$0xff] %vm1090_vm3, %v5554_v12  ;;  %3137 = vmatmul.mubr.f32.gmra.mrb[4].mxu0 %v1889_v10  ;;  %v520_v12 = vmax.f32 %v476_v35, 0.0  ;;  %v7424_v10 = vld [vmem:[#allocation20_spill] sm:$0xff] }
 0x123   :  { %v1420_v40 = vpop.permute.xlu1 %1419  ;;  %v265_v46 = vpop.permute.xlu0 %264  ;;  %3833 = vmatpush1.bf16.msra.mxu0 %v3832_v23  ;;  %3856 = vmatpush1.bf16.msra.mxu1 %v5655_v21  ;;  %v7423_v23 = vld [vmem:[#allocation6_spill] sm:$0xff] }
 0x124   :  { %1551 = vst.msk [vmem:[#allocation2 + $0x150] sm:$0xff] %vm132_vm2, %v1420_v40  ;;  %v342_v45 = vsel %vm12_vm1, %v7415_v44, %v265_v46  ;;  %3841 = vmatprep.subr.bf16.mxu1 %v7416_v63  ;;  %v7426_v44 = vld [vmem:[#allocation22_spill] sm:$0xff] }
 0x125   :  { %403 = vst.msk [vmem:[#allocation2 + $0x130] sm:$0xff] %vm134_vm4, %v342_v45  ;;  %1713 = vrot.lane.b32.xlu1 %v5319_v25, %s4091_s20 }
 0x126   :  { %634 = vrot.lane.b32.xlu0 %v5138_v42, %s4091_s20  ;;  %738 = vst.msk [vmem:[#allocation2 + $0x130] sm:$0xff] %vm442_vm5, %v589_v41  ;;  %v1898_v42 = vld [vmem:[#allocation2 + $0x108] sm:$0xff] }
 0x127   :  { %v593_v18 = vpop.permute.xlu1 %592  ;;  %v1422_v21 = vpop.permute.xlu0 %1421  ;;  %v1899_v48 = vld [vmem:[#allocation2 + $0x110] sm:$0xff]  ;;  %3857 = vmatpush1.bf16.msra.mxu1 %v7417_v54 }
 0x128   :  { %v1487_v30 = vsel %vm12_vm1, %v1420_v40, %v1422_v21  ;;  %3142 = vmatprep.mubr.f32.mxu0 %v1899_v48  ;;  %3842 = vmatprep.subr.bf16.mxu1 %v7418_v17  ;;  %v7428_v54 = vld [vmem:[#allocation25_spill] sm:$0xff]  ;;  %v7430_v17 = vld [vmem:[#allocation8_spill] sm:$0xff] }
 0x129   :  { %1552 = vst.msk [vmem:[#allocation2 + $0x158] sm:$0xff] %vm134_vm4, %v1487_v30  ;;  %636 = vrot.lane.b32.xlu1 %v520_v12, %s4091_s20  ;;  %v1904_v25 = vld [vmem:[#allocation2 + $0x138] sm:$0xff]  ;;  %3143 = vmatmul.mubr.f32.gmra.mrb[6].mxu0 %v1898_v42  ;;  %v6435_v42 = vld [vmem:[%s7305_s0 + $0xe8] sm:$0xff] }
 0x12a   :  { %308 = vrot.lane.b32.xlu0 %v5683_v59, %s4090_s30  ;;  %2730 = vmatprep.mubr.f32.mxu1 %v1904_v25 }
 0x12b   :  { %v6377_v41 = vpop.permute.xlu1 %1719  ;;  %v595_v24 = vpop.permute.xlu0 %594  ;;  %3858 = vmatpush1.bf16.msra.mxu1 %v7419_v19  ;;  %v1907_v63 = vld [vmem:[#allocation2 + $0x150] sm:$0xff] }
 0x12c   :  { %1837 = vst.msk [vmem:[#allocation2 + $0x158] sm:$0xff] %vm442_vm5, %v6377_v41  ;;  %v671_v13 = vsel %vm134_vm4, %v593_v18, %v595_v24  ;;  %3843 = vmatprep.subr.bf16.mxu1 %v7420_v58  ;;  %v7431_v19 = vld [vmem:[#allocation29_spill] sm:$0xff] }
 0x12d   :  { %741 = vst.msk [vmem:[#allocation2 + $0x180] sm:$0xff] %vm444_vm0, %v671_v13  ;;  %1717 = vrot.lane.b32.xlu1 %v5498_v26, %s4091_s20  ;;  %v1903_v53 = vld [vmem:[#allocation2 + $0x130] sm:$0xff]  ;;  %v6406_v26 = vld [vmem:[%s7305_s0 + $0x100] sm:$0xff] }
 0x12e   :  { %638 = vrot.lane.b32.xlu0 %v5195_v8, %s4091_s20  ;;  %1101 = vst.msk [vmem:[#allocation2 + $0x180] sm:$0xff] %vm1090_vm3, %v7421_v22  ;;  %2731 = vmatmul.mubr.f32.gmra.mrb[8].mxu1 %v1903_v53  ;;  %v7425_v8 = vmax.f32 %v6164_v50, 0.0  ;;  %v7427_v50 = vld [vmem:[#allocation23_spill] sm:$0xff]  ;;  %v7432_v13 = vld [vmem:[#allocation9_spill] sm:$0xff]  ;;  %v7433_v53 = vld [vmem:[#allocation30_spill] sm:$0xff] }
 0x12f   :  { %v1424_v29 = vpop.permute.xlu1 %1423  ;;  %v269_v32 = vpop.permute.xlu0 %268  ;;  %3859 = vmatpush1.bf16.msra.mxu1 %v7422_v38  ;;  %v7434_v22 = vld [vmem:[#allocation3_spill] sm:$0xff] }
 0x130   :  { %1553 = vst.msk [vmem:[#allocation2 + $0x198] sm:$0xff] %vm132_vm2, %v1424_v29  ;;  %v343_v9 = vsel %vm12_vm1, %v7423_v23, %v269_v32  ;;  %3844 = vmatprep.subr.bf16.mxu1 %v7424_v10 }
 0x131   :  { %405 = vst.msk [vmem:[#allocation2 + $0x178] sm:$0xff] %vm134_vm4, %v343_v9  ;;  %640 = vrot.lane.b32.xlu1 %v7425_v8, %s4091_s20 }
 0x132   :  { %312 = vrot.lane.b32.xlu0 %v5748_v7, %s4090_s30  ;;  %740 = vst.msk [vmem:[#allocation2 + $0x178] sm:$0xff] %vm442_vm5, %v593_v18  ;;  %v524_v18 = vmax.f32 %v6406_v26, 0.0 }
 0x133   :  { %v597_v35 = vpop.permute.xlu1 %596  ;;  %v1426_v40 = vpop.permute.xlu0 %1425  ;;  %v1908_v46 = vld [vmem:[#allocation2 + $0x158] sm:$0xff]  ;;  %3860 = vmatpush1.bf16.msra.mxu1 %v7426_v44 }
 0x134   :  { %v1488_v45 = vsel %vm12_vm1, %v1424_v29, %v1426_v40  ;;  %3148 = vmatprep.mubr.f32.mxu0 %v1908_v46  ;;  %3845 = vmatprep.subr.bf16.mxu1 %v7427_v50  ;;  %v211_v29 = vmax.f32 %v6435_v42, 0.0  ;;  %v7435_v40 = vld [vmem:[#allocation33_spill] sm:$0xff]  ;;  %v7436_v44 = vld [vmem:[#allocation34_spill] sm:$0xff] }
 0x135   :  { %1554 = vst.msk [vmem:[#allocation2 + $0x1a0] sm:$0xff] %vm134_vm4, %v1488_v45  ;;  %1721 = vrot.lane.b32.xlu1 %v5615_v4, %s4091_s20  ;;  %v1913_v12 = vld [vmem:[#allocation2 + $0x180] sm:$0xff]  ;;  %3149 = vmatmul.mubr.f32.gmra.mrb[8].mxu0 %v1907_v63  ;;  %v7429_v4 = vld [vmem:[#allocation26_spill] sm:$0xff]  ;;  %v7437_v45 = vld [vmem:[#allocation4_spill] sm:$0xff] }
 0x136   :  { %642 = vrot.lane.b32.xlu0 %v5237_v56, %s4091_s20  ;;  %2736 = vmatprep.mubr.f32.mxu1 %v1913_v12 }
 0x137   :  { %v6417_v21 = vpop.permute.xlu1 %1723  ;;  %v599_v48 = vpop.permute.xlu0 %598  ;;  %3861 = vmatpush1.bf16.msra.mxu1 %v7428_v54  ;;  %v485_v54 = vld [vmem:[%s7305_s0 + $0x128] sm:$0xff] }
 0x138   :  { %1839 = vst.msk [vmem:[#allocation2 + $0x1a0] sm:$0xff] %vm442_vm5, %v6417_v21  ;;  %v672_v30 = vsel %vm134_vm4, %v597_v35, %v599_v48  ;;  %3846 = vmatprep.subr.bf16.mxu1 %v7429_v4  ;;  %v7438_v48 = vld [vmem:[#allocation14_spill] sm:$0xff] }
 0x139   :  { %743 = vst.msk [vmem:[#allocation2 + $0x1c8] sm:$0xff] %vm444_vm0, %v672_v30  ;;  %644 = vrot.lane.b32.xlu1 %v524_v18, %s4091_s20  ;;  %v1912_v56 = vld [vmem:[#allocation2 + $0x178] sm:$0xff] }
 0x13a   :  { %316 = vrot.lane.b32.xlu0 %v5947_v57, %s4090_s30  ;;  %1103 = vst.msk [vmem:[#allocation2 + $0x1c8] sm:$0xff] %vm1090_vm3, %v7430_v17  ;;  %2737 = vmatmul.mubr.f32.gmra.mrb[10].mxu1 %v1912_v56  ;;  %v7439_v56 = vld [vmem:[#allocation37_spill] sm:$0xff] }
 0x13b   :  { %v1428_v25 = vpop.permute.xlu1 %1427  ;;  %v273_v24 = vpop.permute.xlu0 %272  ;;  %3862 = vmatpush1.bf16.msra.mxu1 %v7431_v19 }
 0x13c   :  { %1555 = vst.msk [vmem:[#allocation2 + $0x1e0] sm:$0xff] %vm132_vm2, %v1428_v25  ;;  %v344_v58 = vsel %vm12_vm1, %v7432_v13, %v273_v24  ;;  %3847 = vmatprep.subr.bf16.mxu1 %v7433_v53  ;;  %v486_v24 = vld [vmem:[%s7305_s0 + $0x130] sm:$0xff] }
 0x13d   :  { %407 = vst.msk [vmem:[#allocation2 + $0x1c0] sm:$0xff] %vm134_vm4, %v344_v58  ;;  %1725 = vrot.lane.b32.xlu1 %v5683_v59, %s4091_s20  ;;  %v1916_v59 = vld [vmem:[#allocation2 + $0x198] sm:$0xff] }
 0x13e   :  { %646 = vrot.lane.b32.xlu0 %v7434_v22, %s4091_s20  ;;  %742 = vst.msk [vmem:[#allocation2 + $0x1c0] sm:$0xff] %vm442_vm5, %v597_v35 }
 0x13f   :  { %v601_v32 = vpop.permute.xlu1 %600  ;;  %v1430_v38 = vpop.permute.xlu0 %1429  ;;  %v1917_v23 = vld [vmem:[#allocation2 + $0x1a0] sm:$0xff]  ;;  %3863 = vmatpush1.bf16.msra.mxu1 %v5877_v61 }
 0x140   :  { %v1489_v9 = vsel %vm12_vm1, %v1428_v25, %v1430_v38  ;;  %3154 = vmatprep.mubr.f32.mxu0 %v1917_v23  ;;  %3848 = vmatprep.subr.bf16.mxu1 %v5884_v51  ;;  %v484_v61 = vld [vmem:[%s7305_s0 + $0x120] sm:$0xff]  ;;  %v6464_v51 = vld [vmem:[%s7305_s0 + $0xf8] sm:$0xff]  ;;  %v6496_v25 = vmax.f32 %v485_v54, 0.0  ;;  %v6508_v23 = vmax.f32 %v486_v24, 0.0 }
 0x141   :  { %1556 = vst.msk [vmem:[#allocation2 + $0x1e8] sm:$0xff] %vm134_vm4, %v1489_v9  ;;  %648 = vrot.lane.b32.xlu1 %v6205_v31, %s4091_s20  ;;  %v1922_v10 = vld [vmem:[#allocation2 + $0x1c8] sm:$0xff]  ;;  %3155 = vmatmul.mubr.f32.gmra.mrb[10].mxu0 %v1916_v59  ;;  %v6478_v63 = vmax.f32 %v484_v61, 0.0  ;;  %v213_v12 = vmax.f32 %v6464_v51, 0.0  ;;  %v487_v9 = vld [vmem:[%s7305_s0 + $0x138] sm:$0xff] }
 0x142   :  { %320 = vrot.lane.b32.xlu0 %v211_v29, %s4090_s30  ;;  %2742 = vmatprep.mubr.f32.mxu1 %v1922_v10  ;;  %v491_v51 = vld [vmem:[%s7305_s0 + $0x158] sm:$0xff] }
 0x143   :  { %v6466_v8 = vpop.permute.xlu1 %1727  ;;  %v603_v35 = vpop.permute.xlu0 %602  ;;  %3864 = vmatpush1.bf16.msra.mxu1 %v7435_v40  ;;  %v1925_v38 = vld [vmem:[#allocation2 + $0x1e0] sm:$0xff]  ;;  %v7441_v40 = vld [vmem:[#allocation17_spill] sm:$0xff] }
 0x144   :  { %1841 = vst.msk [vmem:[#allocation2 + $0x1e8] sm:$0xff] %vm442_vm5, %v6466_v8  ;;  %v673_v46 = vsel %vm134_vm4, %v601_v32, %v603_v35  ;;  %3849 = vmatprep.subr.bf16.mxu1 %v7436_v44  ;;  %v6523_v35 = vmax.f32 %v487_v9, 0.0 }
 0x145   :  { %745 = vst.msk [vmem:[#allocation2 + $0x210] sm:$0xff] %vm444_vm0, %v673_v46  ;;  %1729 = vrot.lane.b32.xlu1 %v5748_v7, %s4091_s20  ;;  %v1921_v50 = vld [vmem:[#allocation2 + $0x1c0] sm:$0xff] }
 0x146   :  { %650 = vrot.lane.b32.xlu0 %v7437_v45, %s4091_s20  ;;  %1105 = vst.msk [vmem:[#allocation2 + $0x210] sm:$0xff] %vm1090_vm3, %v7438_v48  ;;  %2743 = vmatmul.mubr.f32.gmra.mrb[12].mxu1 %v1921_v50  ;;  %v7440_v7 = vld [vmem:[#allocation11_spill] sm:$0xff]  ;;  %v7442_v48 = vld [vmem:[#allocation18_spill] sm:$0xff] }
 0x147   :  { %v1432_v30 = vpop.permute.xlu1 %1431  ;;  %v277_v4 = vpop.permute.xlu0 %276  ;;  %3865 = vmatpush1.bf16.msra.mxu1 %v7439_v56  ;;  %v488_v46 = vld [vmem:[%s7305_s0 + $0x140] sm:$0xff] }
 0x148   :  { %1557 = vst.msk [vmem:[#allocation2 + $0x228] sm:$0xff] %vm132_vm2, %v1432_v30  ;;  %v345_v17 = vsel %vm12_vm1, %v7440_v7, %v277_v4 }
 0x149   :  { %409 = vst.msk [vmem:[#allocation2 + $0x208] sm:$0xff] %vm134_vm4, %v345_v17  ;;  %652 = vrot.lane.b32.xlu1 %v6478_v63, %s4091_s20 }
 0x14a   :  { %324 = vrot.lane.b32.xlu0 %v213_v12, %s4090_s30  ;;  %744 = vst.msk [vmem:[#allocation2 + $0x208] sm:$0xff] %vm442_vm5, %v601_v32 }
 0x14b   :  { %v605_v19 = vpop.permute.xlu1 %604  ;;  %v1434_v13 = vpop.permute.xlu0 %1433  ;;  %v1926_v58 = vld [vmem:[#allocation2 + $0x1e8] sm:$0xff] }
 0x14c   :  { %v1490_v53 = vsel %vm12_vm1, %v1432_v30, %v1434_v13  ;;  %3160 = vmatprep.mubr.f32.mxu0 %v1926_v58  ;;  %v489_v30 = vld [vmem:[%s7305_s0 + $0x148] sm:$0xff] }
 0x14d   :  { %1558 = vst.msk [vmem:[#allocation2 + $0x230] sm:$0xff] %vm134_vm4, %v1490_v53  ;;  %1733 = vrot.lane.b32.xlu1 %v5947_v57, %s4091_s20  ;;  %v1931_v32 = vld [vmem:[#allocation2 + $0x210] sm:$0xff]  ;;  %3161 = vmatmul.mubr.f32.gmra.mrb[12].mxu0 %v1925_v38  ;;  %v6551_v24 = vmax.f32 %v489_v30, 0.0  ;;  %v1168_v13 = vld [vmem:[%s7305_s0 + $0xe8] sm:$0xff] }
 0x14e   :  { %654 = vrot.lane.b32.xlu0 %v6496_v25, %s4091_s20  ;;  %2748 = vmatprep.mubr.f32.mxu1 %v1931_v32  ;;  %v1212_v38 = vmax.f32 %v1168_v13, 0.0 }
 0x14f   :  { %v6513_v59 = vpop.permute.xlu1 %1731  ;;  %v607_v10 = vpop.permute.xlu0 %606  ;;  %v1934_v42 = vld [vmem:[#allocation2 + $0x228] sm:$0xff] }
 0x150   :  { %1843 = vst.msk [vmem:[#allocation2 + $0x230] sm:$0xff] %vm442_vm5, %v6513_v59  ;;  %v674_v57 = vsel %vm134_vm4, %v605_v19, %v607_v10  ;;  %v7443_v10 = vld [vmem:[#allocation24_spill] sm:$0xff] }
 0x151   :  { %747 = vst.msk [vmem:[#allocation2 + $0x258] sm:$0xff] %vm444_vm0, %v674_v57  ;;  %656 = vrot.lane.b32.xlu1 %v6508_v23, %s4091_s20  ;;  %v1930_v61 = vld [vmem:[#allocation2 + $0x208] sm:$0xff] }
 0x152   :  { %328 = vrot.lane.b32.xlu0 %v7434_v22, %s4090_s30  ;;  %1107 = vst.msk [vmem:[#allocation2 + $0x258] sm:$0xff] %vm1090_vm3, %v7441_v40  ;;  %2749 = vmatmul.mubr.f32.gmra.mrb[14].mxu1 %v1930_v61  ;;  %v6539_v22 = vmax.f32 %v488_v46, 0.0  ;;  %v1616_v57 = vld [vmem:[%s7305_s0 + $0x108] sm:$0xff]  ;;  %v7444_v40 = vld [vmem:[#allocation21_spill] sm:$0xff] }
 0x153   :  { %v1436_v44 = vpop.permute.xlu1 %1435  ;;  %v281_v50 = vpop.permute.xlu0 %280  ;;  %1256 = vst.msk [vmem:[#allocation2 + $0x390] sm:$0xff] %vm12_vm1, %v1212_v38  ;;  %v7445_v38 = vld [vmem:[#allocation27_spill] sm:$0xff] }
 0x154   :  { %1559 = vst.msk [vmem:[#allocation2 + $0x270] sm:$0xff] %vm132_vm2, %v1436_v44  ;;  %v346_v54 = vsel %vm12_vm1, %v7442_v48, %v281_v50  ;;  %v6589_v50 = vmax.f32 %v491_v51, 0.0  ;;  %v1170_v48 = vld [vmem:[%s7305_s0 + $0xf8] sm:$0xff]  ;;  %v7446_v51 = vld [vmem:[#allocation28_spill] sm:$0xff] }
 0x155   :  { %411 = vst.msk [vmem:[#allocation2 + $0x250] sm:$0xff] %vm134_vm4, %v346_v54  ;;  %1737 = vrot.lane.b32.xlu1 %v211_v29, %s4091_s20 }
 0x156   :  { %658 = vrot.lane.b32.xlu0 %v6523_v35, %s4091_s20  ;;  %746 = vst.msk [vmem:[#allocation2 + $0x250] sm:$0xff] %vm442_vm5, %v605_v19  ;;  %v490_v19 = vld [vmem:[%s7305_s0 + $0x150] sm:$0xff] }
 0x157   :  { %v609_v4 = vpop.permute.xlu1 %608  ;;  %v1438_v56 = vpop.permute.xlu0 %1437  ;;  %v1935_v7 = vld [vmem:[#allocation2 + $0x230] sm:$0xff]  ;;  %v6570_v9 = vmax.f32 %v490_v19, 0.0 }
 0x158   :  { %v1491_v17 = vsel %vm12_vm1, %v1436_v44, %v1438_v56  ;;  %3166 = vmatprep.mubr.f32.mxu0 %v1935_v7  ;;  %v1652_v44 = vmax.f32 %v1616_v57, 0.0  ;;  %v1214_v7 = vmax.f32 %v1170_v48, 0.0 }
 0x159   :  { %1560 = vst.msk [vmem:[#allocation2 + $0x278] sm:$0xff] %vm134_vm4, %v1491_v17  ;;  %660 = vrot.lane.b32.xlu1 %v6539_v22, %s4091_s20  ;;  %v1940_v29 = vld [vmem:[#allocation2 + $0x258] sm:$0xff]  ;;  %3167 = vmatmul.mubr.f32.gmra.mrb[14].mxu0 %v1934_v42 }
 0x15a   :  { %332 = vrot.lane.b32.xlu0 %v7437_v45, %s4090_s30  ;;  %2754 = vmatprep.mubr.f32.mxu1 %v1940_v29  ;;  %1258 = vst.msk [vmem:[#allocation2 + $0x3d8] sm:$0xff] %vm12_vm1, %v1214_v7 }
 0x15b   :  { %v6559_v58 = vpop.permute.xlu1 %1735  ;;  %v611_v53 = vpop.permute.xlu0 %610  ;;  %v1943_v42 = vld [vmem:[#allocation2 + $0x270] sm:$0xff] }
 0x15c   :  { %1845 = vst.msk [vmem:[#allocation2 + $0x278] sm:$0xff] %vm442_vm5, %v6559_v58  ;;  %v675_v45 = vsel %vm134_vm4, %v609_v4, %v611_v53 }
 0x15d   :  { %749 = vst.msk [vmem:[#allocation2 + $0x2a0] sm:$0xff] %vm444_vm0, %v675_v45  ;;  %1741 = vrot.lane.b32.xlu1 %v213_v12, %s4091_s20  ;;  %v1939_v32 = vld [vmem:[#allocation2 + $0x250] sm:$0xff]  ;;  %v1172_v45 = vld [vmem:[%s7305_s0 + $0x108] sm:$0xff] }
 0x15e   :  { %662 = vrot.lane.b32.xlu0 %v6551_v24, %s4091_s20  ;;  %1109 = vst.msk [vmem:[#allocation2 + $0x2a0] sm:$0xff] %vm1090_vm3, %v7443_v10  ;;  %2755 = vmatmul.mubr.f32.gmra.mrb[16].mxu1 %v1939_v32  ;;  %v1216_v57 = vmax.f32 %v1172_v45, 0.0 }
 0x15f   :  { %v1440_v12 = vpop.permute.xlu1 %1439  ;;  %v285_v61 = vpop.permute.xlu0 %284 }
 0x160   :  { %1561 = vst.msk [vmem:[#allocation2 + $0x2b8] sm:$0xff] %vm132_vm2, %v1440_v12  ;;  %v347_v46 = vsel %vm12_vm1, %v7444_v40, %v285_v61 }
 0x161   :  { %413 = vst.msk [vmem:[#allocation2 + $0x298] sm:$0xff] %vm134_vm4, %v347_v46  ;;  %664 = vrot.lane.b32.xlu1 %v6570_v9, %s4091_s20 }
 0x162   :  { %336 = vrot.lane.b32.xlu0 %v6496_v25, %s4090_s30  ;;  %748 = vst.msk [vmem:[#allocation2 + $0x298] sm:$0xff] %vm442_vm5, %v609_v4 }
 0x163   :  { %v613_v54 = vpop.permute.xlu1 %612  ;;  %v1442_v30 = vpop.permute.xlu0 %1441  ;;  %v1944_v56 = vld [vmem:[#allocation2 + $0x278] sm:$0xff]  ;;  %1260 = vst.msk [vmem:[#allocation2 + $0x420] sm:$0xff] %vm12_vm1, %v1216_v57 }
 0x164   :  { %v1492_v17 = vsel %vm12_vm1, %v1440_v12, %v1442_v30  ;;  %3172 = vmatprep.mubr.f32.mxu0 %v1944_v56  ;;  %v7447_v56 = vld [vmem:[#allocation32_spill] sm:$0xff] }
 0x165   :  { %1562 = vst.msk [vmem:[#allocation2 + $0x2c0] sm:$0xff] %vm134_vm4, %v1492_v17  ;;  %1745 = vrot.lane.b32.xlu1 %v1652_v44, %s4091_s20  ;;  %v1949_v4 = vld [vmem:[#allocation2 + $0x2a0] sm:$0xff]  ;;  %3173 = vmatmul.mubr.f32.gmra.mrb[16].mxu0 %v1943_v42 }
 0x166   :  { %666 = vrot.lane.b32.xlu0 %v6589_v50, %s4091_s20  ;;  %2760 = vmatprep.mubr.f32.mxu1 %v1949_v4  ;;  %v7448_v42 = vld [vmem:[#allocation31_spill] sm:$0xff] }
 0x167   :  { %v6601_v29 = vpop.permute.xlu1 %1739  ;;  %v615_v19 = vpop.permute.xlu0 %614  ;;  %v1952_v46 = vld [vmem:[#allocation2 + $0x2b8] sm:$0xff] }
 0x168   :  { %1847 = vst.msk [vmem:[#allocation2 + $0x2c0] sm:$0xff] %vm442_vm5, %v6601_v29  ;;  %v676_v13 = vsel %vm134_vm4, %v613_v54, %v615_v19 }
 0x169   :  { %751 = vst.msk [vmem:[#allocation2 + $0x2e8] sm:$0xff] %vm444_vm0, %v676_v13  ;;  %1451 = vrot.lane.b32.xlu1 %v524_v18, %s4090_s30  ;;  %v1948_v53 = vld [vmem:[#allocation2 + $0x298] sm:$0xff] }
 0x16a   :  { %340 = vrot.lane.b32.xlu0 %v6523_v35, %s4090_s30  ;;  %1111 = vst.msk [vmem:[#allocation2 + $0x2e8] sm:$0xff] %vm1090_vm3, %v7445_v38  ;;  %2761 = vmatmul.mubr.f32.gmra.mrb[18].mxu1 %v1948_v53 }
 0x16b   :  { %v1444_v32 = vpop.permute.xlu1 %1443  ;;  %v289_v10 = vpop.permute.xlu0 %288 }
 0x16c   :  { %1563 = vst.msk [vmem:[#allocation2 + $0x300] sm:$0xff] %vm132_vm2, %v1444_v32  ;;  %v348_v26 = vsel %vm12_vm1, %v7446_v51, %v289_v10 }
 0x16d   :  { %415 = vst.msk [vmem:[#allocation2 + $0x2e0] sm:$0xff] %vm134_vm4, %v348_v26  ;;  %1749 = vrot.lane.b32.xlu1 %v6107_v62, %s4091_s20  ;;  %v7449_v26 = vld [vmem:[#allocation35_spill] sm:$0xff] }
 0x16e   :  { %1453 = vrot.lane.b32.xlu0 %v1652_v44, %s4090_s30  ;;  %750 = vst.msk [vmem:[#allocation2 + $0x2e0] sm:$0xff] %vm442_vm5, %v613_v54 }
 0x16f   :  { %v617_v18 = vpop.permute.xlu1 %616  ;;  %v1446_v12 = vpop.permute.xlu0 %1445  ;;  %v1953_v61 = vld [vmem:[#allocation2 + $0x2c0] sm:$0xff] }
 0x170   :  { %v1493_v40 = vsel %vm12_vm1, %v1444_v32, %v1446_v12  ;;  %3178 = vmatprep.mubr.f32.mxu0 %v1953_v61 }
 0x171   :  { %1564 = vst.msk [vmem:[#allocation2 + $0x308] sm:$0xff] %vm134_vm4, %v1493_v40  ;;  %1455 = vrot.lane.b32.xlu1 %v6205_v31, %s4090_s30  ;;  %v1958_v44 = vld [vmem:[#allocation2 + $0x2e8] sm:$0xff]  ;;  %3179 = vmatmul.mubr.f32.gmra.mrb[18].mxu0 %v1952_v46 }
 0x172   :  { %1751 = vrot.lane.b32.xlu0 %v6478_v63, %s4091_s20  ;;  %2766 = vmatprep.mubr.f32.mxu1 %v1958_v44  ;;  %v7450_v46 = vld [vmem:[#allocation36_spill] sm:$0xff] }
 0x173   :  { %v6632_v48 = vpop.permute.xlu1 %1743  ;;  %v619_v54 = vpop.permute.xlu0 %618 }
 0x174   :  { %1849 = vst.msk [vmem:[#allocation2 + $0x308] sm:$0xff] %vm442_vm5, %v6632_v48  ;;  %v677_v30 = vsel %vm134_vm4, %v617_v18, %v619_v54 }
 0x175   :  { %753 = vst.msk [vmem:[#allocation2 + $0x330] sm:$0xff] %vm444_vm0, %v677_v30  ;;  %1753 = vrot.lane.b32.xlu1 %v6496_v25, %s4091_s20  ;;  %v1957_v31 = vld [vmem:[#allocation2 + $0x2e0] sm:$0xff] }
 0x176   :  { %1457 = vrot.lane.b32.xlu0 %v6107_v62, %s4090_s30  ;;  %1113 = vst.msk [vmem:[#allocation2 + $0x330] sm:$0xff] %vm1090_vm3, %v7447_v56  ;;  %2767 = vmatmul.mubr.f32.gmra.mrb[20].mxu1 %v1957_v31  ;;  %v1176_v62 = vld [vmem:[%s7305_s0 + $0x128] sm:$0xff] }
 0x177   :  { %v1448_v7 = vpop.permute.xlu1 %1447  ;;  %v293_v17 = vpop.permute.xlu0 %292  ;;  %v1220_v19 = vmax.f32 %v1176_v62, 0.0  ;;  %v6704_v62 = vld [vmem:[#allocation2] sm:$0xff] }
 0x178   :  { %1565 = vst.msk [vmem:[#allocation2 + $0x348] sm:$0xff] %vm132_vm2, %v1448_v7  ;;  %v349_v4 = vsel %vm12_vm1, %v7448_v42, %v293_v17  ;;  %v1180_v17 = vld [vmem:[%s7305_s0 + $0x148] sm:$0xff] }
 0x179   :  { %417 = vst.msk [vmem:[#allocation2 + $0x328] sm:$0xff] %vm134_vm4, %v349_v4  ;;  %1459 = vrot.lane.b32.xlu1 %v6478_v63, %s4090_s30  ;;  %v1961_v63 = vld [vmem:[#allocation2 + $0x300] sm:$0xff]  ;;  %v1224_v42 = vmax.f32 %v1180_v17, 0.0 }
 0x17a   :  { %1755 = vrot.lane.b32.xlu0 %v6508_v23, %s4091_s20  ;;  %752 = vst.msk [vmem:[#allocation2 + $0x328] sm:$0xff] %vm442_vm5, %v617_v18  ;;  %v1178_v18 = vld [vmem:[%s7305_s0 + $0x138] sm:$0xff] }
 0x17b   :  { %v621_v13 = vpop.permute.xlu1 %620  ;;  %v1450_v53 = vpop.permute.xlu0 %1449  ;;  %v1962_v38 = vld [vmem:[#allocation2 + $0x308] sm:$0xff]  ;;  %1264 = vst.msk [vmem:[#allocation2 + $0x4b0] sm:$0xff] %vm12_vm1, %v1220_v19  ;;  %v1222_v40 = vmax.f32 %v1178_v18, 0.0  ;;  %v7451_v19 = vld [vmem:[#allocation38_spill] sm:$0xff]  ;;  %1268 = vst.msk [vmem:[#allocation2 + $0x540] sm:$0xff] %vm12_vm1, %v1224_v42 }
 0x17c   :  { %v1494_v45 = vsel %vm12_vm1, %v1448_v7, %v1450_v53  ;;  %3184 = vmatprep.mubr.f32.mxu0 %v1962_v38 }
 0x17d   :  { %1566 = vst.msk [vmem:[#allocation2 + $0x350] sm:$0xff] %vm134_vm4, %v1494_v45  ;;  %1757 = vrot.lane.b32.xlu1 %v6523_v35, %s4091_s20  ;;  %v1967_v32 = vld [vmem:[#allocation2 + $0x330] sm:$0xff]  ;;  %3185 = vmatmul.mubr.f32.gmra.mrb[20].mxu0 %v1961_v63 }
 0x17e   :  { %1461 = vrot.lane.b32.xlu0 %v6496_v25, %s4090_s30  ;;  %2772 = vmatprep.mubr.f32.mxu1 %v1967_v32  ;;  %1266 = vst.msk [vmem:[#allocation2 + $0x4f8] sm:$0xff] %vm12_vm1, %v1222_v40 }
 0x17f   :  { %v6663_v10 = vpop.permute.xlu1 %1747 }
 0x180   :  { %v623_v57 = vpop.permute.xlu0 %622  ;;  %1851 = vst.msk [vmem:[#allocation2 + $0x350] sm:$0xff] %vm442_vm5, %v6663_v10 }
 0x181   :  { %v678_v51 = vsel %vm134_vm4, %v621_v13, %v623_v57  ;;  %1463 = vrot.lane.b32.xlu1 %v6508_v23, %s4090_s30  ;;  %v1966_v25 = vld [vmem:[#allocation2 + $0x328] sm:$0xff] }
 0x182   :  { %755 = vst.msk [vmem:[#allocation2 + $0x378] sm:$0xff] %vm444_vm0, %v678_v51  ;;  %1759 = vrot.lane.b32.xlu0 %v6539_v22, %s4091_s20  ;;  %2773 = vmatmul.mubr.f32.gmra.mrb[22].mxu1 %v1966_v25  ;;  %v1629_v25 = vld [vmem:[%s7305_s0 + $0x170] sm:$0xff] }
 0x183   :  { %1115 = vst.msk [vmem:[#allocation2 + $0x378] sm:$0xff] %vm1090_vm3, %v7449_v26  ;;  %v625_v12 = vpop.permute.xlu1 %624  ;;  %v1665_v40 = vmax.f32 %v1629_v25, 0.0 }
 0x184   :  { %v297_v61 = vpop.permute.xlu0 %296 }
 0x185   :  { %v350_v44 = vsel %vm12_vm1, %v7450_v46, %v297_v61  ;;  %1761 = vrot.lane.b32.xlu1 %v6551_v24, %s4091_s20 }
 0x186   :  { %419 = vst.msk [vmem:[#allocation2 + $0x370] sm:$0xff] %vm134_vm4, %v350_v44  ;;  %1465 = vrot.lane.b32.xlu0 %v6523_v35, %s4090_s30  ;;  %v1970_v35 = vld [vmem:[#allocation2 + $0x348] sm:$0xff] }
 0x187   :  { %754 = vst.msk [vmem:[#allocation2 + $0x370] sm:$0xff] %vm442_vm5, %v621_v13  ;;  %v1706_v23 = vpop.permute.xlu1 %1705  ;;  %v1971_v30 = vld [vmem:[#allocation2 + $0x350] sm:$0xff] }
 0x188   :  { %v627_v54 = vpop.permute.xlu0 %626  ;;  %v1775_v31 = vsel %vm134_vm4, %v6178_v1, %v1706_v23  ;;  %3190 = vmatprep.mubr.f32.mxu0 %v1971_v30  ;;  %v1627_v1 = vld [vmem:[%s7305_s0 + $0x160] sm:$0xff] }
 0x189   :  { %v679_v56 = vsel %vm134_vm4, %v625_v12, %v627_v54  ;;  %1830 = vst.msk [vmem:[#allocation2 + $0x40] sm:$0xff] %vm444_vm0, %v1775_v31  ;;  %1467 = vrot.lane.b32.xlu1 %v6539_v22, %s4090_s30  ;;  %3191 = vmatmul.mubr.f32.gmra.mrb[22].mxu0 %v1970_v35  ;;  %v1663_v53 = vmax.f32 %v1627_v1, 0.0  ;;  %v7452_v35 = vld [vmem:[#allocation39_spill] sm:$0xff] }
 0x18a   :  { %757 = vst.msk [vmem:[#allocation2 + $0x3c0] sm:$0xff] %vm444_vm0, %v679_v56  ;;  %1763 = vrot.lane.b32.xlu0 %v6570_v9, %s4091_s20  ;;  %v1976_v7 = vld [vmem:[#allocation2 + $0x378] sm:$0xff]  ;;  %3333 = vmatprep.mubr.f32.mxu0 %v6704_v62 }
 0x18b   :  { %1117 = vst.msk [vmem:[#allocation2 + $0x3c0] sm:$0xff] %vm1090_vm3, %v5962_v14  ;;  %2778 = vmatprep.mubr.f32.mxu1 %v1976_v7  ;;  %v629_v22 = vpop.permute.xlu1 %628 }
 0x18c   :  { %v301_v4 = vpop.permute.xlu0 %300 }
 0x18d   :  { %v351_v13 = vsel %vm12_vm1, %v7451_v19, %v301_v4  ;;  %1765 = vrot.lane.b32.xlu1 %v6589_v50, %s4091_s20 }
 0x18e   :  { %421 = vst.msk [vmem:[#allocation2 + $0x3b8] sm:$0xff] %vm134_vm4, %v351_v13  ;;  %1469 = vrot.lane.b32.xlu0 %v6551_v24, %s4090_s30  ;;  %v1975_v14 = vld [vmem:[#allocation2 + $0x370] sm:$0xff] }
 0x18f   :  { %756 = vst.msk [vmem:[#allocation2 + $0x3b8] sm:$0xff] %vm442_vm5, %v625_v12  ;;  %2779 = vmatmul.mubr.f32.gmra.mrb[24].mxu1 %v1975_v14  ;;  %v1710_v38 = vpop.permute.xlu1 %1709  ;;  %v6724_v51 = vpop.f32.mrb[24].mxu0 }
 0x190   :  { %v631_v45 = vpop.permute.xlu0 %630  ;;  %v1776_v63 = vsel %vm134_vm4, %v6216_v49, %v1710_v38  ;;  %v1873_v57 = vld [vmem:[#allocation2 + $0x40] sm:$0xff]  ;;  %v6729_v49 = vpop.f32.mrb[25].mxu0 }
 0x191   :  { %v680_v32 = vsel %vm134_vm4, %v629_v22, %v631_v45  ;;  %1832 = vst.msk [vmem:[#allocation2 + $0x88] sm:$0xff] %vm444_vm0, %v1776_v63  ;;  %1471 = vrot.lane.b32.xlu1 %v6570_v9, %s4090_s30  ;;  %3530 = vmatmul.mubr.msk.f32.vlgmr.msra.gmra.mrb[0].mxu0 %vm444_vm0, %v1873_v57  ;;  %v1182_v9 = vld [vmem:[%s7305_s0 + $0x158] sm:$0xff] }
 0x192   :  { %759 = vst.msk [vmem:[#allocation2 + $0x408] sm:$0xff] %vm444_vm0, %v680_v32  ;;  %1767 = vrot.lane.b32.xlu0 %v1663_v53, %s4091_s20  ;;  %v1985_v24 = vld [vmem:[#allocation2 + $0x3c0] sm:$0xff]  ;;  %3339 = vmatprep.mubr.f32.mxu0 %v6704_v62  ;;  %v1226_v12 = vmax.f32 %v1182_v9, 0.0 }
 0x193   :  { %1119 = vst.msk [vmem:[#allocation2 + $0x408] sm:$0xff] %vm1090_vm3, %v5974_v28  ;;  %2784 = vmatprep.mubr.f32.mxu1 %v1985_v24  ;;  %v633_v26 = vpop.permute.xlu1 %632  ;;  %v6745_v46 = vpop.f32.mrb[26].mxu0 }
 0x194   :  { %v305_v18 = vpop.permute.xlu0 %304  ;;  %v6748_v44 = vpop.f32.mrb[27].mxu0  ;;  %1270 = vst.msk [vmem:[#allocation2 + $0x588] sm:$0xff] %vm12_vm1, %v1226_v12 }
 0x195   :  { %v352_v28 = vsel %vm12_vm1, %v5976_v16, %v305_v18  ;;  %1769 = vrot.lane.b32.xlu1 %v6290_v36, %s4091_s20 }
 0x196   :  { %423 = vst.msk [vmem:[#allocation2 + $0x400] sm:$0xff] %vm134_vm4, %v352_v28  ;;  %1473 = vrot.lane.b32.xlu0 %v6589_v50, %s4090_s30  ;;  %v1984_v61 = vld [vmem:[#allocation2 + $0x3b8] sm:$0xff] }
 0x197   :  { %758 = vst.msk [vmem:[#allocation2 + $0x400] sm:$0xff] %vm442_vm5, %v629_v22  ;;  %2785 = vmatmul.mubr.f32.gmra.mrb[26].mxu1 %v1984_v61  ;;  %v1714_v16 = vpop.permute.xlu1 %1713 }
 0x198   :  { %v635_v23 = vpop.permute.xlu0 %634  ;;  %v1777_v54 = vsel %vm134_vm4, %v6292_v6, %v1714_v16  ;;  %v1882_v31 = vld [vmem:[#allocation2 + $0x88] sm:$0xff] }
 0x199   :  { %v681_v30 = vsel %vm134_vm4, %v633_v26, %v635_v23  ;;  %1834 = vst.msk [vmem:[#allocation2 + $0xd0] sm:$0xff] %vm444_vm0, %v1777_v54  ;;  %1475 = vrot.lane.b32.xlu1 %v1663_v53, %s4090_s30  ;;  %3531 = vmatmul.mubr.msk.f32.gmra.mrb[2].mxu0 %vm444_vm0, %v1882_v31 }
 0x19a   :  { %761 = vst.msk [vmem:[#allocation2 + $0x450] sm:$0xff] %vm444_vm0, %v681_v30  ;;  %1771 = vrot.lane.b32.xlu0 %v1665_v40, %s4091_s20  ;;  %v1994_v50 = vld [vmem:[#allocation2 + $0x408] sm:$0xff]  ;;  %3345 = vmatprep.mubr.f32.mxu0 %v6704_v62 }
 0x19b   :  { %1121 = vst.msk [vmem:[#allocation2 + $0x450] sm:$0xff] %vm1090_vm3, %v5998_v11  ;;  %2790 = vmatprep.mubr.f32.mxu1 %v1994_v50  ;;  %v637_v56 = vpop.permute.xlu1 %636 }
 0x19c   :  { %v309_v6 = vpop.permute.xlu0 %308 }
 0x19d   :  { %v353_v7 = vsel %vm12_vm1, %v7452_v35, %v309_v6  ;;  %1773 = vrot.lane.b32.xlu1 %v6337_v27, %s4091_s20  ;;  %v6769_v11 = vpop.f32.mrb[28].mxu0 }
 0x19e   :  { %425 = vst.msk [vmem:[#allocation2 + $0x448] sm:$0xff] %vm134_vm4, %v353_v7  ;;  %1477 = vrot.lane.b32.xlu0 %v6290_v36, %s4090_s30  ;;  %v1993_v17 = vld [vmem:[#allocation2 + $0x400] sm:$0xff]  ;;  %v6772_v1 = vpop.f32.mrb[29].mxu0 }
 0x19f   :  { %760 = vst.msk [vmem:[#allocation2 + $0x448] sm:$0xff] %vm442_vm5, %v633_v26  ;;  %2791 = vmatmul.mubr.f32.gmra.mrb[28].mxu1 %v1993_v17  ;;  %v1718_v42 = vpop.permute.xlu1 %1717 }
 0x1a0   :  { %v639_v22 = vpop.permute.xlu0 %638  ;;  %v1778_v4 = vsel %vm134_vm4, %v6340_v0, %v1718_v42  ;;  %v1891_v13 = vld [vmem:[#allocation2 + $0xd0] sm:$0xff] }
 0x1a1   :  { %v682_v19 = vsel %vm134_vm4, %v637_v56, %v639_v22  ;;  %1836 = vst.msk [vmem:[#allocation2 + $0x118] sm:$0xff] %vm444_vm0, %v1778_v4  ;;  %1481 = vrot.lane.b32.xlu1 %v6337_v27, %s4090_s30  ;;  %v6782_v14 = vpop.f32.mrb[30].mxu0  ;;  %3532 = vmatmul.mubr.msk.f32.gmra.mrb[4].mxu0 %vm444_vm0, %v1891_v13 }
 0x1a2   :  { %763 = vst.msk [vmem:[#allocation2 + $0x498] sm:$0xff] %vm444_vm0, %v682_v19  ;;  %1479 = vrot.lane.b32.xlu0 %v1665_v40, %s4090_s30  ;;  %v2003_v36 = vld [vmem:[#allocation2 + $0x450] sm:$0xff]  ;;  %v6787_v0 = vpop.f32.mrb[31].mxu0  ;;  %3351 = vmatprep.mubr.f32.mxu0 %v6704_v62 }
 0x1a3   :  { %1123 = vst.msk [vmem:[#allocation2 + $0x498] sm:$0xff] %vm1090_vm3, %v6010_v34  ;;  %2796 = vmatprep.mubr.f32.mxu1 %v2003_v36  ;;  %v641_v53 = vpop.permute.xlu1 %640 }
 0x1a4   :  { %v313_v38 = vpop.permute.xlu0 %312 }
 0x1a5   :  { %v354_v27 = vsel %vm12_vm1, %v6012_v47, %v313_v38 }
 0x1a6   :  { %427 = vst.msk [vmem:[#allocation2 + $0x490] sm:$0xff] %vm134_vm4, %v354_v27  ;;  %v2002_v45 = vld [vmem:[#allocation2 + $0x448] sm:$0xff] }
 0x1a7   :  { %762 = vst.msk [vmem:[#allocation2 + $0x490] sm:$0xff] %vm442_vm5, %v637_v56  ;;  %2797 = vmatmul.mubr.f32.gmra.mrb[30].mxu1 %v2002_v45  ;;  %v1722_v63 = vpop.permute.xlu1 %1721 }
 0x1a8   :  { %v643_v34 = vpop.permute.xlu0 %642  ;;  %v1779_v32 = vsel %vm134_vm4, %v6377_v41, %v1722_v63  ;;  %v1900_v24 = vld [vmem:[#allocation2 + $0x118] sm:$0xff] }
 0x1a9   :  { %v683_v57 = vsel %vm134_vm4, %v641_v53, %v643_v34  ;;  %1838 = vst.msk [vmem:[#allocation2 + $0x160] sm:$0xff] %vm444_vm0, %v1779_v32  ;;  %3533 = vmatmul.mubr.msk.f32.gmra.mrb[6].mxu0 %vm444_vm0, %v1900_v24  ;;  %v6800_v25 = vpop.f32.mrb[32].mxu0 }
 0x1aa   :  { %765 = vst.msk [vmem:[#allocation2 + $0x4e0] sm:$0xff] %vm444_vm0, %v683_v57  ;;  %v2012_v47 = vld [vmem:[#allocation2 + $0x498] sm:$0xff]  ;;  %3357 = vmatprep.mubr.f32.mxu0 %v6704_v62  ;;  %v6805_v26 = vpop.f32.mrb[33].mxu0 }
 0x1ab   :  { %1125 = vst.msk [vmem:[#allocation2 + $0x4e0] sm:$0xff] %vm1090_vm3, %v6031_v33  ;;  %2802 = vmatprep.mubr.f32.mxu1 %v2012_v47  ;;  %v645_v41 = vpop.permute.xlu1 %644 }
 0x1ac   :  { %v317_v18 = vpop.permute.xlu0 %316 }
 0x1ad   :  { %v355_v9 = vsel %vm12_vm1, %v6021_v52, %v317_v18  ;;  %v6810_v12 = vpop.f32.mrb[34].mxu0 }
 0x1ae   :  { %429 = vst.msk [vmem:[#allocation2 + $0x4d8] sm:$0xff] %vm134_vm4, %v355_v9  ;;  %v2011_v28 = vld [vmem:[#allocation2 + $0x490] sm:$0xff]  ;;  %v6813_v61 = vpop.f32.mrb[35].mxu0 }
 0x1af   :  { %764 = vst.msk [vmem:[#allocation2 + $0x4d8] sm:$0xff] %vm442_vm5, %v641_v53  ;;  %2803 = vmatmul.mubr.f32.gmra.mrb[32].mxu1 %v2011_v28  ;;  %v1726_v33 = vpop.permute.xlu1 %1725 }
 0x1b0   :  { %v647_v40 = vpop.permute.xlu0 %646  ;;  %v1780_v16 = vsel %vm134_vm4, %v6417_v21, %v1726_v33  ;;  %v1909_v54 = vld [vmem:[#allocation2 + $0x160] sm:$0xff] }
 0x1b1   :  { %v684_v23 = vsel %vm134_vm4, %v645_v41, %v647_v40  ;;  %1840 = vst.msk [vmem:[#allocation2 + $0x1a8] sm:$0xff] %vm444_vm0, %v1780_v16  ;;  %3534 = vmatmul.mubr.msk.f32.gmra.mrb[8].mxu0 %vm444_vm0, %v1909_v54 }
 0x1b2   :  { %767 = vst.msk [vmem:[#allocation2 + $0x528] sm:$0xff] %vm444_vm0, %v684_v23  ;;  %v2021_v52 = vld [vmem:[#allocation2 + $0x4e0] sm:$0xff]  ;;  %3363 = vmatprep.mubr.f32.mxu0 %v6704_v62 }
 0x1b3   :  { %1127 = vst.msk [vmem:[#allocation2 + $0x528] sm:$0xff] %vm1090_vm3, %v6041_v5  ;;  %2808 = vmatprep.mubr.f32.mxu1 %v2021_v52  ;;  %v649_v30 = vpop.permute.xlu1 %648 }
 0x1b4   :  { %v321_v31 = vpop.permute.xlu0 %320 }
 0x1b5   :  { %v356_v21 = vsel %vm12_vm1, %v6043_v55, %v321_v31  ;;  %v6827_v56 = vpop.f32.mrb[36].mxu0 }
 0x1b6   :  { %431 = vst.msk [vmem:[#allocation2 + $0x520] sm:$0xff] %vm134_vm4, %v356_v21  ;;  %v2020_v50 = vld [vmem:[#allocation2 + $0x4d8] sm:$0xff]  ;;  %v6830_v6 = vpop.f32.mrb[37].mxu0 }
 0x1b7   :  { %766 = vst.msk [vmem:[#allocation2 + $0x520] sm:$0xff] %vm442_vm5, %v645_v41  ;;  %2809 = vmatmul.mubr.f32.gmra.mrb[34].mxu1 %v2020_v50  ;;  %v1730_v35 = vpop.permute.xlu1 %1729 }
 0x1b8   :  { %v651_v5 = vpop.permute.xlu0 %650  ;;  %v1781_v7 = vsel %vm134_vm4, %v6466_v8, %v1730_v35  ;;  %v1918_v42 = vld [vmem:[#allocation2 + $0x1a8] sm:$0xff] }
 0x1b9   :  { %v685_v17 = vsel %vm134_vm4, %v649_v30, %v651_v5  ;;  %1842 = vst.msk [vmem:[#allocation2 + $0x1f0] sm:$0xff] %vm444_vm0, %v1781_v7  ;;  %3535 = vmatmul.mubr.msk.f32.gmra.mrb[10].mxu0 %vm444_vm0, %v1918_v42  ;;  %v6838_v22 = vpop.f32.mrb[38].mxu0 }
 0x1ba   :  { %769 = vst.msk [vmem:[#allocation2 + $0x570] sm:$0xff] %vm444_vm0, %v685_v17  ;;  %v2030_v55 = vld [vmem:[#allocation2 + $0x528] sm:$0xff]  ;;  %3369 = vmatprep.mubr.f32.mxu0 %v6704_v62  ;;  %v6843_v4 = vpop.f32.mrb[39].mxu0 }
 0x1bb   :  { %1129 = vst.msk [vmem:[#allocation2 + $0x570] sm:$0xff] %vm1090_vm3, %v6068_v2  ;;  %2814 = vmatprep.mubr.f32.mxu1 %v2030_v55  ;;  %v653_v8 = vpop.permute.xlu1 %652 }
 0x1bc   :  { %v325_v19 = vpop.permute.xlu0 %324 }
 0x1bd   :  { %v357_v13 = vsel %vm12_vm1, %v6057_v37, %v325_v19 }
 0x1be   :  { %433 = vst.msk [vmem:[#allocation2 + $0x568] sm:$0xff] %vm134_vm4, %v357_v13  ;;  %v2029_v36 = vld [vmem:[#allocation2 + $0x520] sm:$0xff] }
 0x1bf   :  { %768 = vst.msk [vmem:[#allocation2 + $0x568] sm:$0xff] %vm442_vm5, %v649_v30  ;;  %2815 = vmatmul.mubr.f32.gmra.mrb[36].mxu1 %v2029_v36  ;;  %v1734_v53 = vpop.permute.xlu1 %1733 }
 0x1c0   :  { %v655_v38 = vpop.permute.xlu0 %654  ;;  %v1782_v2 = vsel %vm134_vm4, %v6513_v59, %v1734_v53  ;;  %v1927_v45 = vld [vmem:[#allocation2 + $0x1f0] sm:$0xff] }
 0x1c1   :  { %v686_v27 = vsel %vm134_vm4, %v653_v8, %v655_v38  ;;  %1844 = vst.msk [vmem:[#allocation2 + $0x238] sm:$0xff] %vm444_vm0, %v1782_v2  ;;  %3536 = vmatmul.mubr.msk.f32.gmra.mrb[12].mxu0 %vm444_vm0, %v1927_v45  ;;  %v6855_v63 = vpop.f32.mrb[40].mxu0  ;;  %v7453_v53 = vld [vmem:[#allocation41_spill] sm:$0xff] }
 0x1c2   :  { %771 = vst.msk [vmem:[#allocation2 + $0x5b8] sm:$0xff] %vm444_vm0, %v686_v27  ;;  %v2039_v37 = vld [vmem:[#allocation2 + $0x570] sm:$0xff]  ;;  %3375 = vmatprep.mubr.f32.mxu0 %v6704_v62  ;;  %v6860_v34 = vpop.f32.mrb[41].mxu0  ;;  %v7454_v27 = vld [vmem:[#allocation40_spill] sm:$0xff] }
 0x1c3   :  { %1131 = vst.msk [vmem:[#allocation2 + $0x5b8] sm:$0xff] %vm1090_vm3, %v6079_v60  ;;  %2820 = vmatprep.mubr.f32.mxu1 %v2039_v37  ;;  %v657_v59 = vpop.permute.xlu1 %656 }
 0x1c4   :  { %v329_v32 = vpop.permute.xlu0 %328 }
 0x1c5   :  { %v358_v57 = vsel %vm12_vm1, %v6081_v43, %v329_v32  ;;  %v6865_v47 = vpop.f32.mrb[42].mxu0 }
 0x1c6   :  { %435 = vst.msk [vmem:[#allocation2 + $0x5b0] sm:$0xff] %vm134_vm4, %v358_v57  ;;  %v2038_v24 = vld [vmem:[#allocation2 + $0x568] sm:$0xff]  ;;  %v6868_v41 = vpop.f32.mrb[43].mxu0 }
 0x1c7   :  { %770 = vst.msk [vmem:[#allocation2 + $0x5b0] sm:$0xff] %vm442_vm5, %v653_v8  ;;  %2821 = vmatmul.mubr.f32.gmra.mrb[38].mxu1 %v2038_v24  ;;  %v1738_v60 = vpop.permute.xlu1 %1737 }
 0x1c8   :  { %v659_v18 = vpop.permute.xlu0 %658  ;;  %v1783_v9 = vsel %vm134_vm4, %v6559_v58, %v1738_v60  ;;  %v1936_v33 = vld [vmem:[#allocation2 + $0x238] sm:$0xff] }
 0x1c9   :  { %v687_v28 = vsel %vm134_vm4, %v657_v59, %v659_v18  ;;  %1846 = vst.msk [vmem:[#allocation2 + $0x280] sm:$0xff] %vm444_vm0, %v1783_v9  ;;  %3537 = vmatmul.mubr.msk.f32.gmra.mrb[14].mxu0 %vm444_vm0, %v1936_v33 }
 0x1ca   :  { %773 = vst.msk [vmem:[#allocation2 + $0x600] sm:$0xff] %vm444_vm0, %v687_v28  ;;  %v2048_v43 = vld [vmem:[#allocation2 + $0x5b8] sm:$0xff]  ;;  %3381 = vmatprep.mubr.f32.mxu0 %v6704_v62 }
 0x1cb   :  { %1133 = vst.msk [vmem:[#allocation2 + $0x600] sm:$0xff] %vm1090_vm3, %v6109_v39  ;;  %2826 = vmatprep.mubr.f32.mxu1 %v2048_v43  ;;  %v661_v40 = vpop.permute.xlu1 %660 }
 0x1cc   :  { %v333_v16 = vpop.permute.xlu0 %332 }
 0x1cd   :  { %v359_v58 = vsel %vm12_vm1, %v6093_v15, %v333_v16  ;;  %v6882_v54 = vpop.f32.mrb[44].mxu0 }
 0x1ce   :  { %437 = vst.msk [vmem:[#allocation2 + $0x5f8] sm:$0xff] %vm134_vm4, %v359_v58  ;;  %v2047_v23 = vld [vmem:[#allocation2 + $0x5b0] sm:$0xff]  ;;  %v6885_v52 = vpop.f32.mrb[45].mxu0 }
 0x1cf   :  { %772 = vst.msk [vmem:[#allocation2 + $0x5f8] sm:$0xff] %vm442_vm5, %v657_v59  ;;  %2827 = vmatmul.mubr.f32.gmra.mrb[40].mxu1 %v2047_v23  ;;  %v1742_v30 = vpop.permute.xlu1 %1741 }
 0x1d0   :  { %v663_v39 = vpop.permute.xlu0 %662  ;;  %v1784_v31 = vsel %vm134_vm4, %v6601_v29, %v1742_v30  ;;  %v1945_v50 = vld [vmem:[#allocation2 + $0x280] sm:$0xff] }
 0x1d1   :  { %v688_v21 = vsel %vm134_vm4, %v661_v40, %v663_v39  ;;  %1848 = vst.msk [vmem:[#allocation2 + $0x2c8] sm:$0xff] %vm444_vm0, %v1784_v31  ;;  %3538 = vmatmul.mubr.msk.f32.gmra.mrb[16].mxu0 %vm444_vm0, %v1945_v50  ;;  %v6893_v35 = vpop.f32.mrb[46].mxu0 }
 0x1d2   :  { %775 = vst.msk [vmem:[#allocation2 + $0x648] sm:$0xff] %vm444_vm0, %v688_v21  ;;  %v2057_v15 = vld [vmem:[#allocation2 + $0x600] sm:$0xff]  ;;  %3387 = vmatprep.mubr.f32.mxu0 %v6704_v62  ;;  %v6898_v5 = vpop.f32.mrb[47].mxu0 }
 0x1d3   :  { %1135 = vst.msk [vmem:[#allocation2 + $0x648] sm:$0xff] %vm1090_vm3, %v6119_v20  ;;  %2832 = vmatprep.mubr.f32.mxu1 %v2057_v15  ;;  %v665_v29 = vpop.permute.xlu1 %664 }
 0x1d4   :  { %v337_v7 = vpop.permute.xlu0 %336 }
 0x1d5   :  { %v360_v17 = vsel %vm12_vm1, %v6121_v3, %v337_v7 }
 0x1d6   :  { %439 = vst.msk [vmem:[#allocation2 + $0x640] sm:$0xff] %vm134_vm4, %v360_v17  ;;  %v2056_v42 = vld [vmem:[#allocation2 + $0x5f8] sm:$0xff] }
 0x1d7   :  { %774 = vst.msk [vmem:[#allocation2 + $0x640] sm:$0xff] %vm442_vm5, %v661_v40  ;;  %2833 = vmatmul.mubr.f32.gmra.mrb[42].mxu1 %v2056_v42  ;;  %v1746_v55 = vpop.permute.xlu1 %1745 }
 0x1d8   :  { %v667_v8 = vpop.permute.xlu0 %666  ;;  %v1785_v20 = vsel %vm134_vm4, %v6632_v48, %v1746_v55  ;;  %v1954_v13 = vld [vmem:[#allocation2 + $0x2c8] sm:$0xff] }
 0x1d9   :  { %v689_v19 = vsel %vm134_vm4, %v665_v29, %v667_v8  ;;  %1850 = vst.msk [vmem:[#allocation2 + $0x310] sm:$0xff] %vm444_vm0, %v1785_v20  ;;  %3539 = vmatmul.mubr.msk.f32.gmra.mrb[18].mxu0 %vm444_vm0, %v1954_v13  ;;  %v6910_v36 = vpop.f32.mrb[0].mxu1 }
 0x1da   :  { %777 = vst.msk [vmem:[#allocation2 + $0x690] sm:$0xff] %vm444_vm0, %v689_v19  ;;  %v2066_v3 = vld [vmem:[#allocation2 + $0x648] sm:$0xff]  ;;  %3393 = vmatprep.mubr.f32.mxu0 %v6704_v62  ;;  %v6915_v38 = vpop.f32.mrb[1].mxu1 }
 0x1db   :  { %1137 = vst.msk [vmem:[#allocation2 + $0x690] sm:$0xff] %vm1090_vm3, %v7453_v53  ;;  %2838 = vmatprep.mubr.f32.mxu1 %v2066_v3  ;;  %v1452_v48 = vpop.permute.xlu1 %1451 }
 0x1dc   :  { %v341_v2 = vpop.permute.xlu0 %340  ;;  %1567 = vst.msk [vmem:[#allocation2 + $0x390] sm:$0xff] %vm132_vm2, %v1452_v48 }
 0x1dd   :  { %v361_v45 = vsel %vm12_vm1, %v7454_v27, %v341_v2  ;;  %v6921_v59 = vpop.f32.mrb[2].mxu1 }
 0x1de   :  { %441 = vst.msk [vmem:[#allocation2 + $0x688] sm:$0xff] %vm134_vm4, %v361_v45  ;;  %v2065_v37 = vld [vmem:[#allocation2 + $0x640] sm:$0xff]  ;;  %v6924_v32 = vpop.f32.mrb[3].mxu1 }
 0x1df   :  { %776 = vst.msk [vmem:[#allocation2 + $0x688] sm:$0xff] %vm442_vm5, %v665_v29  ;;  %2839 = vmatmul.mubr.f32.gmra.mrb[44].mxu1 %v2065_v37  ;;  %v1750_v57 = vpop.permute.xlu1 %1749 }
 0x1e0   :  { %v1454_v24 = vpop.permute.xlu0 %1453  ;;  %v1786_v60 = vsel %vm134_vm4, %v6663_v10, %v1750_v57  ;;  %v1963_v9 = vld [vmem:[#allocation2 + $0x310] sm:$0xff] }
 0x1e1   :  { %v1495_v18 = vsel %vm12_vm1, %v1452_v48, %v1454_v24  ;;  %1852 = vst.msk [vmem:[#allocation2 + $0x358] sm:$0xff] %vm444_vm0, %v1786_v60  ;;  %3540 = vmatmul.mubr.msk.f32.gmra.mrb[20].mxu0 %vm444_vm0, %v1963_v9 }
 0x1e2   :  { %1568 = vst.msk [vmem:[#allocation2 + $0x398] sm:$0xff] %vm134_vm4, %v1495_v18  ;;  %v2075_v28 = vld [vmem:[#allocation2 + $0x690] sm:$0xff]  ;;  %3399 = vmatprep.mubr.f32.mxu0 %v6704_v62 }
 0x1e3   :  { %2844 = vmatprep.mubr.f32.mxu1 %v2075_v28  ;;  %v1456_v33 = vpop.permute.xlu1 %1455  ;;  %v1979_v29 = vld [vmem:[#allocation2 + $0x390] sm:$0xff] }
 0x1e4   :  { %v1752_v43 = vpop.permute.xlu0 %1751  ;;  %1569 = vst.msk [vmem:[#allocation2 + $0x3d8] sm:$0xff] %vm132_vm2, %v1456_v33 }
 0x1e5   :  { %1853 = vst.msk [vmem:[#allocation2 + $0x398] sm:$0xff] %vm442_vm5, %v1752_v43 }
 0x1e6   :  { %v2074_v10 = vld [vmem:[#allocation2 + $0x688] sm:$0xff] }
 0x1e7   :  { %2845 = vmatmul.mubr.f32.gmra.mrb[46].mxu1 %v2074_v10  ;;  %v1754_v40 = vpop.permute.xlu1 %1753 }
 0x1e8   :  { %v1458_v16 = vpop.permute.xlu0 %1457  ;;  %v1787_v58 = vsel %vm134_vm4, %v1752_v43, %v1754_v40  ;;  %v1972_v30 = vld [vmem:[#allocation2 + $0x358] sm:$0xff] }
 0x1e9   :  { %v1496_v23 = vsel %vm12_vm1, %v1456_v33, %v1458_v16  ;;  %1854 = vst.msk [vmem:[#allocation2 + $0x3a0] sm:$0xff] %vm444_vm0, %v1787_v58  ;;  %3541 = vmatmul.mubr.msk.f32.gmra.mrb[22].mxu0 %vm444_vm0, %v1972_v30 }
 0x1ea   :  { %1570 = vst.msk [vmem:[#allocation2 + $0x3e0] sm:$0xff] %vm134_vm4, %v1496_v23  ;;  %v6940_v39 = vpop.f32.mrb[4].mxu1  ;;  %3405 = vmatprep.mubr.f32.mxu0 %v6704_v62 }
 0x1eb   :  { %v1460_v31 = vpop.permute.xlu1 %1459  ;;  %v6945_v15 = vpop.f32.mrb[5].mxu1  ;;  %v1988_v48 = vld [vmem:[#allocation2 + $0x3d8] sm:$0xff] }
 0x1ec   :  { %v1756_v21 = vpop.permute.xlu0 %1755  ;;  %v1980_v50 = vld [vmem:[#allocation2 + $0x398] sm:$0xff]  ;;  %1571 = vst.msk [vmem:[#allocation2 + $0x420] sm:$0xff] %vm132_vm2, %v1460_v31 }
 0x1ed   :  { %1855 = vst.msk [vmem:[#allocation2 + $0x3e0] sm:$0xff] %vm442_vm5, %v1756_v21  ;;  %3196 = vmatprep.mubr.f32.mxu1 %v1980_v50 }
 0x1ee   :  { %3197 = vmatmul.mubr.f32.vlgmr.msra.gmra.mrb[48].mxu1 %v1979_v29 }
 0x1ef   :  { %v1758_v7 = vpop.permute.xlu1 %1757 }
 0x1f0   :  { %v1462_v17 = vpop.permute.xlu0 %1461  ;;  %v1788_v42 = vsel %vm134_vm4, %v1756_v21, %v1758_v7  ;;  %v1981_v8 = vld [vmem:[#allocation2 + $0x3a0] sm:$0xff] }
 0x1f1   :  { %v1497_v55 = vsel %vm12_vm1, %v1460_v31, %v1462_v17  ;;  %1856 = vst.msk [vmem:[#allocation2 + $0x3e8] sm:$0xff] %vm444_vm0, %v1788_v42  ;;  %3542 = vmatmul.mubr.msk.f32.gmra.mrb[48].mxu0 %vm444_vm0, %v1981_v8 }
 0x1f2   :  { %1572 = vst.msk [vmem:[#allocation2 + $0x428] sm:$0xff] %vm134_vm4, %v1497_v55  ;;  %v6952_v20 = vpop.f32.mrb[6].mxu1  ;;  %3411 = vmatprep.mubr.f32.mxu0 %v6704_v62 }
 0x1f3   :  { %v1464_v19 = vpop.permute.xlu1 %1463  ;;  %v6957_v53 = vpop.f32.mrb[7].mxu1  ;;  %v1997_v9 = vld [vmem:[#allocation2 + $0x420] sm:$0xff] }
 0x1f4   :  { %v1760_v13 = vpop.permute.xlu0 %1759  ;;  %v1989_v3 = vld [vmem:[#allocation2 + $0x3e0] sm:$0xff]  ;;  %1573 = vst.msk [vmem:[#allocation2 + $0x468] sm:$0xff] %vm132_vm2, %v1464_v19 }
 0x1f5   :  { %1857 = vst.msk [vmem:[#allocation2 + $0x428] sm:$0xff] %vm442_vm5, %v1760_v13  ;;  %3202 = vmatprep.mubr.f32.mxu1 %v1989_v3 }
 0x1f6   :  { %3203 = vmatmul.mubr.f32.gmra.mrb[50].mxu1 %v1988_v48 }
 0x1f7   :  { %v1762_v2 = vpop.permute.xlu1 %1761 }
 0x1f8   :  { %v1466_v27 = vpop.permute.xlu0 %1465  ;;  %v1789_v45 = vsel %vm134_vm4, %v1760_v13, %v1762_v2  ;;  %v1990_v57 = vld [vmem:[#allocation2 + $0x3e8] sm:$0xff] }
 0x1f9   :  { %v1498_v37 = vsel %vm12_vm1, %v1464_v19, %v1466_v27  ;;  %1858 = vst.msk [vmem:[#allocation2 + $0x430] sm:$0xff] %vm444_vm0, %v1789_v45  ;;  %3543 = vmatmul.mubr.msk.f32.gmra.mrb[50].mxu0 %vm444_vm0, %v1990_v57 }
 0x1fa   :  { %1574 = vst.msk [vmem:[#allocation2 + $0x470] sm:$0xff] %vm134_vm4, %v1498_v37  ;;  %3417 = vmatprep.mubr.f32.mxu0 %v6704_v62 }
 0x1fb   :  { %v1468_v24 = vpop.permute.xlu1 %1467  ;;  %v2006_v21 = vld [vmem:[#allocation2 + $0x468] sm:$0xff] }
 0x1fc   :  { %v1764_v60 = vpop.permute.xlu0 %1763  ;;  %v1998_v18 = vld [vmem:[#allocation2 + $0x428] sm:$0xff]  ;;  %1575 = vst.msk [vmem:[#allocation2 + $0x4b0] sm:$0xff] %vm132_vm2, %v1468_v24 }
 0x1fd   :  { %1859 = vst.msk [vmem:[#allocation2 + $0x470] sm:$0xff] %vm442_vm5, %v1764_v60  ;;  %3208 = vmatprep.mubr.f32.mxu1 %v1998_v18 }
 0x1fe   :  { %3209 = vmatmul.mubr.f32.gmra.mrb[52].mxu1 %v1997_v9 }
 0x1ff   :  { %v1766_v28 = vpop.permute.xlu1 %1765 }
 0x200   :  { %v1470_v33 = vpop.permute.xlu0 %1469  ;;  %v1790_v43 = vsel %vm134_vm4, %v1764_v60, %v1766_v28  ;;  %v1999_v40 = vld [vmem:[#allocation2 + $0x430] sm:$0xff] }
 0x201   :  { %v1499_v10 = vsel %vm12_vm1, %v1468_v24, %v1470_v33  ;;  %1860 = vst.msk [vmem:[#allocation2 + $0x478] sm:$0xff] %vm444_vm0, %v1790_v43  ;;  %v6971_v16 = vpop.f32.mrb[8].mxu1  ;;  %3544 = vmatmul.mubr.msk.f32.gmra.mrb[52].mxu0 %vm444_vm0, %v1999_v40 }
 0x202   :  { %1576 = vst.msk [vmem:[#allocation2 + $0x4b8] sm:$0xff] %vm134_vm4, %v1499_v10  ;;  %v6974_v58 = vpop.f32.mrb[9].mxu1  ;;  %3423 = vmatprep.mubr.f32.mxu0 %v6704_v62 }
 0x203   :  { %v1472_v23 = vpop.permute.xlu1 %1471  ;;  %v2015_v13 = vld [vmem:[#allocation2 + $0x4b0] sm:$0xff] }
 0x204   :  { %v1768_v30 = vpop.permute.xlu0 %1767  ;;  %v2007_v31 = vld [vmem:[#allocation2 + $0x470] sm:$0xff]  ;;  %1577 = vst.msk [vmem:[#allocation2 + $0x4f8] sm:$0xff] %vm132_vm2, %v1472_v23 }
 0x205   :  { %1861 = vst.msk [vmem:[#allocation2 + $0x4b8] sm:$0xff] %vm442_vm5, %v1768_v30  ;;  %3214 = vmatprep.mubr.f32.mxu1 %v2007_v31 }
 0x206   :  { %3215 = vmatmul.mubr.f32.gmra.mrb[54].mxu1 %v2006_v21  ;;  %v2052_v21 = vld [vmem:[#allocation2 + $0x5d8] sm:$0xff] }
 0x207   :  { %v1770_v50 = vpop.permute.xlu1 %1769 }
 0x208   :  { %v1474_v29 = vpop.permute.xlu0 %1473  ;;  %v1791_v7 = vsel %vm134_vm4, %v1768_v30, %v1770_v50  ;;  %v2008_v42 = vld [vmem:[#allocation2 + $0x478] sm:$0xff]  ;;  %v2035_v30 = vld [vmem:[#allocation2 + $0x550] sm:$0xff] }
 0x209   :  { %v1500_v17 = vsel %vm12_vm1, %v1472_v23, %v1474_v29  ;;  %1862 = vst.msk [vmem:[#allocation2 + $0x4c0] sm:$0xff] %vm444_vm0, %v1791_v7  ;;  %3545 = vmatmul.mubr.msk.f32.gmra.mrb[54].mxu0 %vm444_vm0, %v2008_v42  ;;  %v2044_v29 = vld [vmem:[#allocation2 + $0x598] sm:$0xff]  ;;  %v2051_v7 = vld [vmem:[#allocation2 + $0x5d0] sm:$0xff]  ;;  %v2053_v42 = vld [vmem:[#allocation2 + $0x5e0] sm:$0xff] }
 0x20a   :  { %1578 = vst.msk [vmem:[#allocation2 + $0x500] sm:$0xff] %vm134_vm4, %v1500_v17  ;;  %3429 = vmatprep.mubr.f32.mxu0 %v6704_v62  ;;  %v2061_v17 = vld [vmem:[#allocation2 + $0x620] sm:$0xff] }
 0x20b   :  { %v1476_v55 = vpop.permute.xlu1 %1475  ;;  %v2024_v28 = vld [vmem:[#allocation2 + $0x4f8] sm:$0xff] }
 0x20c   :  { %v1772_v8 = vpop.permute.xlu0 %1771  ;;  %v2016_v19 = vld [vmem:[#allocation2 + $0x4b8] sm:$0xff]  ;;  %1579 = vst.msk [vmem:[#allocation2 + $0x540] sm:$0xff] %vm132_vm2, %v1476_v55 }
 0x20d   :  { %1863 = vst.msk [vmem:[#allocation2 + $0x500] sm:$0xff] %vm442_vm5, %v1772_v8  ;;  %3220 = vmatprep.mubr.f32.mxu1 %v2016_v19  ;;  %v6987_v3 = vpop.f32.mrb[10].mxu1  ;;  %v2070_v19 = vld [vmem:[#allocation2 + $0x668] sm:$0xff] }
 0x20e   :  { %3221 = vmatmul.mubr.f32.gmra.mrb[56].mxu1 %v2015_v13  ;;  %v6989_v48 = vpop.f32.mrb[11].mxu1 }
 0x20f   :  { %v1774_v2 = vpop.permute.xlu1 %1773 }
 0x210   :  { %v1478_v27 = vpop.permute.xlu0 %1477  ;;  %v1792_v45 = vsel %vm134_vm4, %v1772_v8, %v1774_v2  ;;  %v2017_v57 = vld [vmem:[#allocation2 + $0x4c0] sm:$0xff]  ;;  %v2062_v2 = vld [vmem:[#allocation2 + $0x628] sm:$0xff] }
 0x211   :  { %v1501_v37 = vsel %vm12_vm1, %v1476_v55, %v1478_v27  ;;  %1864 = vst.msk [vmem:[#allocation2 + $0x508] sm:$0xff] %vm444_vm0, %v1792_v45  ;;  %3546 = vmatmul.mubr.msk.f32.gmra.mrb[56].mxu0 %vm444_vm0, %v2017_v57  ;;  %v2060_v55 = vld [vmem:[#allocation2 + $0x618] sm:$0xff]  ;;  %v2069_v27 = vld [vmem:[#allocation2 + $0x660] sm:$0xff]  ;;  %v2079_v45 = vld [vmem:[#allocation2 + $0x6b0] sm:$0xff] }
 0x212   :  { %1580 = vst.msk [vmem:[#allocation2 + $0x548] sm:$0xff] %vm134_vm4, %v1501_v37  ;;  %3435 = vmatprep.mubr.f32.mxu0 %v6704_v62  ;;  %v2071_v37 = vld [vmem:[#allocation2 + $0x670] sm:$0xff]  ;;  %v2078_v57 = vld [vmem:[#allocation2 + $0x6a8] sm:$0xff] }
 0x213   :  { %1583 = vst.msk [vmem:[#allocation2 + $0x548] sm:$0xff] %vm442_vm5, %v6704_v62  ;;  %v1482_v24 = vpop.permute.xlu1 %1481  ;;  %v2033_v23 = vld [vmem:[#allocation2 + $0x540] sm:$0xff] }
 0x214   :  { %v1480_v60 = vpop.permute.xlu0 %1479  ;;  %v2025_v18 = vld [vmem:[#allocation2 + $0x500] sm:$0xff] }
 0x215   :  { %v1502_v9 = vsel %vm12_vm1, %v1480_v60, %v1482_v24  ;;  %1581 = vst.msk [vmem:[#allocation2 + $0x588] sm:$0xff] %vm132_vm2, %v1480_v60  ;;  %3226 = vmatprep.mubr.f32.mxu1 %v2025_v18  ;;  %v2080_v24 = vld [vmem:[#allocation2 + $0x6b8] sm:$0xff] }
 0x216   :  { %1582 = vst.msk [vmem:[#allocation2 + $0x590] sm:$0xff] %vm134_vm4, %v1502_v9  ;;  %3227 = vmatmul.mubr.f32.gmra.mrb[58].mxu1 %v2024_v28 }
 0x217   :  { %1585 = vst.msk [vmem:[#allocation2 + $0x590] sm:$0xff] %vm442_vm5, %v6704_v62 }
 0x218   :  { %v2026_v33 = vld [vmem:[#allocation2 + $0x508] sm:$0xff] }
 0x219   :  { %v7004_v43 = vpop.f32.mrb[12].mxu1  ;;  %3547 = vmatmul.mubr.msk.f32.gmra.mrb[58].mxu0 %vm444_vm0, %v2026_v33 }
 0x21a   :  { %v2034_v10 = vld [vmem:[#allocation2 + $0x548] sm:$0xff]  ;;  %v7007_v40 = vpop.f32.mrb[13].mxu1  ;;  %3441 = vmatprep.mubr.f32.mxu0 %v6704_v62 }
 0x21b   :  { %3232 = vmatprep.mubr.f32.mxu1 %v2034_v10 }
 0x21c   :  { %3233 = vmatmul.mubr.f32.gmra.mrb[60].mxu1 %v2033_v23  ;;  %v2042_v50 = vld [vmem:[#allocation2 + $0x588] sm:$0xff] }
 0x21d   :  { %3548 = vmatmul.mubr.msk.f32.gmra.mrb[60].mxu0 %vm444_vm0, %v2035_v30 }
 0x21e   :  { %v2043_v31 = vld [vmem:[#allocation2 + $0x590] sm:$0xff]  ;;  %3447 = vmatprep.mubr.f32.mxu0 %v6704_v62 }
 0x21f   :  { %3238 = vmatprep.mubr.f32.mxu1 %v2043_v31 }
 0x220   :  { %3239 = vmatmul.mubr.f32.gmra.mrb[62].mxu1 %v2042_v50 }
 0x221   :  { %3244 = vmatprep.mubr.f32.mxu1 %v2052_v21  ;;  %3549 = vmatmul.mubr.msk.f32.gmra.mrb[62].mxu0 %vm444_vm0, %v2044_v29 }
 0x222   :  { %3453 = vmatprep.mubr.f32.mxu0 %v6704_v62 }
 0x224   :  { %3245 = vmatmul.mubr.f32.gmra.mrb[64].mxu1 %v2051_v7 }
 0x225   :  { %3250 = vmatprep.mubr.f32.mxu1 %v2061_v17  ;;  %v7014_v8 = vpop.f32.mrb[14].mxu1  ;;  %3550 = vmatmul.mubr.msk.f32.gmra.mrb[64].mxu0 %vm444_vm0, %v2053_v42 }
 0x226   :  { %v7017_v13 = vpop.f32.mrb[15].mxu1  ;;  %3459 = vmatprep.mubr.f32.mxu0 %v6704_v62 }
 0x228   :  { %3251 = vmatmul.mubr.f32.gmra.mrb[66].mxu1 %v2060_v55 }
 0x229   :  { %3256 = vmatprep.mubr.f32.mxu1 %v2070_v19  ;;  %3551 = vmatmul.mubr.msk.f32.gmra.mrb[66].mxu0 %vm444_vm0, %v2062_v2 }
 0x22a   :  { %3465 = vmatprep.mubr.f32.mxu0 %v6704_v62 }
 0x22c   :  { %3257 = vmatmul.mubr.f32.gmra.mrb[68].mxu1 %v2069_v27 }
 0x22d   :  { %3262 = vmatprep.mubr.f32.mxu1 %v2079_v45  ;;  %3552 = vmatmul.mubr.msk.f32.gmra.mrb[68].mxu0 %vm444_vm0, %v2071_v37 }
 0x22e   :  { %3471 = vmatprep.mubr.f32.mxu0 %v6704_v62 }
 0x230   :  { %3263 = vmatmul.mubr.f32.gmra.mrb[70].mxu1 %v2078_v57 }
 0x231   :  { %v7024_v60 = vpop.f32.mrb[16].mxu1  ;;  %3553 = vmatmul.mubr.msk.f32.gmra.mrb[70].mxu0 %vm444_vm0, %v2080_v24 }
 0x232   :  { %v7027_v18 = vpop.f32.mrb[17].mxu1 }
 0x23d   :  { %v7029_v9 = vpop.f32.mrb[18].mxu1 }
 0x23e   :  { %v7031_v28 = vpop.f32.mrb[19].mxu1 }
 0x249   :  { %v7033_v33 = vpop.f32.mrb[20].mxu1 }
 0x24a   :  { %v7035_v10 = vpop.f32.mrb[21].mxu1 }
 0x255   :  { %v7037_v23 = vpop.f32.mrb[22].mxu1 }
 0x256   :  { %v7039_v30 = vpop.f32.mrb[23].mxu1 }
 0x262   :  { %v2780_v62 = vpop.f32.mrb[24].mxu1 }
 0x263   :  { %v7042_v31 = vadd.f32 %v6724_v51, %v2780_v62  ;;  %v2782_v21 = vpop.f32.mrb[25].mxu1 }
 0x264   :  { %v7045_v50 = vadd.f32 %v6729_v49, %v2782_v21  ;;  %v3335_v29 = vpop.f32.mrb[0].mxu0 }
 0x265   :  { %v3866_v7 = vadd.f32 %v3335_v29, %v6910_v36  ;;  %v3337_v17 = vpop.f32.mrb[1].mxu0 }
 0x266   :  { %v3867_v42 = vadd.f32 %v3337_v17, %v6915_v38 }
 0x267   :  { %3478 = vst [vmem:[%s7307_s2] sm:$0xff] %v3866_v7 }
 0x268   :  { %3479 = vst [vmem:[%s7307_s2 + $0x8] sm:$0xff] %v3867_v42 }
 0x26a   :  { %v2786_v51 = vpop.f32.mrb[26].mxu1 }
 0x26b   :  { %v7056_v55 = vadd.f32 %v6745_v46, %v2786_v51  ;;  %v2788_v49 = vpop.f32.mrb[27].mxu1 }
 0x26c   :  { %v7059_v19 = vadd.f32 %v6748_v44, %v2788_v49  ;;  %v3341_v36 = vpop.f32.mrb[2].mxu0 }
 0x26d   :  { %v3868_v2 = vadd.f32 %v3341_v36, %v6921_v59  ;;  %v3343_v38 = vpop.f32.mrb[3].mxu0 }
 0x26e   :  { %v3869_v27 = vadd.f32 %v3343_v38, %v6924_v32 }
 0x26f   :  { %3480 = vst [vmem:[%s7307_s2 + $0x10] sm:$0xff] %v3868_v2 }
 0x270   :  { %3481 = vst [vmem:[%s7307_s2 + $0x18] sm:$0xff] %v3869_v27 }
 0x272   :  { %v2792_v46 = vpop.f32.mrb[28].mxu1 }
 0x273   :  { %v7070_v45 = vadd.f32 %v6769_v11, %v2792_v46  ;;  %v2794_v44 = vpop.f32.mrb[29].mxu1 }
 0x274   :  { %v7073_v37 = vadd.f32 %v6772_v1, %v2794_v44  ;;  %v3347_v59 = vpop.f32.mrb[4].mxu0 }
 0x275   :  { %v3870_v57 = vadd.f32 %v3347_v59, %v6940_v39  ;;  %v3349_v32 = vpop.f32.mrb[5].mxu0 }
 0x276   :  { %v3871_v24 = vadd.f32 %v3349_v32, %v6945_v15 }
 0x277   :  { %3482 = vst [vmem:[%s7307_s2 + $0x20] sm:$0xff] %v3870_v57 }
 0x278   :  { %3483 = vst [vmem:[%s7307_s2 + $0x28] sm:$0xff] %v3871_v24 }
 0x27a   :  { %v2798_v11 = vpop.f32.mrb[30].mxu1 }
 0x27b   :  { %v7084_v62 = vadd.f32 %v6782_v14, %v2798_v11  ;;  %v2800_v1 = vpop.f32.mrb[31].mxu1 }
 0x27c   :  { %v7087_v21 = vadd.f32 %v6787_v0, %v2800_v1  ;;  %v3353_v39 = vpop.f32.mrb[6].mxu0 }
 0x27d   :  { %v3872_v29 = vadd.f32 %v3353_v39, %v6952_v20  ;;  %v3355_v15 = vpop.f32.mrb[7].mxu0 }
 0x27e   :  { %v3873_v7 = vadd.f32 %v3355_v15, %v6957_v53 }
 0x27f   :  { %3484 = vst [vmem:[%s7307_s2 + $0x30] sm:$0xff] %v3872_v29 }
 0x280   :  { %3485 = vst [vmem:[%s7307_s2 + $0x38] sm:$0xff] %v3873_v7 }
 0x282   :  { %v2804_v14 = vpop.f32.mrb[32].mxu1 }
 0x283   :  { %v7098_v17 = vadd.f32 %v6800_v25, %v2804_v14  ;;  %v2806_v0 = vpop.f32.mrb[33].mxu1 }
 0x284   :  { %v7101_v42 = vadd.f32 %v6805_v26, %v2806_v0  ;;  %v3359_v20 = vpop.f32.mrb[8].mxu0 }
 0x285   :  { %v3874_v51 = vadd.f32 %v3359_v20, %v6971_v16  ;;  %v3361_v53 = vpop.f32.mrb[9].mxu0 }
 0x286   :  { %v3875_v49 = vadd.f32 %v3361_v53, %v6974_v58 }
 0x287   :  { %3486 = vst [vmem:[%s7307_s2 + $0x40] sm:$0xff] %v3874_v51 }
 0x288   :  { %3487 = vst [vmem:[%s7307_s2 + $0x48] sm:$0xff] %v3875_v49 }
 0x28a   :  { %v2810_v25 = vpop.f32.mrb[34].mxu1 }
 0x28b   :  { %v7112_v36 = vadd.f32 %v6810_v12, %v2810_v25  ;;  %v2812_v26 = vpop.f32.mrb[35].mxu1 }
 0x28c   :  { %v7115_v2 = vadd.f32 %v6813_v61, %v2812_v26  ;;  %v3365_v16 = vpop.f32.mrb[10].mxu0 }
 0x28d   :  { %v3876_v38 = vadd.f32 %v3365_v16, %v6987_v3  ;;  %v3367_v58 = vpop.f32.mrb[11].mxu0 }
 0x28e   :  { %v3877_v27 = vadd.f32 %v3367_v58, %v6989_v48 }
 0x28f   :  { %3488 = vst [vmem:[%s7307_s2 + $0x50] sm:$0xff] %v3876_v38 }
 0x290   :  { %3489 = vst [vmem:[%s7307_s2 + $0x58] sm:$0xff] %v3877_v27 }
 0x292   :  { %v2816_v12 = vpop.f32.mrb[36].mxu1 }
 0x293   :  { %v7126_v46 = vadd.f32 %v6827_v56, %v2816_v12  ;;  %v2818_v61 = vpop.f32.mrb[37].mxu1 }
 0x294   :  { %v7129_v44 = vadd.f32 %v6830_v6, %v2818_v61  ;;  %v3371_v3 = vpop.f32.mrb[12].mxu0 }
 0x295   :  { %v3878_v59 = vadd.f32 %v3371_v3, %v7004_v43  ;;  %v3373_v48 = vpop.f32.mrb[13].mxu0 }
 0x296   :  { %v3879_v57 = vadd.f32 %v3373_v48, %v7007_v40 }
 0x297   :  { %3490 = vst [vmem:[%s7307_s2 + $0x60] sm:$0xff] %v3878_v59 }
 0x298   :  { %3491 = vst [vmem:[%s7307_s2 + $0x68] sm:$0xff] %v3879_v57 }
 0x29a   :  { %v2822_v56 = vpop.f32.mrb[38].mxu1 }
 0x29b   :  { %v7140_v32 = vadd.f32 %v6838_v22, %v2822_v56  ;;  %v2824_v6 = vpop.f32.mrb[39].mxu1 }
 0x29c   :  { %v7143_v24 = vadd.f32 %v6843_v4, %v2824_v6  ;;  %v3377_v43 = vpop.f32.mrb[14].mxu0 }
 0x29d   :  { %v3880_v11 = vadd.f32 %v3377_v43, %v7014_v8  ;;  %v3379_v40 = vpop.f32.mrb[15].mxu0 }
 0x29e   :  { %v3881_v1 = vadd.f32 %v3379_v40, %v7017_v13 }
 0x29f   :  { %3492 = vst [vmem:[%s7307_s2 + $0x70] sm:$0xff] %v3880_v11 }
 0x2a0   :  { %3493 = vst [vmem:[%s7307_s2 + $0x78] sm:$0xff] %v3881_v1 }
 0x2a2   :  { %v2828_v22 = vpop.f32.mrb[40].mxu1 }
 0x2a3   :  { %v7154_v39 = vadd.f32 %v6855_v63, %v2828_v22  ;;  %v2830_v4 = vpop.f32.mrb[41].mxu1 }
 0x2a4   :  { %v7157_v29 = vadd.f32 %v6860_v34, %v2830_v4  ;;  %v3383_v8 = vpop.f32.mrb[16].mxu0 }
 0x2a5   :  { %v3882_v15 = vadd.f32 %v3383_v8, %v7024_v60  ;;  %v3385_v13 = vpop.f32.mrb[17].mxu0 }
 0x2a6   :  { %v3883_v7 = vadd.f32 %v3385_v13, %v7027_v18 }
 0x2a7   :  { %3494 = vst [vmem:[%s7307_s2 + $0x80] sm:$0xff] %v3882_v15 }
 0x2a8   :  { %3495 = vst [vmem:[%s7307_s2 + $0x88] sm:$0xff] %v3883_v7 }
 0x2aa   :  { %v2834_v63 = vpop.f32.mrb[42].mxu1 }
 0x2ab   :  { %v7168_v14 = vadd.f32 %v6865_v47, %v2834_v63  ;;  %v2836_v34 = vpop.f32.mrb[43].mxu1 }
 0x2ac   :  { %v7171_v0 = vadd.f32 %v6868_v41, %v2836_v34  ;;  %v3389_v60 = vpop.f32.mrb[18].mxu0 }
 0x2ad   :  { %v3884_v20 = vadd.f32 %v3389_v60, %v7029_v9  ;;  %v3391_v18 = vpop.f32.mrb[19].mxu0 }
 0x2ae   :  { %v3885_v51 = vadd.f32 %v3391_v18, %v7031_v28 }
 0x2af   :  { %3496 = vst [vmem:[%s7307_s2 + $0x90] sm:$0xff] %v3884_v20 }
 0x2b0   :  { %3497 = vst [vmem:[%s7307_s2 + $0x98] sm:$0xff] %v3885_v51 }
 0x2b2   :  { %v2840_v47 = vpop.f32.mrb[44].mxu1 }
 0x2b3   :  { %v7182_v53 = vadd.f32 %v6882_v54, %v2840_v47  ;;  %v2842_v41 = vpop.f32.mrb[45].mxu1 }
 0x2b4   :  { %v7185_v49 = vadd.f32 %v6885_v52, %v2842_v41  ;;  %v3395_v9 = vpop.f32.mrb[20].mxu0 }
 0x2b5   :  { %v3886_v25 = vadd.f32 %v3395_v9, %v7033_v33  ;;  %v3397_v28 = vpop.f32.mrb[21].mxu0 }
 0x2b6   :  { %v3887_v26 = vadd.f32 %v3397_v28, %v7035_v10 }
 0x2b7   :  { %3498 = vst [vmem:[%s7307_s2 + $0xa0] sm:$0xff] %v3886_v25 }
 0x2b8   :  { %3499 = vst [vmem:[%s7307_s2 + $0xa8] sm:$0xff] %v3887_v26 }
 0x2ba   :  { %v2846_v54 = vpop.f32.mrb[46].mxu1 }
 0x2bb   :  { %v7196_v16 = vadd.f32 %v6893_v35, %v2846_v54  ;;  %v2848_v52 = vpop.f32.mrb[47].mxu1 }
 0x2bc   :  { %v7199_v38 = vadd.f32 %v6898_v5, %v2848_v52  ;;  %v3401_v33 = vpop.f32.mrb[22].mxu0 }
 0x2bd   :  { %v3888_v58 = vadd.f32 %v3401_v33, %v7037_v23  ;;  %v3403_v10 = vpop.f32.mrb[23].mxu0 }
 0x2be   :  { %v3889_v27 = vadd.f32 %v3403_v10, %v7039_v30 }
 0x2bf   :  { %3500 = vst [vmem:[%s7307_s2 + $0xb0] sm:$0xff] %v3888_v58 }
 0x2c0   :  { %3501 = vst [vmem:[%s7307_s2 + $0xb8] sm:$0xff] %v3889_v27 }
 0x2c1   :  { %v3198_v35 = vpop.f32.mrb[48].mxu1 }
 0x2c2   :  { %v3891_v12 = vadd.f32 %v7042_v31, %v3198_v35  ;;  %v3200_v61 = vpop.f32.mrb[49].mxu1 }
 0x2c3   :  { %v3894_v5 = vadd.f32 %v7045_v50, %v3200_v61 }
 0x2c4   :  { %v3407_v3 = vpop.f32.mrb[48].mxu0 }
 0x2c5   :  { %v3892_v59 = vadd.f32 %v3891_v12, %v3407_v3  ;;  %v3409_v23 = vpop.f32.mrb[49].mxu0 }
 0x2c6   :  { %v3895_v48 = vadd.f32 %v3894_v5, %v3409_v23 }
 0x2c7   :  { %3502 = vst [vmem:[%s7307_s2 + $0xc0] sm:$0xff] %v3892_v59 }
 0x2c8   :  { %3503 = vst [vmem:[%s7307_s2 + $0xc8] sm:$0xff] %v3895_v48 }
 0x2c9   :  { %v3204_v30 = vpop.f32.mrb[50].mxu1 }
 0x2ca   :  { %v3897_v57 = vadd.f32 %v7056_v55, %v3204_v30  ;;  %v3206_v56 = vpop.f32.mrb[51].mxu1 }
 0x2cb   :  { %v3900_v31 = vadd.f32 %v7059_v19, %v3206_v56 }
 0x2cc   :  { %v3413_v6 = vpop.f32.mrb[50].mxu0 }
 0x2cd   :  { %v3898_v50 = vadd.f32 %v3897_v57, %v3413_v6  ;;  %v3415_v43 = vpop.f32.mrb[51].mxu0 }
 0x2ce   :  { %v3901_v11 = vadd.f32 %v3900_v31, %v3415_v43 }
 0x2cf   :  { %3504 = vst [vmem:[%s7307_s2 + $0xd0] sm:$0xff] %v3898_v50 }
 0x2d0   :  { %3505 = vst [vmem:[%s7307_s2 + $0xd8] sm:$0xff] %v3901_v11 }
 0x2d1   :  { %v3210_v40 = vpop.f32.mrb[52].mxu1 }
 0x2d2   :  { %v3903_v1 = vadd.f32 %v7070_v45, %v3210_v40  ;;  %v3212_v22 = vpop.f32.mrb[53].mxu1 }
 0x2d3   :  { %v3906_v55 = vadd.f32 %v7073_v37, %v3212_v22 }
 0x2d4   :  { %v3419_v4 = vpop.f32.mrb[52].mxu0 }
 0x2d5   :  { %v3904_v19 = vadd.f32 %v3903_v1, %v3419_v4  ;;  %v3421_v8 = vpop.f32.mrb[53].mxu0 }
 0x2d6   :  { %v3907_v15 = vadd.f32 %v3906_v55, %v3421_v8 }
 0x2d7   :  { %3506 = vst [vmem:[%s7307_s2 + $0xe0] sm:$0xff] %v3904_v19 }
 0x2d8   :  { %3507 = vst [vmem:[%s7307_s2 + $0xe8] sm:$0xff] %v3907_v15 }
 0x2d9   :  { %v3216_v13 = vpop.f32.mrb[54].mxu1 }
 0x2da   :  { %v3909_v7 = vadd.f32 %v7084_v62, %v3216_v13  ;;  %v3218_v63 = vpop.f32.mrb[55].mxu1 }
 0x2db   :  { %v3912_v45 = vadd.f32 %v7087_v21, %v3218_v63 }
 0x2dc   :  { %v3425_v34 = vpop.f32.mrb[54].mxu0 }
 0x2dd   :  { %v3910_v37 = vadd.f32 %v3909_v7, %v3425_v34  ;;  %v3427_v60 = vpop.f32.mrb[55].mxu0 }
 0x2de   :  { %v3913_v20 = vadd.f32 %v3912_v45, %v3427_v60 }
 0x2df   :  { %3508 = vst [vmem:[%s7307_s2 + $0xf0] sm:$0xff] %v3910_v37 }
 0x2e0   :  { %3509 = vst [vmem:[%s7307_s2 + $0xf8] sm:$0xff] %v3913_v20 }
 0x2e1   :  { %v3222_v18 = vpop.f32.mrb[56].mxu1 }
 0x2e2   :  { %v3915_v51 = vadd.f32 %v7098_v17, %v3222_v18  ;;  %v3224_v47 = vpop.f32.mrb[57].mxu1 }
 0x2e3   :  { %v3918_v62 = vadd.f32 %v7101_v42, %v3224_v47 }
 0x2e4   :  { %v3431_v41 = vpop.f32.mrb[56].mxu0 }
 0x2e5   :  { %v3916_v21 = vadd.f32 %v3915_v51, %v3431_v41  ;;  %v3433_v9 = vpop.f32.mrb[57].mxu0 }
 0x2e6   :  { %v3919_v25 = vadd.f32 %v3918_v62, %v3433_v9 }
 0x2e7   :  { %3510 = vst [vmem:[%s7307_s2 + $0x100] sm:$0xff] %v3916_v21 }
 0x2e8   :  { %3511 = vst [vmem:[%s7307_s2 + $0x108] sm:$0xff] %v3919_v25 }
 0x2e9   :  { %v3228_v28 = vpop.f32.mrb[58].mxu1 }
 0x2ea   :  { %v3921_v26 = vadd.f32 %v7112_v36, %v3228_v28  ;;  %v3230_v54 = vpop.f32.mrb[59].mxu1 }
 0x2eb   :  { %v3924_v17 = vadd.f32 %v7115_v2, %v3230_v54 }
 0x2ec   :  { %v3437_v52 = vpop.f32.mrb[58].mxu0 }
 0x2ed   :  { %v3922_v42 = vadd.f32 %v3921_v26, %v3437_v52  ;;  %v3439_v33 = vpop.f32.mrb[59].mxu0 }
 0x2ee   :  { %v3925_v58 = vadd.f32 %v3924_v17, %v3439_v33 }
 0x2ef   :  { %v3234_v10 = vpop.f32.mrb[60].mxu1  ;;  %3512 = vst [vmem:[%s7307_s2 + $0x110] sm:$0xff] %v3922_v42 }
 0x2f0   :  { %v3927_v27 = vadd.f32 %v7126_v46, %v3234_v10  ;;  %v3236_v35 = vpop.f32.mrb[61].mxu1  ;;  %3513 = vst [vmem:[%s7307_s2 + $0x118] sm:$0xff] %v3925_v58  ;;  %v3443_v12 = vpop.f32.mrb[60].mxu0 }
 0x2f1   :  { %v3930_v36 = vadd.f32 %v7129_v44, %v3236_v35  ;;  %v3445_v61 = vpop.f32.mrb[61].mxu0 }
 0x2f2   :  { %v3928_v2 = vadd.f32 %v3927_v27, %v3443_v12 }
 0x2f3   :  { %v3931_v5 = vadd.f32 %v3930_v36, %v3445_v61  ;;  %v3240_v3 = vpop.f32.mrb[62].mxu1 }
 0x2f4   :  { %3514 = vst [vmem:[%s7307_s2 + $0x120] sm:$0xff] %v3928_v2  ;;  %v3933_v59 = vadd.f32 %v7140_v32, %v3240_v3  ;;  %v3242_v23 = vpop.f32.mrb[63].mxu1  ;;  %v3449_v48 = vpop.f32.mrb[62].mxu0 }
 0x2f5   :  { %3515 = vst [vmem:[%s7307_s2 + $0x128] sm:$0xff] %v3931_v5  ;;  %v3936_v46 = vadd.f32 %v7143_v24, %v3242_v23  ;;  %v3451_v30 = vpop.f32.mrb[63].mxu0 }
 0x2f6   :  { %v3934_v44 = vadd.f32 %v3933_v59, %v3449_v48 }
 0x2f7   :  { %v3937_v57 = vadd.f32 %v3936_v46, %v3451_v30  ;;  %v3246_v56 = vpop.f32.mrb[64].mxu1 }
 0x2f8   :  { %3516 = vst [vmem:[%s7307_s2 + $0x130] sm:$0xff] %v3934_v44  ;;  %v3939_v31 = vadd.f32 %v7154_v39, %v3246_v56  ;;  %v3248_v6 = vpop.f32.mrb[65].mxu1  ;;  %v3455_v50 = vpop.f32.mrb[64].mxu0 }
 0x2f9   :  { %3517 = vst [vmem:[%s7307_s2 + $0x138] sm:$0xff] %v3937_v57  ;;  %v3942_v32 = vadd.f32 %v7157_v29, %v3248_v6  ;;  %v3457_v43 = vpop.f32.mrb[65].mxu0 }
 0x2fa   :  { %v3940_v24 = vadd.f32 %v3939_v31, %v3455_v50 }
 0x2fb   :  { %v3943_v11 = vadd.f32 %v3942_v32, %v3457_v43  ;;  %v3252_v40 = vpop.f32.mrb[66].mxu1 }
 0x2fc   :  { %3518 = vst [vmem:[%s7307_s2 + $0x140] sm:$0xff] %v3940_v24  ;;  %v3945_v1 = vadd.f32 %v7168_v14, %v3252_v40  ;;  %v3254_v22 = vpop.f32.mrb[67].mxu1  ;;  %v3461_v55 = vpop.f32.mrb[66].mxu0 }
 0x2fd   :  { %3519 = vst [vmem:[%s7307_s2 + $0x148] sm:$0xff] %v3943_v11  ;;  %v3948_v39 = vadd.f32 %v7171_v0, %v3254_v22  ;;  %v3463_v4 = vpop.f32.mrb[67].mxu0 }
 0x2fe   :  { %v3946_v29 = vadd.f32 %v3945_v1, %v3461_v55 }
 0x2ff   :  { %v3949_v19 = vadd.f32 %v3948_v39, %v3463_v4  ;;  %v3258_v8 = vpop.f32.mrb[68].mxu1 }
 0x300   :  { %3520 = vst [vmem:[%s7307_s2 + $0x150] sm:$0xff] %v3946_v29  ;;  %v3951_v15 = vadd.f32 %v7182_v53, %v3258_v8  ;;  %v3260_v13 = vpop.f32.mrb[69].mxu1  ;;  %v3467_v7 = vpop.f32.mrb[68].mxu0 }
 0x301   :  { %3521 = vst [vmem:[%s7307_s2 + $0x158] sm:$0xff] %v3949_v19  ;;  %v3954_v14 = vadd.f32 %v7185_v49, %v3260_v13  ;;  %v3469_v63 = vpop.f32.mrb[69].mxu0 }
 0x302   :  { %v3952_v0 = vadd.f32 %v3951_v15, %v3467_v7 }
 0x303   :  { %v3955_v45 = vadd.f32 %v3954_v14, %v3469_v63  ;;  %v3264_v34 = vpop.f32.mrb[70].mxu1 }
 0x304   :  { %3522 = vst [vmem:[%s7307_s2 + $0x160] sm:$0xff] %v3952_v0  ;;  %v3957_v37 = vadd.f32 %v7196_v16, %v3264_v34  ;;  %v3266_v60 = vpop.f32.mrb[71].mxu1  ;;  %v3473_v20 = vpop.f32.mrb[70].mxu0 }
 0x305   :  { %3523 = vst [vmem:[%s7307_s2 + $0x168] sm:$0xff] %v3955_v45  ;;  %v3960_v53 = vadd.f32 %v7199_v38, %v3266_v60  ;;  %v3475_v18 = vpop.f32.mrb[71].mxu0 }
 0x306   :  { %v3958_v49 = vadd.f32 %v3957_v37, %v3473_v20 }
 0x307   :  { %v3961_v51 = vadd.f32 %v3960_v53, %v3475_v18 }
 0x308   :  { %3524 = vst [vmem:[%s7307_s2 + $0x170] sm:$0xff] %v3958_v49 }
 0x309   :  { %3525 = vst [vmem:[%s7307_s2 + $0x178] sm:$0xff] %v3961_v51 }

</bundles_post_ra>
